<compile_context>
chip_gen: v7x
topology: tpu7x:2x2x1
jax: 0.10.0
libtpu: 0.0.40
codegen_flags: <defaults>
</compile_context>

<pallas_src>
import functools

import jax
import jax.numpy as jnp
import numpy as np
from jax import lax
from jax.experimental import pallas as pl
from jax.experimental.pallas import tpu as pltpu


def _round_up(x, m):
    return (x + m - 1) // m * m


# -----------------------------------------------------------------------------
# Pallas kernel: one grid step = one (batch block, time block) of the LSTM.
# -----------------------------------------------------------------------------
def _lstm_block_kernel(x_ref, wih_ref, whh_ref, bias_ref, out_ref,
                       h_scr, c_scr, xg_scr, *,
                       t_blk, seq_len, last_only, unroll):
    """x_ref   : (t_blk, Bp, Dp)  raw input block (compute dtype, e.g. bf16)
       wih_ref : (Dp, 4Hp)        input weights, resident in VMEM
       whh_ref : (Hp, 4Hp)        recurrent weights, resident in VMEM
       bias_ref: (1, 4Hp)         b_ih + b_hh (f32), resident
       out_ref : (t_blk, Bp, Hp)  hidden sequence block   (last_only=False)
                 (Bp, Hp)         final hidden state      (last_only=True)
       h_scr, c_scr : (Bp, Hp) f32 state carried across the time grid axis
       xg_scr  : (t_blk, Bp, 4Hp) f32 gate-input slab for this block
    """
    tb = pl.program_id(1)                      # time-block index (sequential)
    Hp = whh_ref.shape[0]
    H4 = whh_ref.shape[1]
    Bp = h_scr.shape[0]

    @pl.when(tb == 0)
    def _():
        # PyTorch default: zero initial hidden / cell state (per batch block).
        h_scr[...] = jnp.zeros_like(h_scr)
        c_scr[...] = jnp.zeros_like(c_scr)

    # ---- Prologue: blocked input projection, one large MXU matmul per block.
    # Still hoisted out of the per-timestep loop, just computed block-by-block
    # so the (T, B, 4H) f32 slab never touches HBM.
    x_blk = x_ref[...].reshape(t_blk * Bp, x_ref.shape[-1])
    xg = jnp.dot(x_blk, wih_ref[...], preferred_element_type=jnp.float32)
    xg = xg + bias_ref[...]                          # (1, 4Hp) broadcast, f32
    xg_scr[...] = xg.reshape(t_blk, Bp, H4)

    w_hh = whh_ref[...]                              # resident, loaded once
    t0 = tb * t_blk

    def sigmoid(z):
        # tanh form keeps all transcendentals on the EUP slot (no VPU divide).
        return 0.5 * (jnp.tanh(0.5 * z) + 1.0)

    def step(tt, carry):
        h_prev, c_prev = carry
        # Only the recurrent matmul remains on the sequential path.
        gates = xg_scr[tt] + jnp.dot(h_prev.astype(w_hh.dtype), w_hh,
                                     preferred_element_type=jnp.float32)
        i = sigmoid(gates[:, 0 * Hp:1 * Hp])         # 128-aligned lane slices
        f = sigmoid(gates[:, 1 * Hp:2 * Hp])
        g = jnp.tanh(gates[:, 2 * Hp:3 * Hp])
        o = sigmoid(gates[:, 3 * Hp:4 * Hp])
        c = f * c_prev + i * g
        h = o * jnp.tanh(c)
        # Remainder masking: a padded timestep is NOT an identity step
        # (h @ W_hh would still update the state), so mask the carries.
        valid = (t0 + tt) < seq_len
        h = jnp.where(valid, h, h_prev)
        c = jnp.where(valid, c, c_prev)
        if not last_only:
            out_ref[tt] = h.astype(out_ref.dtype)
        return h, c

    h, c = lax.fori_loop(0, t_blk, step, (h_scr[...], c_scr[...]),
                         unroll=unroll)
    h_scr[...] = h
    c_scr[...] = c

    if last_only:
        # Constant output block index over the time axis -> stays resident in
        # VMEM; write only on the final time block, single HBM writeback.
        @pl.when(tb == pl.num_programs(1) - 1)
        def _():
            out_ref[...] = h.astype(out_ref.dtype)


# -----------------------------------------------------------------------------
# One LSTM layer (padded, time-major).
# -----------------------------------------------------------------------------
def lstm_layer_pallas(x_tm, seq_len, w_ih, w_hh, bias, *, last_only,
                      t_blk, b_blk=None, compute_dtype=jnp.bfloat16,
                      unroll=8):
    """x_tm : (T_pad, B_pad, D_pad) time-major, padded, compute_dtype
       w_ih : (D_pad, 4*H_pad)      padded input weights (compute_dtype)
       w_hh : (H_pad, 4*H_pad)      padded recurrent weights (compute_dtype)
       bias : (1, 4*H_pad)          padded b_ih + b_hh (f32)
       Returns (T_pad, B_pad, H_pad) compute_dtype, or (B_pad, H_pad) f32 if
       last_only.
    """
    T_pad, B_pad, D_pad = x_tm.shape
    H_pad = w_hh.shape[0]
    H4 = w_hh.shape[1]
    assert T_pad % t_blk == 0 and B_pad % 8 == 0 and H_pad % 128 == 0

    if b_blk is None:
        b_blk = B_pad            # set b_blk = B_pad // 2 to split across v7x TCs
    n_bb = B_pad // b_blk
    n_tb = T_pad // t_blk

    kernel = functools.partial(_lstm_block_kernel,
                               t_blk=t_blk, seq_len=seq_len,
                               last_only=last_only,
                               unroll=min(unroll, t_blk))

    if last_only:
        out_shape = jax.ShapeDtypeStruct((B_pad, H_pad), jnp.float32)
        out_specs = pl.BlockSpec((b_blk, H_pad), lambda b, t: (b, 0))
        out_elems = b_blk * H_pad
        out_itemsize = 4
    else:
        out_shape = jax.ShapeDtypeStruct((T_pad, B_pad, H_pad), compute_dtype)
        out_specs = pl.BlockSpec((t_blk, b_blk, H_pad), lambda b, t: (t, b, 0))
        out_elems = t_blk * b_blk * H_pad
        out_itemsize = jnp.dtype(compute_dtype).itemsize

    grid_spec = pltpu.PrefetchScalarGridSpec(
        num_scalar_prefetch=0,
        grid=(n_bb, n_tb),
        in_specs=[
            pl.BlockSpec((t_blk, b_blk, D_pad), lambda b, t: (t, b, 0)),  # x
            pl.BlockSpec((D_pad, H4), lambda b, t: (0, 0)),   # W_ih, resident
            pl.BlockSpec((H_pad, H4), lambda b, t: (0, 0)),   # W_hh, resident
            pl.BlockSpec((1, H4), lambda b, t: (0, 0)),       # bias, resident
        ],
        out_specs=out_specs,
        scratch_shapes=[
            pltpu.VMEM((b_blk, H_pad), jnp.float32),          # h carry
            pltpu.VMEM((b_blk, H_pad), jnp.float32),          # c carry
            pltpu.VMEM((t_blk, b_blk, H4), jnp.float32),      # gate-input slab
        ],
    )

    # Rough VMEM budget; raise the scoped limit only when the default (32 MiB)
    # would be exceeded (e.g. large H).  Weights are bf16 so residency is 2x
    # cheaper than f32.
    w_itemsize = jnp.dtype(compute_dtype).itemsize
    vmem_est = (
        2 * t_blk * b_blk * D_pad * w_itemsize          # x double buffer
        + 2 * (D_pad + H_pad) * H4 * w_itemsize         # resident weights
        + 2 * H4 * 4                                    # bias
        + t_blk * b_blk * H4 * 4                        # xg scratch
        + 2 * b_blk * H_pad * 4                         # h/c scratch
        + 2 * out_elems * out_itemsize                  # output buffers
    )
    cp_kwargs = dict(dimension_semantics=("parallel", "arbitrary"))
    if vmem_est > (32 << 20):
        cp_kwargs["vmem_limit_bytes"] = min(int(vmem_est * 5 // 4), 128 << 20)

    return pl.pallas_call(
        kernel,
        out_shape=out_shape,
        grid_spec=grid_spec,
        compiler_params=pltpu.CompilerParams(**cp_kwargs),
    )(x_tm, w_ih, w_hh, bias)


# -----------------------------------------------------------------------------
# Padding helpers (gate-aware: each of the i/f/g/o blocks is padded H -> H_pad).
# -----------------------------------------------------------------------------
def _pad_gate_cols(m, H, H_pad):
    """(rows, 4H) -> (rows, 4*H_pad), each gate slice placed at k*H_pad."""
    parts = []
    for k in range(4):
        g = m[..., k * H:(k + 1) * H]
        pad = [(0, 0)] * (m.ndim - 1) + [(0, H_pad - H)]
        parts.append(jnp.pad(g, pad))
    return jnp.concatenate(parts, axis=-1)


def _pad_weight(w, rows_pad, H, H_pad):
    w = _pad_gate_cols(w, H, H_pad)
    return jnp.pad(w, ((0, rows_pad - w.shape[0]), (0, 0)))


# -----------------------------------------------------------------------------
# ManyToOneRNN forward: stacked LSTM, return last layer's final hidden state.
# -----------------------------------------------------------------------------
@functools.partial(jax.jit,
                   static_argnames=("compute_dtype", "t_blk_target", "b_blk"))
def many_to_one_rnn_forward(x_btd, params, *, compute_dtype=jnp.bfloat16,
                            t_blk_target=64, b_blk=None):
    """x_btd: (B, T, input_size) batch-first, like the PyTorch module.
       params: list of (w_ih (D,4H), w_hh (H,4H), bias (4H,)) per layer.
       Returns (B, H) == h_n[-1]."""
    B, T, D = x_btd.shape
    H = params[0][1].shape[0]

    B_pad = _round_up(max(B, 8), 8)
    H_pad = _round_up(max(H, 128), 128)
    D_pad = _round_up(max(D, 128), 128)

    t_blk = min(t_blk_target, T)
    n_blk = pl.cdiv(T, t_blk)
    T_pad = n_blk * t_blk

    # Time-major; pad time / batch / feature.  Padded lanes stay exactly zero
    # through every layer (zero-padded weights + zero init), padded batch rows
    # and timesteps are masked / sliced off.
    h = jnp.transpose(x_btd, (1, 0, 2)).astype(compute_dtype)
    h = jnp.pad(h, ((0, T_pad - T), (0, B_pad - B), (0, D_pad - D)))

    n_layers = len(params)
    for idx, (w_ih, w_hh, bias) in enumerate(params):
        d_in = w_ih.shape[0]
        d_in_pad = _round_up(max(d_in, 128), 128)
        w_ih_p = _pad_weight(w_ih, d_in_pad, H, H_pad).astype(compute_dtype)
        w_hh_p = _pad_weight(w_hh, H_pad, H, H_pad).astype(compute_dtype)
        bias_p = _pad_gate_cols(bias.reshape(1, 4 * H).astype(jnp.float32),
                                H, H_pad)
        last = idx == n_layers - 1
        h = lstm_layer_pallas(h, T, w_ih_p, w_hh_p, bias_p,
                              last_only=last, t_blk=t_blk, b_blk=b_blk,
                              compute_dtype=compute_dtype)
    return h[:B, :H]   # (B, H)


# -----------------------------------------------------------------------------
# Deterministic parameter initialization (PyTorch-style uniform(-k, k)).
# -----------------------------------------------------------------------------
def init_lstm_params(key, input_size, hidden_size, num_layers):
    params = []
    k = 1.0 / np.sqrt(hidden_size)
    for layer in range(num_layers):
        d_in = input_size if layer == 0 else hidden_size
        key, k1, k2, k3, k4 = jax.random.split(key, 5)
        # PyTorch stores (4H, D); we keep transposed layout (D, 4H) for x @ W.
        w_ih = jax.random.uniform(k1, (d_in, 4 * hidden_size), jnp.float32, -k, k)
        w_hh = jax.random.uniform(k2, (hidden_size, 4 * hidden_size), jnp.float32, -k, k)
        b_ih = jax.random.uniform(k3, (4 * hidden_size,), jnp.float32, -k, k)
        b_hh = jax.random.uniform(k4, (4 * hidden_size,), jnp.float32, -k, k)
        params.append((w_ih, w_hh, b_ih + b_hh))
    return params


# -----------------------------------------------------------------------------
# Pure-JAX reference (for a correctness cross-check).
# -----------------------------------------------------------------------------
def reference_forward(x_btd, params, hidden_size):
    h_in = jnp.transpose(x_btd, (1, 0, 2))  # (T, B, D)
    B = x_btd.shape[0]
    H = hidden_size
    for (w_ih, w_hh, bias) in params:
        def step(carry, x_t):
            h_prev, c_prev = carry
            gates = x_t @ w_ih + h_prev @ w_hh + bias
            i = jax.nn.sigmoid(gates[:, 0 * H:1 * H])
            f = jax.nn.sigmoid(gates[:, 1 * H:2 * H])
            g = jnp.tanh(gates[:, 2 * H:3 * H])
            o = jax.nn.sigmoid(gates[:, 3 * H:4 * H])
            c = f * c_prev + i * g
            h = o * jnp.tanh(c)
            return (h, c), h

        init = (jnp.zeros((B, H), jnp.float32), jnp.zeros((B, H), jnp.float32))
        _, h_seq = lax.scan(step, init, h_in)
        h_in = h_seq
    return h_in[-1]


if __name__ == "__main__":
    batch, seq_len, input_size, hidden_size, num_layers = 2, 8, 16, 32, 2

    key = jax.random.PRNGKey(0)
    key_x, key_p = jax.random.split(key)
    x = jax.random.normal(key_x, (batch, seq_len, input_size), dtype=jnp.float32)
    params = init_lstm_params(key_p, input_size, hidden_size, num_layers)

    ref = reference_forward(x, params, hidden_size)

    # Exact-math sanity check: f32 matmul operands.
    out_f32 = jax.block_until_ready(
        many_to_one_rnn_forward(x, params, compute_dtype=jnp.float32))
    np.testing.assert_allclose(np.asarray(out_f32), np.asarray(ref),
                               rtol=1e-3, atol=1e-4)
    assert out_f32.shape == (batch, hidden_size)

    # Production path: bf16 matmul operands (MXU-native), f32 accumulation.
    out_bf16 = jax.block_until_ready(
        many_to_one_rnn_forward(x, params, compute_dtype=jnp.bfloat16))
    np.testing.assert_allclose(np.asarray(out_bf16), np.asarray(ref),
                               rtol=5e-2, atol=5e-2)
    assert out_bf16.shape == (batch, hidden_size)

    print("KERNEL_OK")
</pallas_src>

<mosaic_0001>
module attributes {stable_mosaic.version = 11 : i64} {
  func.func @_lstm_block_kernel(%arg0: i32, %arg1: i32, %arg2: memref<8x8x128xf32, #tpu.memory_space<vmem>>, %arg3: memref<128x512xf32, #tpu.memory_space<vmem>>, %arg4: memref<128x512xf32, #tpu.memory_space<vmem>>, %arg5: memref<1x512xf32, #tpu.memory_space<vmem>>, %arg6: memref<8x8x128xf32, #tpu.memory_space<vmem>>, %arg7: memref<8x128xf32, #tpu.memory_space<vmem>>, %arg8: memref<8x128xf32, #tpu.memory_space<vmem>>, %arg9: memref<8x8x512xf32, #tpu.memory_space<vmem>>) attributes {dimension_semantics = [#tpu.dimension_semantics<parallel>, #tpu.dimension_semantics<arbitrary>], iteration_bounds = array<i64: 1, 1>, scalar_prefetch = 0 : i64, scratch_operands = 3 : i64, tpu.core_type = #tpu.core_type<tc>, window_params = [{transform_indices = @transform_0, window_bounds = array<i64: 8, 8, 128>}, {pipeline_mode = #tpu.pipeline_mode<synchronous>, transform_indices = @transform_1, window_bounds = array<i64: 128, 512>}, {pipeline_mode = #tpu.pipeline_mode<synchronous>, transform_indices = @transform_2, window_bounds = array<i64: 128, 512>}, {pipeline_mode = #tpu.pipeline_mode<synchronous>, transform_indices = @transform_3, window_bounds = array<i64: 1, 512>}, {transform_indices = @transform_4, window_bounds = array<i64: 8, 8, 128>}]} {
    %c0_i32 = arith.constant 0 : i32
    %0 = arith.cmpi eq, %arg1, %c0_i32 : i32
    %1 = arith.extui %0 : i1 to i32
    %c0_i32_0 = arith.constant 0 : i32
    %2 = arith.cmpi ne, %1, %c0_i32_0 : i32
    scf.if %2 {
      %cst_142 = arith.constant 0.000000e+00 : f32
      %370 = vector.broadcast %cst_142 : f32 to vector<8x128xf32>
      %c0_143 = arith.constant 0 : index
      %c0_144 = arith.constant 0 : index
      %371 = vector.load %arg7[%c0_143, %c0_144] : memref<8x128xf32, #tpu.memory_space<vmem>>, vector<8x128xf32>
      tpu.vector_store %arg7[%c0_143, %c0_144], %370 {strides = array<i32>} : memref<8x128xf32, #tpu.memory_space<vmem>>, vector<8x128xf32>,
      %cst_145 = arith.constant 0.000000e+00 : f32
      %372 = vector.broadcast %cst_145 : f32 to vector<8x128xf32>
      %c0_146 = arith.constant 0 : index
      %c0_147 = arith.constant 0 : index
      %373 = vector.load %arg8[%c0_146, %c0_147] : memref<8x128xf32, #tpu.memory_space<vmem>>, vector<8x128xf32>
      tpu.vector_store %arg8[%c0_146, %c0_147], %372 {strides = array<i32>} : memref<8x128xf32, #tpu.memory_space<vmem>>, vector<8x128xf32>,
    } else {
    }
    %c0 = arith.constant 0 : index
    %c0_1 = arith.constant 0 : index
    %c0_2 = arith.constant 0 : index
    %3 = vector.load %arg2[%c0, %c0_1, %c0_2] : memref<8x8x128xf32, #tpu.memory_space<vmem>>, vector<8x8x128xf32>
    %4 = vector.shape_cast %3 : vector<8x8x128xf32> to vector<64x128xf32>
    %c0_3 = arith.constant 0 : index
    %c0_4 = arith.constant 0 : index
    %5 = vector.load %arg3[%c0_3, %c0_4] : memref<128x512xf32, #tpu.memory_space<vmem>>, vector<128x512xf32>
    %cst = arith.constant dense<0.000000e+00> : vector<64x512xf32>
    %6 = tpu.matmul %4, %5, %cst {dimension_numbers = #tpu.dot_dimension_numbers<[1], [0], [0], [1], [0, 0, 1, 1], [], []>} : vector<64x128xf32>, vector<128x512xf32>, vector<64x512xf32> -> vector<64x512xf32>
    %c0_5 = arith.constant 0 : index
    %c0_6 = arith.constant 0 : index
    %7 = vector.load %arg5[%c0_5, %c0_6] : memref<1x512xf32, #tpu.memory_space<vmem>>, vector<1x512xf32>
    %8 = vector.broadcast %7 : vector<1x512xf32> to vector<64x512xf32>
    %9 = arith.addf %6, %8 : vector<64x512xf32>
    %10 = vector.shape_cast %9 : vector<64x512xf32> to vector<8x8x512xf32>
    %c0_7 = arith.constant 0 : index
    %c0_8 = arith.constant 0 : index
    %c0_9 = arith.constant 0 : index
    %11 = vector.load %arg9[%c0_7, %c0_8, %c0_9] : memref<8x8x512xf32, #tpu.memory_space<vmem>>, vector<8x8x512xf32>
    tpu.vector_store %arg9[%c0_7, %c0_8, %c0_9], %10 {strides = array<i32>} : memref<8x8x512xf32, #tpu.memory_space<vmem>>, vector<8x8x512xf32>,
    %c0_10 = arith.constant 0 : index
    %c0_11 = arith.constant 0 : index
    %12 = vector.load %arg4[%c0_10, %c0_11] : memref<128x512xf32, #tpu.memory_space<vmem>>, vector<128x512xf32>
    %c8_i32 = arith.constant 8 : i32
    %13 = arith.muli %arg1, %c8_i32 : i32
    %c0_12 = arith.constant 0 : index
    %c0_13 = arith.constant 0 : index
    %14 = vector.load %arg7[%c0_12, %c0_13] : memref<8x128xf32, #tpu.memory_space<vmem>>, vector<8x128xf32>
    %c0_14 = arith.constant 0 : index
    %c0_15 = arith.constant 0 : index
    %15 = vector.load %arg8[%c0_14, %c0_15] : memref<8x128xf32, #tpu.memory_space<vmem>>, vector<8x128xf32>
    %c0_i32_16 = arith.constant 0 : i32
    %16 = arith.index_cast %c0_i32_16 : i32 to index
    %c0_17 = arith.constant 0 : index
    %c0_18 = arith.constant 0 : index
    %17 = vector.load %arg9[%16, %c0_17, %c0_18] : memref<8x8x512xf32, #tpu.memory_space<vmem>>, vector<1x8x512xf32>
    %18 = vector.shape_cast %17 : vector<1x8x512xf32> to vector<8x512xf32>
    %cst_19 = arith.constant dense<0.000000e+00> : vector<8x512xf32>
    %19 = tpu.matmul %14, %12, %cst_19 {dimension_numbers = #tpu.dot_dimension_numbers<[1], [0], [0], [1], [0, 0, 1, 1], [], []>} : vector<8x128xf32>, vector<128x512xf32>, vector<8x512xf32> -> vector<8x512xf32>
    %20 = arith.addf %18, %19 : vector<8x512xf32>
    %21 = vector.extract_strided_slice %20 {offsets = [0, 0], sizes = [8, 128], strides = [1, 1]} : vector<8x512xf32> to vector<8x128xf32>
    %cst_20 = arith.constant 5.000000e-01 : f32
    %22 = vector.broadcast %cst_20 : f32 to vector<8x128xf32>
    %23 = arith.mulf %22, %21 : vector<8x128xf32>
    %24 = math.tanh %23 : vector<8x128xf32>
    %cst_21 = arith.constant 1.000000e+00 : f32
    %25 = vector.broadcast %cst_21 : f32 to vector<8x128xf32>
    %26 = arith.addf %24, %25 : vector<8x128xf32>
    %cst_22 = arith.constant 5.000000e-01 : f32
    %27 = vector.broadcast %cst_22 : f32 to vector<8x128xf32>
    %28 = arith.mulf %27, %26 : vector<8x128xf32>
    %29 = vector.extract_strided_slice %20 {offsets = [0, 128], sizes = [8, 128], strides = [1, 1]} : vector<8x512xf32> to vector<8x128xf32>
    %cst_23 = arith.constant 5.000000e-01 : f32
    %30 = vector.broadcast %cst_23 : f32 to vector<8x128xf32>
    %31 = arith.mulf %30, %29 : vector<8x128xf32>
    %32 = math.tanh %31 : vector<8x128xf32>
    %cst_24 = arith.constant 1.000000e+00 : f32
    %33 = vector.broadcast %cst_24 : f32 to vector<8x128xf32>
    %34 = arith.addf %32, %33 : vector<8x128xf32>
    %cst_25 = arith.constant 5.000000e-01 : f32
    %35 = vector.broadcast %cst_25 : f32 to vector<8x128xf32>
    %36 = arith.mulf %35, %34 : vector<8x128xf32>
    %37 = vector.extract_strided_slice %20 {offsets = [0, 256], sizes = [8, 128], strides = [1, 1]} : vector<8x512xf32> to vector<8x128xf32>
    %38 = math.tanh %37 : vector<8x128xf32>
    %39 = vector.extract_strided_slice %20 {offsets = [0, 384], sizes = [8, 128], strides = [1, 1]} : vector<8x512xf32> to vector<8x128xf32>
    %cst_26 = arith.constant 5.000000e-01 : f32
    %40 = vector.broadcast %cst_26 : f32 to vector<8x128xf32>
    %41 = arith.mulf %40, %39 : vector<8x128xf32>
    %42 = math.tanh %41 : vector<8x128xf32>
    %cst_27 = arith.constant 1.000000e+00 : f32
    %43 = vector.broadcast %cst_27 : f32 to vector<8x128xf32>
    %44 = arith.addf %42, %43 : vector<8x128xf32>
    %cst_28 = arith.constant 5.000000e-01 : f32
    %45 = vector.broadcast %cst_28 : f32 to vector<8x128xf32>
    %46 = arith.mulf %45, %44 : vector<8x128xf32>
    %47 = arith.mulf %36, %15 : vector<8x128xf32>
    %48 = arith.mulf %28, %38 : vector<8x128xf32>
    %49 = arith.addf %47, %48 : vector<8x128xf32>
    %50 = math.tanh %49 : vector<8x128xf32>
    %51 = arith.mulf %46, %50 : vector<8x128xf32>
    %52 = arith.addi %13, %c0_i32_16 : i32
    %c8_i32_29 = arith.constant 8 : i32
    %53 = arith.cmpi slt, %52, %c8_i32_29 : i32
    %54 = arith.select %53, %51, %14 : vector<8x128xf32>
    %55 = arith.select %53, %49, %15 : vector<8x128xf32>
    %56 = arith.index_cast %c0_i32_16 : i32 to index
    %c0_30 = arith.constant 0 : index
    %c0_31 = arith.constant 0 : index
    %57 = vector.load %arg6[%56, %c0_30, %c0_31] : memref<8x8x128xf32, #tpu.memory_space<vmem>>, vector<1x8x128xf32>
    %58 = vector.shape_cast %57 : vector<1x8x128xf32> to vector<8x128xf32>
    %59 = vector.shape_cast %54 : vector<8x128xf32> to vector<1x8x128xf32>
    tpu.vector_store %arg6[%56, %c0_30, %c0_31], %59 {strides = array<i32>} : memref<8x8x128xf32, #tpu.memory_space<vmem>>, vector<1x8x128xf32>,
    %c1_i32 = arith.constant 1 : i32
    %60 = arith.index_cast %c1_i32 : i32 to index
    %c0_32 = arith.constant 0 : index
    %c0_33 = arith.constant 0 : index
    %61 = vector.load %arg9[%60, %c0_32, %c0_33] : memref<8x8x512xf32, #tpu.memory_space<vmem>>, vector<1x8x512xf32>
    %62 = vector.shape_cast %61 : vector<1x8x512xf32> to vector<8x512xf32>
    %cst_34 = arith.constant dense<0.000000e+00> : vector<8x512xf32>
    %63 = tpu.matmul %54, %12, %cst_34 {dimension_numbers = #tpu.dot_dimension_numbers<[1], [0], [0], [1], [0, 0, 1, 1], [], []>} : vector<8x128xf32>, vector<128x512xf32>, vector<8x512xf32> -> vector<8x512xf32>
    %64 = arith.addf %62, %63 : vector<8x512xf32>
    %65 = vector.extract_strided_slice %64 {offsets = [0, 0], sizes = [8, 128], strides = [1, 1]} : vector<8x512xf32> to vector<8x128xf32>
    %cst_35 = arith.constant 5.000000e-01 : f32
    %66 = vector.broadcast %cst_35 : f32 to vector<8x128xf32>
    %67 = arith.mulf %66, %65 : vector<8x128xf32>
    %68 = math.tanh %67 : vector<8x128xf32>
    %cst_36 = arith.constant 1.000000e+00 : f32
    %69 = vector.broadcast %cst_36 : f32 to vector<8x128xf32>
    %70 = arith.addf %68, %69 : vector<8x128xf32>
    %cst_37 = arith.constant 5.000000e-01 : f32
    %71 = vector.broadcast %cst_37 : f32 to vector<8x128xf32>
    %72 = arith.mulf %71, %70 : vector<8x128xf32>
    %73 = vector.extract_strided_slice %64 {offsets = [0, 128], sizes = [8, 128], strides = [1, 1]} : vector<8x512xf32> to vector<8x128xf32>
    %cst_38 = arith.constant 5.000000e-01 : f32
    %74 = vector.broadcast %cst_38 : f32 to vector<8x128xf32>
    %75 = arith.mulf %74, %73 : vector<8x128xf32>
    %76 = math.tanh %75 : vector<8x128xf32>
    %cst_39 = arith.constant 1.000000e+00 : f32
    %77 = vector.broadcast %cst_39 : f32 to vector<8x128xf32>
    %78 = arith.addf %76, %77 : vector<8x128xf32>
    %cst_40 = arith.constant 5.000000e-01 : f32
    %79 = vector.broadcast %cst_40 : f32 to vector<8x128xf32>
    %80 = arith.mulf %79, %78 : vector<8x128xf32>
    %81 = vector.extract_strided_slice %64 {offsets = [0, 256], sizes = [8, 128], strides = [1, 1]} : vector<8x512xf32> to vector<8x128xf32>
    %82 = math.tanh %81 : vector<8x128xf32>
    %83 = vector.extract_strided_slice %64 {offsets = [0, 384], sizes = [8, 128], strides = [1, 1]} : vector<8x512xf32> to vector<8x128xf32>
    %cst_41 = arith.constant 5.000000e-01 : f32
    %84 = vector.broadcast %cst_41 : f32 to vector<8x128xf32>
    %85 = arith.mulf %84, %83 : vector<8x128xf32>
    %86 = math.tanh %85 : vector<8x128xf32>
    %cst_42 = arith.constant 1.000000e+00 : f32
    %87 = vector.broadcast %cst_42 : f32 to vector<8x128xf32>
    %88 = arith.addf %86, %87 : vector<8x128xf32>
    %cst_43 = arith.constant 5.000000e-01 : f32
    %89 = vector.broadcast %cst_43 : f32 to vector<8x128xf32>
    %90 = arith.mulf %89, %88 : vector<8x128xf32>
    %91 = arith.mulf %80, %55 : vector<8x128xf32>
    %92 = arith.mulf %72, %82 : vector<8x128xf32>
    %93 = arith.addf %91, %92 : vector<8x128xf32>
    %94 = math.tanh %93 : vector<8x128xf32>
    %95 = arith.mulf %90, %94 : vector<8x128xf32>
    %96 = arith.addi %13, %c1_i32 : i32
    %c8_i32_44 = arith.constant 8 : i32
    %97 = arith.cmpi slt, %96, %c8_i32_44 : i32
    %98 = arith.select %97, %95, %54 : vector<8x128xf32>
    %99 = arith.select %97, %93, %55 : vector<8x128xf32>
    %100 = arith.index_cast %c1_i32 : i32 to index
    %c0_45 = arith.constant 0 : index
    %c0_46 = arith.constant 0 : index
    %101 = vector.load %arg6[%100, %c0_45, %c0_46] : memref<8x8x128xf32, #tpu.memory_space<vmem>>, vector<1x8x128xf32>
    %102 = vector.shape_cast %101 : vector<1x8x128xf32> to vector<8x128xf32>
    %103 = vector.shape_cast %98 : vector<8x128xf32> to vector<1x8x128xf32>
    tpu.vector_store %arg6[%100, %c0_45, %c0_46], %103 {strides = array<i32>} : memref<8x8x128xf32, #tpu.memory_space<vmem>>, vector<1x8x128xf32>,
    %c2_i32 = arith.constant 2 : i32
    %104 = arith.index_cast %c2_i32 : i32 to index
    %c0_47 = arith.constant 0 : index
    %c0_48 = arith.constant 0 : index
    %105 = vector.load %arg9[%104, %c0_47, %c0_48] : memref<8x8x512xf32, #tpu.memory_space<vmem>>, vector<1x8x512xf32>
    %106 = vector.shape_cast %105 : vector<1x8x512xf32> to vector<8x512xf32>
    %cst_49 = arith.constant dense<0.000000e+00> : vector<8x512xf32>
    %107 = tpu.matmul %98, %12, %cst_49 {dimension_numbers = #tpu.dot_dimension_numbers<[1], [0], [0], [1], [0, 0, 1, 1], [], []>} : vector<8x128xf32>, vector<128x512xf32>, vector<8x512xf32> -> vector<8x512xf32>
    %108 = arith.addf %106, %107 : vector<8x512xf32>
    %109 = vector.extract_strided_slice %108 {offsets = [0, 0], sizes = [8, 128], strides = [1, 1]} : vector<8x512xf32> to vector<8x128xf32>
    %cst_50 = arith.constant 5.000000e-01 : f32
    %110 = vector.broadcast %cst_50 : f32 to vector<8x128xf32>
    %111 = arith.mulf %110, %109 : vector<8x128xf32>
    %112 = math.tanh %111 : vector<8x128xf32>
    %cst_51 = arith.constant 1.000000e+00 : f32
    %113 = vector.broadcast %cst_51 : f32 to vector<8x128xf32>
    %114 = arith.addf %112, %113 : vector<8x128xf32>
    %cst_52 = arith.constant 5.000000e-01 : f32
    %115 = vector.broadcast %cst_52 : f32 to vector<8x128xf32>
    %116 = arith.mulf %115, %114 : vector<8x128xf32>
    %117 = vector.extract_strided_slice %108 {offsets = [0, 128], sizes = [8, 128], strides = [1, 1]} : vector<8x512xf32> to vector<8x128xf32>
    %cst_53 = arith.constant 5.000000e-01 : f32
    %118 = vector.broadcast %cst_53 : f32 to vector<8x128xf32>
    %119 = arith.mulf %118, %117 : vector<8x128xf32>
    %120 = math.tanh %119 : vector<8x128xf32>
    %cst_54 = arith.constant 1.000000e+00 : f32
    %121 = vector.broadcast %cst_54 : f32 to vector<8x128xf32>
    %122 = arith.addf %120, %121 : vector<8x128xf32>
    %cst_55 = arith.constant 5.000000e-01 : f32
    %123 = vector.broadcast %cst_55 : f32 to vector<8x128xf32>
    %124 = arith.mulf %123, %122 : vector<8x128xf32>
    %125 = vector.extract_strided_slice %108 {offsets = [0, 256], sizes = [8, 128], strides = [1, 1]} : vector<8x512xf32> to vector<8x128xf32>
    %126 = math.tanh %125 : vector<8x128xf32>
    %127 = vector.extract_strided_slice %108 {offsets = [0, 384], sizes = [8, 128], strides = [1, 1]} : vector<8x512xf32> to vector<8x128xf32>
    %cst_56 = arith.constant 5.000000e-01 : f32
    %128 = vector.broadcast %cst_56 : f32 to vector<8x128xf32>
    %129 = arith.mulf %128, %127 : vector<8x128xf32>
    %130 = math.tanh %129 : vector<8x128xf32>
    %cst_57 = arith.constant 1.000000e+00 : f32
    %131 = vector.broadcast %cst_57 : f32 to vector<8x128xf32>
    %132 = arith.addf %130, %131 : vector<8x128xf32>
    %cst_58 = arith.constant 5.000000e-01 : f32
    %133 = vector.broadcast %cst_58 : f32 to vector<8x128xf32>
    %134 = arith.mulf %133, %132 : vector<8x128xf32>
    %135 = arith.mulf %124, %99 : vector<8x128xf32>
    %136 = arith.mulf %116, %126 : vector<8x128xf32>
    %137 = arith.addf %135, %136 : vector<8x128xf32>
    %138 = math.tanh %137 : vector<8x128xf32>
    %139 = arith.mulf %134, %138 : vector<8x128xf32>
    %140 = arith.addi %13, %c2_i32 : i32
    %c8_i32_59 = arith.constant 8 : i32
    %141 = arith.cmpi slt, %140, %c8_i32_59 : i32
    %142 = arith.select %141, %139, %98 : vector<8x128xf32>
    %143 = arith.select %141, %137, %99 : vector<8x128xf32>
    %144 = arith.index_cast %c2_i32 : i32 to index
    %c0_60 = arith.constant 0 : index
    %c0_61 = arith.constant 0 : index
    %145 = vector.load %arg6[%144, %c0_60, %c0_61] : memref<8x8x128xf32, #tpu.memory_space<vmem>>, vector<1x8x128xf32>
    %146 = vector.shape_cast %145 : vector<1x8x128xf32> to vector<8x128xf32>
    %147 = vector.shape_cast %142 : vector<8x128xf32> to vector<1x8x128xf32>
    tpu.vector_store %arg6[%144, %c0_60, %c0_61], %147 {strides = array<i32>} : memref<8x8x128xf32, #tpu.memory_space<vmem>>, vector<1x8x128xf32>,
    %c3_i32 = arith.constant 3 : i32
    %148 = arith.index_cast %c3_i32 : i32 to index
    %c0_62 = arith.constant 0 : index
    %c0_63 = arith.constant 0 : index
    %149 = vector.load %arg9[%148, %c0_62, %c0_63] : memref<8x8x512xf32, #tpu.memory_space<vmem>>, vector<1x8x512xf32>
    %150 = vector.shape_cast %149 : vector<1x8x512xf32> to vector<8x512xf32>
    %cst_64 = arith.constant dense<0.000000e+00> : vector<8x512xf32>
    %151 = tpu.matmul %142, %12, %cst_64 {dimension_numbers = #tpu.dot_dimension_numbers<[1], [0], [0], [1], [0, 0, 1, 1], [], []>} : vector<8x128xf32>, vector<128x512xf32>, vector<8x512xf32> -> vector<8x512xf32>
    %152 = arith.addf %150, %151 : vector<8x512xf32>
    %153 = vector.extract_strided_slice %152 {offsets = [0, 0], sizes = [8, 128], strides = [1, 1]} : vector<8x512xf32> to vector<8x128xf32>
    %cst_65 = arith.constant 5.000000e-01 : f32
    %154 = vector.broadcast %cst_65 : f32 to vector<8x128xf32>
    %155 = arith.mulf %154, %153 : vector<8x128xf32>
    %156 = math.tanh %155 : vector<8x128xf32>
    %cst_66 = arith.constant 1.000000e+00 : f32
    %157 = vector.broadcast %cst_66 : f32 to vector<8x128xf32>
    %158 = arith.addf %156, %157 : vector<8x128xf32>
    %cst_67 = arith.constant 5.000000e-01 : f32
    %159 = vector.broadcast %cst_67 : f32 to vector<8x128xf32>
    %160 = arith.mulf %159, %158 : vector<8x128xf32>
    %161 = vector.extract_strided_slice %152 {offsets = [0, 128], sizes = [8, 128], strides = [1, 1]} : vector<8x512xf32> to vector<8x128xf32>
    %cst_68 = arith.constant 5.000000e-01 : f32
    %162 = vector.broadcast %cst_68 : f32 to vector<8x128xf32>
    %163 = arith.mulf %162, %161 : vector<8x128xf32>
    %164 = math.tanh %163 : vector<8x128xf32>
    %cst_69 = arith.constant 1.000000e+00 : f32
    %165 = vector.broadcast %cst_69 : f32 to vector<8x128xf32>
    %166 = arith.addf %164, %165 : vector<8x128xf32>
    %cst_70 = arith.constant 5.000000e-01 : f32
    %167 = vector.broadcast %cst_70 : f32 to vector<8x128xf32>
    %168 = arith.mulf %167, %166 : vector<8x128xf32>
    %169 = vector.extract_strided_slice %152 {offsets = [0, 256], sizes = [8, 128], strides = [1, 1]} : vector<8x512xf32> to vector<8x128xf32>
    %170 = math.tanh %169 : vector<8x128xf32>
    %171 = vector.extract_strided_slice %152 {offsets = [0, 384], sizes = [8, 128], strides = [1, 1]} : vector<8x512xf32> to vector<8x128xf32>
    %cst_71 = arith.constant 5.000000e-01 : f32
    %172 = vector.broadcast %cst_71 : f32 to vector<8x128xf32>
    %173 = arith.mulf %172, %171 : vector<8x128xf32>
    %174 = math.tanh %173 : vector<8x128xf32>
    %cst_72 = arith.constant 1.000000e+00 : f32
    %175 = vector.broadcast %cst_72 : f32 to vector<8x128xf32>
    %176 = arith.addf %174, %175 : vector<8x128xf32>
    %cst_73 = arith.constant 5.000000e-01 : f32
    %177 = vector.broadcast %cst_73 : f32 to vector<8x128xf32>
    %178 = arith.mulf %177, %176 : vector<8x128xf32>
    %179 = arith.mulf %168, %143 : vector<8x128xf32>
    %180 = arith.mulf %160, %170 : vector<8x128xf32>
    %181 = arith.addf %179, %180 : vector<8x128xf32>
    %182 = math.tanh %181 : vector<8x128xf32>
    %183 = arith.mulf %178, %182 : vector<8x128xf32>
    %184 = arith.addi %13, %c3_i32 : i32
    %c8_i32_74 = arith.constant 8 : i32
    %185 = arith.cmpi slt, %184, %c8_i32_74 : i32
    %186 = arith.select %185, %183, %142 : vector<8x128xf32>
    %187 = arith.select %185, %181, %143 : vector<8x128xf32>
    %188 = arith.index_cast %c3_i32 : i32 to index
    %c0_75 = arith.constant 0 : index
    %c0_76 = arith.constant 0 : index
    %189 = vector.load %arg6[%188, %c0_75, %c0_76] : memref<8x8x128xf32, #tpu.memory_space<vmem>>, vector<1x8x128xf32>
    %190 = vector.shape_cast %189 : vector<1x8x128xf32> to vector<8x128xf32>
    %191 = vector.shape_cast %186 : vector<8x128xf32> to vector<1x8x128xf32>
    tpu.vector_store %arg6[%188, %c0_75, %c0_76], %191 {strides = array<i32>} : memref<8x8x128xf32, #tpu.memory_space<vmem>>, vector<1x8x128xf32>,
    %c4_i32 = arith.constant 4 : i32
    %192 = arith.index_cast %c4_i32 : i32 to index
    %c0_77 = arith.constant 0 : index
    %c0_78 = arith.constant 0 : index
    %193 = vector.load %arg9[%192, %c0_77, %c0_78] : memref<8x8x512xf32, #tpu.memory_space<vmem>>, vector<1x8x512xf32>
    %194 = vector.shape_cast %193 : vector<1x8x512xf32> to vector<8x512xf32>
    %cst_79 = arith.constant dense<0.000000e+00> : vector<8x512xf32>
    %195 = tpu.matmul %186, %12, %cst_79 {dimension_numbers = #tpu.dot_dimension_numbers<[1], [0], [0], [1], [0, 0, 1, 1], [], []>} : vector<8x128xf32>, vector<128x512xf32>, vector<8x512xf32> -> vector<8x512xf32>
    %196 = arith.addf %194, %195 : vector<8x512xf32>
    %197 = vector.extract_strided_slice %196 {offsets = [0, 0], sizes = [8, 128], strides = [1, 1]} : vector<8x512xf32> to vector<8x128xf32>
    %cst_80 = arith.constant 5.000000e-01 : f32
    %198 = vector.broadcast %cst_80 : f32 to vector<8x128xf32>
    %199 = arith.mulf %198, %197 : vector<8x128xf32>
    %200 = math.tanh %199 : vector<8x128xf32>
    %cst_81 = arith.constant 1.000000e+00 : f32
    %201 = vector.broadcast %cst_81 : f32 to vector<8x128xf32>
    %202 = arith.addf %200, %201 : vector<8x128xf32>
    %cst_82 = arith.constant 5.000000e-01 : f32
    %203 = vector.broadcast %cst_82 : f32 to vector<8x128xf32>
    %204 = arith.mulf %203, %202 : vector<8x128xf32>
    %205 = vector.extract_strided_slice %196 {offsets = [0, 128], sizes = [8, 128], strides = [1, 1]} : vector<8x512xf32> to vector<8x128xf32>
    %cst_83 = arith.constant 5.000000e-01 : f32
    %206 = vector.broadcast %cst_83 : f32 to vector<8x128xf32>
    %207 = arith.mulf %206, %205 : vector<8x128xf32>
    %208 = math.tanh %207 : vector<8x128xf32>
    %cst_84 = arith.constant 1.000000e+00 : f32
    %209 = vector.broadcast %cst_84 : f32 to vector<8x128xf32>
    %210 = arith.addf %208, %209 : vector<8x128xf32>
    %cst_85 = arith.constant 5.000000e-01 : f32
    %211 = vector.broadcast %cst_85 : f32 to vector<8x128xf32>
    %212 = arith.mulf %211, %210 : vector<8x128xf32>
    %213 = vector.extract_strided_slice %196 {offsets = [0, 256], sizes = [8, 128], strides = [1, 1]} : vector<8x512xf32> to vector<8x128xf32>
    %214 = math.tanh %213 : vector<8x128xf32>
    %215 = vector.extract_strided_slice %196 {offsets = [0, 384], sizes = [8, 128], strides = [1, 1]} : vector<8x512xf32> to vector<8x128xf32>
    %cst_86 = arith.constant 5.000000e-01 : f32
    %216 = vector.broadcast %cst_86 : f32 to vector<8x128xf32>
    %217 = arith.mulf %216, %215 : vector<8x128xf32>
    %218 = math.tanh %217 : vector<8x128xf32>
    %cst_87 = arith.constant 1.000000e+00 : f32
    %219 = vector.broadcast %cst_87 : f32 to vector<8x128xf32>
    %220 = arith.addf %218, %219 : vector<8x128xf32>
    %cst_88 = arith.constant 5.000000e-01 : f32
    %221 = vector.broadcast %cst_88 : f32 to vector<8x128xf32>
    %222 = arith.mulf %221, %220 : vector<8x128xf32>
    %223 = arith.mulf %212, %187 : vector<8x128xf32>
    %224 = arith.mulf %204, %214 : vector<8x128xf32>
    %225 = arith.addf %223, %224 : vector<8x128xf32>
    %226 = math.tanh %225 : vector<8x128xf32>
    %227 = arith.mulf %222, %226 : vector<8x128xf32>
    %228 = arith.addi %13, %c4_i32 : i32
    %c8_i32_89 = arith.constant 8 : i32
    %229 = arith.cmpi slt, %228, %c8_i32_89 : i32
    %230 = arith.select %229, %227, %186 : vector<8x128xf32>
    %231 = arith.select %229, %225, %187 : vector<8x128xf32>
    %232 = arith.index_cast %c4_i32 : i32 to index
    %c0_90 = arith.constant 0 : index
    %c0_91 = arith.constant 0 : index
    %233 = vector.load %arg6[%232, %c0_90, %c0_91] : memref<8x8x128xf32, #tpu.memory_space<vmem>>, vector<1x8x128xf32>
    %234 = vector.shape_cast %233 : vector<1x8x128xf32> to vector<8x128xf32>
    %235 = vector.shape_cast %230 : vector<8x128xf32> to vector<1x8x128xf32>
    tpu.vector_store %arg6[%232, %c0_90, %c0_91], %235 {strides = array<i32>} : memref<8x8x128xf32, #tpu.memory_space<vmem>>, vector<1x8x128xf32>,
    %c5_i32 = arith.constant 5 : i32
    %236 = arith.index_cast %c5_i32 : i32 to index
    %c0_92 = arith.constant 0 : index
    %c0_93 = arith.constant 0 : index
    %237 = vector.load %arg9[%236, %c0_92, %c0_93] : memref<8x8x512xf32, #tpu.memory_space<vmem>>, vector<1x8x512xf32>
    %238 = vector.shape_cast %237 : vector<1x8x512xf32> to vector<8x512xf32>
    %cst_94 = arith.constant dense<0.000000e+00> : vector<8x512xf32>
    %239 = tpu.matmul %230, %12, %cst_94 {dimension_numbers = #tpu.dot_dimension_numbers<[1], [0], [0], [1], [0, 0, 1, 1], [], []>} : vector<8x128xf32>, vector<128x512xf32>, vector<8x512xf32> -> vector<8x512xf32>
    %240 = arith.addf %238, %239 : vector<8x512xf32>
    %241 = vector.extract_strided_slice %240 {offsets = [0, 0], sizes = [8, 128], strides = [1, 1]} : vector<8x512xf32> to vector<8x128xf32>
    %cst_95 = arith.constant 5.000000e-01 : f32
    %242 = vector.broadcast %cst_95 : f32 to vector<8x128xf32>
    %243 = arith.mulf %242, %241 : vector<8x128xf32>
    %244 = math.tanh %243 : vector<8x128xf32>
    %cst_96 = arith.constant 1.000000e+00 : f32
    %245 = vector.broadcast %cst_96 : f32 to vector<8x128xf32>
    %246 = arith.addf %244, %245 : vector<8x128xf32>
    %cst_97 = arith.constant 5.000000e-01 : f32
    %247 = vector.broadcast %cst_97 : f32 to vector<8x128xf32>
    %248 = arith.mulf %247, %246 : vector<8x128xf32>
    %249 = vector.extract_strided_slice %240 {offsets = [0, 128], sizes = [8, 128], strides = [1, 1]} : vector<8x512xf32> to vector<8x128xf32>
    %cst_98 = arith.constant 5.000000e-01 : f32
    %250 = vector.broadcast %cst_98 : f32 to vector<8x128xf32>
    %251 = arith.mulf %250, %249 : vector<8x128xf32>
    %252 = math.tanh %251 : vector<8x128xf32>
    %cst_99 = arith.constant 1.000000e+00 : f32
    %253 = vector.broadcast %cst_99 : f32 to vector<8x128xf32>
    %254 = arith.addf %252, %253 : vector<8x128xf32>
    %cst_100 = arith.constant 5.000000e-01 : f32
    %255 = vector.broadcast %cst_100 : f32 to vector<8x128xf32>
    %256 = arith.mulf %255, %254 : vector<8x128xf32>
    %257 = vector.extract_strided_slice %240 {offsets = [0, 256], sizes = [8, 128], strides = [1, 1]} : vector<8x512xf32> to vector<8x128xf32>
    %258 = math.tanh %257 : vector<8x128xf32>
    %259 = vector.extract_strided_slice %240 {offsets = [0, 384], sizes = [8, 128], strides = [1, 1]} : vector<8x512xf32> to vector<8x128xf32>
    %cst_101 = arith.constant 5.000000e-01 : f32
    %260 = vector.broadcast %cst_101 : f32 to vector<8x128xf32>
    %261 = arith.mulf %260, %259 : vector<8x128xf32>
    %262 = math.tanh %261 : vector<8x128xf32>
    %cst_102 = arith.constant 1.000000e+00 : f32
    %263 = vector.broadcast %cst_102 : f32 to vector<8x128xf32>
    %264 = arith.addf %262, %263 : vector<8x128xf32>
    %cst_103 = arith.constant 5.000000e-01 : f32
    %265 = vector.broadcast %cst_103 : f32 to vector<8x128xf32>
    %266 = arith.mulf %265, %264 : vector<8x128xf32>
    %267 = arith.mulf %256, %231 : vector<8x128xf32>
    %268 = arith.mulf %248, %258 : vector<8x128xf32>
    %269 = arith.addf %267, %268 : vector<8x128xf32>
    %270 = math.tanh %269 : vector<8x128xf32>
    %271 = arith.mulf %266, %270 : vector<8x128xf32>
    %272 = arith.addi %13, %c5_i32 : i32
    %c8_i32_104 = arith.constant 8 : i32
    %273 = arith.cmpi slt, %272, %c8_i32_104 : i32
    %274 = arith.select %273, %271, %230 : vector<8x128xf32>
    %275 = arith.select %273, %269, %231 : vector<8x128xf32>
    %276 = arith.index_cast %c5_i32 : i32 to index
    %c0_105 = arith.constant 0 : index
    %c0_106 = arith.constant 0 : index
    %277 = vector.load %arg6[%276, %c0_105, %c0_106] : memref<8x8x128xf32, #tpu.memory_space<vmem>>, vector<1x8x128xf32>
    %278 = vector.shape_cast %277 : vector<1x8x128xf32> to vector<8x128xf32>
    %279 = vector.shape_cast %274 : vector<8x128xf32> to vector<1x8x128xf32>
    tpu.vector_store %arg6[%276, %c0_105, %c0_106], %279 {strides = array<i32>} : memref<8x8x128xf32, #tpu.memory_space<vmem>>, vector<1x8x128xf32>,
    %c6_i32 = arith.constant 6 : i32
    %280 = arith.index_cast %c6_i32 : i32 to index
    %c0_107 = arith.constant 0 : index
    %c0_108 = arith.constant 0 : index
    %281 = vector.load %arg9[%280, %c0_107, %c0_108] : memref<8x8x512xf32, #tpu.memory_space<vmem>>, vector<1x8x512xf32>
    %282 = vector.shape_cast %281 : vector<1x8x512xf32> to vector<8x512xf32>
    %cst_109 = arith.constant dense<0.000000e+00> : vector<8x512xf32>
    %283 = tpu.matmul %274, %12, %cst_109 {dimension_numbers = #tpu.dot_dimension_numbers<[1], [0], [0], [1], [0, 0, 1, 1], [], []>} : vector<8x128xf32>, vector<128x512xf32>, vector<8x512xf32> -> vector<8x512xf32>
    %284 = arith.addf %282, %283 : vector<8x512xf32>
    %285 = vector.extract_strided_slice %284 {offsets = [0, 0], sizes = [8, 128], strides = [1, 1]} : vector<8x512xf32> to vector<8x128xf32>
    %cst_110 = arith.constant 5.000000e-01 : f32
    %286 = vector.broadcast %cst_110 : f32 to vector<8x128xf32>
    %287 = arith.mulf %286, %285 : vector<8x128xf32>
    %288 = math.tanh %287 : vector<8x128xf32>
    %cst_111 = arith.constant 1.000000e+00 : f32
    %289 = vector.broadcast %cst_111 : f32 to vector<8x128xf32>
    %290 = arith.addf %288, %289 : vector<8x128xf32>
    %cst_112 = arith.constant 5.000000e-01 : f32
    %291 = vector.broadcast %cst_112 : f32 to vector<8x128xf32>
    %292 = arith.mulf %291, %290 : vector<8x128xf32>
    %293 = vector.extract_strided_slice %284 {offsets = [0, 128], sizes = [8, 128], strides = [1, 1]} : vector<8x512xf32> to vector<8x128xf32>
    %cst_113 = arith.constant 5.000000e-01 : f32
    %294 = vector.broadcast %cst_113 : f32 to vector<8x128xf32>
    %295 = arith.mulf %294, %293 : vector<8x128xf32>
    %296 = math.tanh %295 : vector<8x128xf32>
    %cst_114 = arith.constant 1.000000e+00 : f32
    %297 = vector.broadcast %cst_114 : f32 to vector<8x128xf32>
    %298 = arith.addf %296, %297 : vector<8x128xf32>
    %cst_115 = arith.constant 5.000000e-01 : f32
    %299 = vector.broadcast %cst_115 : f32 to vector<8x128xf32>
    %300 = arith.mulf %299, %298 : vector<8x128xf32>
    %301 = vector.extract_strided_slice %284 {offsets = [0, 256], sizes = [8, 128], strides = [1, 1]} : vector<8x512xf32> to vector<8x128xf32>
    %302 = math.tanh %301 : vector<8x128xf32>
    %303 = vector.extract_strided_slice %284 {offsets = [0, 384], sizes = [8, 128], strides = [1, 1]} : vector<8x512xf32> to vector<8x128xf32>
    %cst_116 = arith.constant 5.000000e-01 : f32
    %304 = vector.broadcast %cst_116 : f32 to vector<8x128xf32>
    %305 = arith.mulf %304, %303 : vector<8x128xf32>
    %306 = math.tanh %305 : vector<8x128xf32>
    %cst_117 = arith.constant 1.000000e+00 : f32
    %307 = vector.broadcast %cst_117 : f32 to vector<8x128xf32>
    %308 = arith.addf %306, %307 : vector<8x128xf32>
    %cst_118 = arith.constant 5.000000e-01 : f32
    %309 = vector.broadcast %cst_118 : f32 to vector<8x128xf32>
    %310 = arith.mulf %309, %308 : vector<8x128xf32>
    %311 = arith.mulf %300, %275 : vector<8x128xf32>
    %312 = arith.mulf %292, %302 : vector<8x128xf32>
    %313 = arith.addf %311, %312 : vector<8x128xf32>
    %314 = math.tanh %313 : vector<8x128xf32>
    %315 = arith.mulf %310, %314 : vector<8x128xf32>
    %316 = arith.addi %13, %c6_i32 : i32
    %c8_i32_119 = arith.constant 8 : i32
    %317 = arith.cmpi slt, %316, %c8_i32_119 : i32
    %318 = arith.select %317, %315, %274 : vector<8x128xf32>
    %319 = arith.select %317, %313, %275 : vector<8x128xf32>
    %320 = arith.index_cast %c6_i32 : i32 to index
    %c0_120 = arith.constant 0 : index
    %c0_121 = arith.constant 0 : index
    %321 = vector.load %arg6[%320, %c0_120, %c0_121] : memref<8x8x128xf32, #tpu.memory_space<vmem>>, vector<1x8x128xf32>
    %322 = vector.shape_cast %321 : vector<1x8x128xf32> to vector<8x128xf32>
    %323 = vector.shape_cast %318 : vector<8x128xf32> to vector<1x8x128xf32>
    tpu.vector_store %arg6[%320, %c0_120, %c0_121], %323 {strides = array<i32>} : memref<8x8x128xf32, #tpu.memory_space<vmem>>, vector<1x8x128xf32>,
    %c7_i32 = arith.constant 7 : i32
    %324 = arith.index_cast %c7_i32 : i32 to index
    %c0_122 = arith.constant 0 : index
    %c0_123 = arith.constant 0 : index
    %325 = vector.load %arg9[%324, %c0_122, %c0_123] : memref<8x8x512xf32, #tpu.memory_space<vmem>>, vector<1x8x512xf32>
    %326 = vector.shape_cast %325 : vector<1x8x512xf32> to vector<8x512xf32>
    %cst_124 = arith.constant dense<0.000000e+00> : vector<8x512xf32>
    %327 = tpu.matmul %318, %12, %cst_124 {dimension_numbers = #tpu.dot_dimension_numbers<[1], [0], [0], [1], [0, 0, 1, 1], [], []>} : vector<8x128xf32>, vector<128x512xf32>, vector<8x512xf32> -> vector<8x512xf32>
    %328 = arith.addf %326, %327 : vector<8x512xf32>
    %329 = vector.extract_strided_slice %328 {offsets = [0, 0], sizes = [8, 128], strides = [1, 1]} : vector<8x512xf32> to vector<8x128xf32>
    %cst_125 = arith.constant 5.000000e-01 : f32
    %330 = vector.broadcast %cst_125 : f32 to vector<8x128xf32>
    %331 = arith.mulf %330, %329 : vector<8x128xf32>
    %332 = math.tanh %331 : vector<8x128xf32>
    %cst_126 = arith.constant 1.000000e+00 : f32
    %333 = vector.broadcast %cst_126 : f32 to vector<8x128xf32>
    %334 = arith.addf %332, %333 : vector<8x128xf32>
    %cst_127 = arith.constant 5.000000e-01 : f32
    %335 = vector.broadcast %cst_127 : f32 to vector<8x128xf32>
    %336 = arith.mulf %335, %334 : vector<8x128xf32>
    %337 = vector.extract_strided_slice %328 {offsets = [0, 128], sizes = [8, 128], strides = [1, 1]} : vector<8x512xf32> to vector<8x128xf32>
    %cst_128 = arith.constant 5.000000e-01 : f32
    %338 = vector.broadcast %cst_128 : f32 to vector<8x128xf32>
    %339 = arith.mulf %338, %337 : vector<8x128xf32>
    %340 = math.tanh %339 : vector<8x128xf32>
    %cst_129 = arith.constant 1.000000e+00 : f32
    %341 = vector.broadcast %cst_129 : f32 to vector<8x128xf32>
    %342 = arith.addf %340, %341 : vector<8x128xf32>
    %cst_130 = arith.constant 5.000000e-01 : f32
    %343 = vector.broadcast %cst_130 : f32 to vector<8x128xf32>
    %344 = arith.mulf %343, %342 : vector<8x128xf32>
    %345 = vector.extract_strided_slice %328 {offsets = [0, 256], sizes = [8, 128], strides = [1, 1]} : vector<8x512xf32> to vector<8x128xf32>
    %346 = math.tanh %345 : vector<8x128xf32>
    %347 = vector.extract_strided_slice %328 {offsets = [0, 384], sizes = [8, 128], strides = [1, 1]} : vector<8x512xf32> to vector<8x128xf32>
    %cst_131 = arith.constant 5.000000e-01 : f32
    %348 = vector.broadcast %cst_131 : f32 to vector<8x128xf32>
    %349 = arith.mulf %348, %347 : vector<8x128xf32>
    %350 = math.tanh %349 : vector<8x128xf32>
    %cst_132 = arith.constant 1.000000e+00 : f32
    %351 = vector.broadcast %cst_132 : f32 to vector<8x128xf32>
    %352 = arith.addf %350, %351 : vector<8x128xf32>
    %cst_133 = arith.constant 5.000000e-01 : f32
    %353 = vector.broadcast %cst_133 : f32 to vector<8x128xf32>
    %354 = arith.mulf %353, %352 : vector<8x128xf32>
    %355 = arith.mulf %344, %319 : vector<8x128xf32>
    %356 = arith.mulf %336, %346 : vector<8x128xf32>
    %357 = arith.addf %355, %356 : vector<8x128xf32>
    %358 = math.tanh %357 : vector<8x128xf32>
    %359 = arith.mulf %354, %358 : vector<8x128xf32>
    %360 = arith.addi %13, %c7_i32 : i32
    %c8_i32_134 = arith.constant 8 : i32
    %361 = arith.cmpi slt, %360, %c8_i32_134 : i32
    %362 = arith.select %361, %359, %318 : vector<8x128xf32>
    %363 = arith.select %361, %357, %319 : vector<8x128xf32>
    %364 = arith.index_cast %c7_i32 : i32 to index
    %c0_135 = arith.constant 0 : index
    %c0_136 = arith.constant 0 : index
    %365 = vector.load %arg6[%364, %c0_135, %c0_136] : memref<8x8x128xf32, #tpu.memory_space<vmem>>, vector<1x8x128xf32>
    %366 = vector.shape_cast %365 : vector<1x8x128xf32> to vector<8x128xf32>
    %367 = vector.shape_cast %362 : vector<8x128xf32> to vector<1x8x128xf32>
    tpu.vector_store %arg6[%364, %c0_135, %c0_136], %367 {strides = array<i32>} : memref<8x8x128xf32, #tpu.memory_space<vmem>>, vector<1x8x128xf32>,
    %c8_i32_137 = arith.constant 8 : i32
    %c0_138 = arith.constant 0 : index
    %c0_139 = arith.constant 0 : index
    %368 = vector.load %arg7[%c0_138, %c0_139] : memref<8x128xf32, #tpu.memory_space<vmem>>, vector<8x128xf32>
    tpu.vector_store %arg7[%c0_138, %c0_139], %362 {strides = array<i32>} : memref<8x128xf32, #tpu.memory_space<vmem>>, vector<8x128xf32>,
    %c0_140 = arith.constant 0 : index
    %c0_141 = arith.constant 0 : index
    %369 = vector.load %arg8[%c0_140, %c0_141] : memref<8x128xf32, #tpu.memory_space<vmem>>, vector<8x128xf32>
    tpu.vector_store %arg8[%c0_140, %c0_141], %363 {strides = array<i32>} : memref<8x128xf32, #tpu.memory_space<vmem>>, vector<8x128xf32>,
    return
  }
  func.func @transform_0(%arg0: i32, %arg1: i32) -> (i32, i32, i32) {
    %c0_i32 = arith.constant 0 : i32
    %c0_i32_0 = arith.constant 0 : i32
    return %arg1, %arg0, %c0_i32 : i32, i32, i32
  }
  func.func @transform_1(%arg0: i32, %arg1: i32) -> (i32, i32) {
    %c0_i32 = arith.constant 0 : i32
    %c0_i32_0 = arith.constant 0 : i32
    %c0_i32_1 = arith.constant 0 : i32
    return %c0_i32, %c0_i32_0 : i32, i32
  }
  func.func @transform_2(%arg0: i32, %arg1: i32) -> (i32, i32) {
    %c0_i32 = arith.constant 0 : i32
    %c0_i32_0 = arith.constant 0 : i32
    %c0_i32_1 = arith.constant 0 : i32
    return %c0_i32, %c0_i32_0 : i32, i32
  }
  func.func @transform_3(%arg0: i32, %arg1: i32) -> (i32, i32) {
    %c0_i32 = arith.constant 0 : i32
    %c0_i32_0 = arith.constant 0 : i32
    %c0_i32_1 = arith.constant 0 : i32
    return %c0_i32, %c0_i32_0 : i32, i32
  }
  func.func @transform_4(%arg0: i32, %arg1: i32) -> (i32, i32, i32) {
    %c0_i32 = arith.constant 0 : i32
    %c0_i32_0 = arith.constant 0 : i32
    return %arg1, %arg0, %c0_i32 : i32, i32, i32
  }
}

module attributes {stable_mosaic.version = 11 : i64} {
  func.func @_lstm_block_kernel(%arg0: i32, %arg1: i32, %arg2: memref<8x8x128xf32, #tpu.memory_space<vmem>>, %arg3: memref<128x512xf32, #tpu.memory_space<vmem>>, %arg4: memref<128x512xf32, #tpu.memory_space<vmem>>, %arg5: memref<1x512xf32, #tpu.memory_space<vmem>>, %arg6: memref<8x128xf32, #tpu.memory_space<vmem>>, %arg7: memref<8x128xf32, #tpu.memory_space<vmem>>, %arg8: memref<8x128xf32, #tpu.memory_space<vmem>>, %arg9: memref<8x8x512xf32, #tpu.memory_space<vmem>>) attributes {dimension_semantics = [#tpu.dimension_semantics<parallel>, #tpu.dimension_semantics<arbitrary>], iteration_bounds = array<i64: 1, 1>, scalar_prefetch = 0 : i64, scratch_operands = 3 : i64, tpu.core_type = #tpu.core_type<tc>, window_params = [{transform_indices = @transform_0, window_bounds = array<i64: 8, 8, 128>}, {pipeline_mode = #tpu.pipeline_mode<synchronous>, transform_indices = @transform_1, window_bounds = array<i64: 128, 512>}, {pipeline_mode = #tpu.pipeline_mode<synchronous>, transform_indices = @transform_2, window_bounds = array<i64: 128, 512>}, {pipeline_mode = #tpu.pipeline_mode<synchronous>, transform_indices = @transform_3, window_bounds = array<i64: 1, 512>}, {transform_indices = @transform_4, window_bounds = array<i64: 8, 128>}]} {
    %c0_i32 = arith.constant 0 : i32
    %0 = arith.cmpi eq, %arg1, %c0_i32 : i32
    %1 = arith.extui %0 : i1 to i32
    %c0_i32_0 = arith.constant 0 : i32
    %2 = arith.cmpi ne, %1, %c0_i32_0 : i32
    scf.if %2 {
      %cst_128 = arith.constant 0.000000e+00 : f32
      %341 = vector.broadcast %cst_128 : f32 to vector<8x128xf32>
      %c0_129 = arith.constant 0 : index
      %c0_130 = arith.constant 0 : index
      %342 = vector.load %arg7[%c0_129, %c0_130] : memref<8x128xf32, #tpu.memory_space<vmem>>, vector<8x128xf32>
      tpu.vector_store %arg7[%c0_129, %c0_130], %341 {strides = array<i32>} : memref<8x128xf32, #tpu.memory_space<vmem>>, vector<8x128xf32>,
      %cst_131 = arith.constant 0.000000e+00 : f32
      %343 = vector.broadcast %cst_131 : f32 to vector<8x128xf32>
      %c0_132 = arith.constant 0 : index
      %c0_133 = arith.constant 0 : index
      %344 = vector.load %arg8[%c0_132, %c0_133] : memref<8x128xf32, #tpu.memory_space<vmem>>, vector<8x128xf32>
      tpu.vector_store %arg8[%c0_132, %c0_133], %343 {strides = array<i32>} : memref<8x128xf32, #tpu.memory_space<vmem>>, vector<8x128xf32>,
    } else {
    }
    %c0 = arith.constant 0 : index
    %c0_1 = arith.constant 0 : index
    %c0_2 = arith.constant 0 : index
    %3 = vector.load %arg2[%c0, %c0_1, %c0_2] : memref<8x8x128xf32, #tpu.memory_space<vmem>>, vector<8x8x128xf32>
    %4 = vector.shape_cast %3 : vector<8x8x128xf32> to vector<64x128xf32>
    %c0_3 = arith.constant 0 : index
    %c0_4 = arith.constant 0 : index
    %5 = vector.load %arg3[%c0_3, %c0_4] : memref<128x512xf32, #tpu.memory_space<vmem>>, vector<128x512xf32>
    %cst = arith.constant dense<0.000000e+00> : vector<64x512xf32>
    %6 = tpu.matmul %4, %5, %cst {dimension_numbers = #tpu.dot_dimension_numbers<[1], [0], [0], [1], [0, 0, 1, 1], [], []>} : vector<64x128xf32>, vector<128x512xf32>, vector<64x512xf32> -> vector<64x512xf32>
    %c0_5 = arith.constant 0 : index
    %c0_6 = arith.constant 0 : index
    %7 = vector.load %arg5[%c0_5, %c0_6] : memref<1x512xf32, #tpu.memory_space<vmem>>, vector<1x512xf32>
    %8 = vector.broadcast %7 : vector<1x512xf32> to vector<64x512xf32>
    %9 = arith.addf %6, %8 : vector<64x512xf32>
    %10 = vector.shape_cast %9 : vector<64x512xf32> to vector<8x8x512xf32>
    %c0_7 = arith.constant 0 : index
    %c0_8 = arith.constant 0 : index
    %c0_9 = arith.constant 0 : index
    %11 = vector.load %arg9[%c0_7, %c0_8, %c0_9] : memref<8x8x512xf32, #tpu.memory_space<vmem>>, vector<8x8x512xf32>
    tpu.vector_store %arg9[%c0_7, %c0_8, %c0_9], %10 {strides = array<i32>} : memref<8x8x512xf32, #tpu.memory_space<vmem>>, vector<8x8x512xf32>,
    %c0_10 = arith.constant 0 : index
    %c0_11 = arith.constant 0 : index
    %12 = vector.load %arg4[%c0_10, %c0_11] : memref<128x512xf32, #tpu.memory_space<vmem>>, vector<128x512xf32>
    %c8_i32 = arith.constant 8 : i32
    %13 = arith.muli %arg1, %c8_i32 : i32
    %c0_12 = arith.constant 0 : index
    %c0_13 = arith.constant 0 : index
    %14 = vector.load %arg7[%c0_12, %c0_13] : memref<8x128xf32, #tpu.memory_space<vmem>>, vector<8x128xf32>
    %c0_14 = arith.constant 0 : index
    %c0_15 = arith.constant 0 : index
    %15 = vector.load %arg8[%c0_14, %c0_15] : memref<8x128xf32, #tpu.memory_space<vmem>>, vector<8x128xf32>
    %c0_i32_16 = arith.constant 0 : i32
    %16 = arith.index_cast %c0_i32_16 : i32 to index
    %c0_17 = arith.constant 0 : index
    %c0_18 = arith.constant 0 : index
    %17 = vector.load %arg9[%16, %c0_17, %c0_18] : memref<8x8x512xf32, #tpu.memory_space<vmem>>, vector<1x8x512xf32>
    %18 = vector.shape_cast %17 : vector<1x8x512xf32> to vector<8x512xf32>
    %cst_19 = arith.constant dense<0.000000e+00> : vector<8x512xf32>
    %19 = tpu.matmul %14, %12, %cst_19 {dimension_numbers = #tpu.dot_dimension_numbers<[1], [0], [0], [1], [0, 0, 1, 1], [], []>} : vector<8x128xf32>, vector<128x512xf32>, vector<8x512xf32> -> vector<8x512xf32>
    %20 = arith.addf %18, %19 : vector<8x512xf32>
    %21 = vector.extract_strided_slice %20 {offsets = [0, 0], sizes = [8, 128], strides = [1, 1]} : vector<8x512xf32> to vector<8x128xf32>
    %cst_20 = arith.constant 5.000000e-01 : f32
    %22 = vector.broadcast %cst_20 : f32 to vector<8x128xf32>
    %23 = arith.mulf %22, %21 : vector<8x128xf32>
    %24 = math.tanh %23 : vector<8x128xf32>
    %cst_21 = arith.constant 1.000000e+00 : f32
    %25 = vector.broadcast %cst_21 : f32 to vector<8x128xf32>
    %26 = arith.addf %24, %25 : vector<8x128xf32>
    %cst_22 = arith.constant 5.000000e-01 : f32
    %27 = vector.broadcast %cst_22 : f32 to vector<8x128xf32>
    %28 = arith.mulf %27, %26 : vector<8x128xf32>
    %29 = vector.extract_strided_slice %20 {offsets = [0, 128], sizes = [8, 128], strides = [1, 1]} : vector<8x512xf32> to vector<8x128xf32>
    %cst_23 = arith.constant 5.000000e-01 : f32
    %30 = vector.broadcast %cst_23 : f32 to vector<8x128xf32>
    %31 = arith.mulf %30, %29 : vector<8x128xf32>
    %32 = math.tanh %31 : vector<8x128xf32>
    %cst_24 = arith.constant 1.000000e+00 : f32
    %33 = vector.broadcast %cst_24 : f32 to vector<8x128xf32>
    %34 = arith.addf %32, %33 : vector<8x128xf32>
    %cst_25 = arith.constant 5.000000e-01 : f32
    %35 = vector.broadcast %cst_25 : f32 to vector<8x128xf32>
    %36 = arith.mulf %35, %34 : vector<8x128xf32>
    %37 = vector.extract_strided_slice %20 {offsets = [0, 256], sizes = [8, 128], strides = [1, 1]} : vector<8x512xf32> to vector<8x128xf32>
    %38 = math.tanh %37 : vector<8x128xf32>
    %39 = vector.extract_strided_slice %20 {offsets = [0, 384], sizes = [8, 128], strides = [1, 1]} : vector<8x512xf32> to vector<8x128xf32>
    %cst_26 = arith.constant 5.000000e-01 : f32
    %40 = vector.broadcast %cst_26 : f32 to vector<8x128xf32>
    %41 = arith.mulf %40, %39 : vector<8x128xf32>
    %42 = math.tanh %41 : vector<8x128xf32>
    %cst_27 = arith.constant 1.000000e+00 : f32
    %43 = vector.broadcast %cst_27 : f32 to vector<8x128xf32>
    %44 = arith.addf %42, %43 : vector<8x128xf32>
    %cst_28 = arith.constant 5.000000e-01 : f32
    %45 = vector.broadcast %cst_28 : f32 to vector<8x128xf32>
    %46 = arith.mulf %45, %44 : vector<8x128xf32>
    %47 = arith.mulf %36, %15 : vector<8x128xf32>
    %48 = arith.mulf %28, %38 : vector<8x128xf32>
    %49 = arith.addf %47, %48 : vector<8x128xf32>
    %50 = math.tanh %49 : vector<8x128xf32>
    %51 = arith.mulf %46, %50 : vector<8x128xf32>
    %52 = arith.addi %13, %c0_i32_16 : i32
    %c8_i32_29 = arith.constant 8 : i32
    %53 = arith.cmpi slt, %52, %c8_i32_29 : i32
    %54 = arith.select %53, %51, %14 : vector<8x128xf32>
    %55 = arith.select %53, %49, %15 : vector<8x128xf32>
    %c1_i32 = arith.constant 1 : i32
    %56 = arith.index_cast %c1_i32 : i32 to index
    %c0_30 = arith.constant 0 : index
    %c0_31 = arith.constant 0 : index
    %57 = vector.load %arg9[%56, %c0_30, %c0_31] : memref<8x8x512xf32, #tpu.memory_space<vmem>>, vector<1x8x512xf32>
    %58 = vector.shape_cast %57 : vector<1x8x512xf32> to vector<8x512xf32>
    %cst_32 = arith.constant dense<0.000000e+00> : vector<8x512xf32>
    %59 = tpu.matmul %54, %12, %cst_32 {dimension_numbers = #tpu.dot_dimension_numbers<[1], [0], [0], [1], [0, 0, 1, 1], [], []>} : vector<8x128xf32>, vector<128x512xf32>, vector<8x512xf32> -> vector<8x512xf32>
    %60 = arith.addf %58, %59 : vector<8x512xf32>
    %61 = vector.extract_strided_slice %60 {offsets = [0, 0], sizes = [8, 128], strides = [1, 1]} : vector<8x512xf32> to vector<8x128xf32>
    %cst_33 = arith.constant 5.000000e-01 : f32
    %62 = vector.broadcast %cst_33 : f32 to vector<8x128xf32>
    %63 = arith.mulf %62, %61 : vector<8x128xf32>
    %64 = math.tanh %63 : vector<8x128xf32>
    %cst_34 = arith.constant 1.000000e+00 : f32
    %65 = vector.broadcast %cst_34 : f32 to vector<8x128xf32>
    %66 = arith.addf %64, %65 : vector<8x128xf32>
    %cst_35 = arith.constant 5.000000e-01 : f32
    %67 = vector.broadcast %cst_35 : f32 to vector<8x128xf32>
    %68 = arith.mulf %67, %66 : vector<8x128xf32>
    %69 = vector.extract_strided_slice %60 {offsets = [0, 128], sizes = [8, 128], strides = [1, 1]} : vector<8x512xf32> to vector<8x128xf32>
    %cst_36 = arith.constant 5.000000e-01 : f32
    %70 = vector.broadcast %cst_36 : f32 to vector<8x128xf32>
    %71 = arith.mulf %70, %69 : vector<8x128xf32>
    %72 = math.tanh %71 : vector<8x128xf32>
    %cst_37 = arith.constant 1.000000e+00 : f32
    %73 = vector.broadcast %cst_37 : f32 to vector<8x128xf32>
    %74 = arith.addf %72, %73 : vector<8x128xf32>
    %cst_38 = arith.constant 5.000000e-01 : f32
    %75 = vector.broadcast %cst_38 : f32 to vector<8x128xf32>
    %76 = arith.mulf %75, %74 : vector<8x128xf32>
    %77 = vector.extract_strided_slice %60 {offsets = [0, 256], sizes = [8, 128], strides = [1, 1]} : vector<8x512xf32> to vector<8x128xf32>
    %78 = math.tanh %77 : vector<8x128xf32>
    %79 = vector.extract_strided_slice %60 {offsets = [0, 384], sizes = [8, 128], strides = [1, 1]} : vector<8x512xf32> to vector<8x128xf32>
    %cst_39 = arith.constant 5.000000e-01 : f32
    %80 = vector.broadcast %cst_39 : f32 to vector<8x128xf32>
    %81 = arith.mulf %80, %79 : vector<8x128xf32>
    %82 = math.tanh %81 : vector<8x128xf32>
    %cst_40 = arith.constant 1.000000e+00 : f32
    %83 = vector.broadcast %cst_40 : f32 to vector<8x128xf32>
    %84 = arith.addf %82, %83 : vector<8x128xf32>
    %cst_41 = arith.constant 5.000000e-01 : f32
    %85 = vector.broadcast %cst_41 : f32 to vector<8x128xf32>
    %86 = arith.mulf %85, %84 : vector<8x128xf32>
    %87 = arith.mulf %76, %55 : vector<8x128xf32>
    %88 = arith.mulf %68, %78 : vector<8x128xf32>
    %89 = arith.addf %87, %88 : vector<8x128xf32>
    %90 = math.tanh %89 : vector<8x128xf32>
    %91 = arith.mulf %86, %90 : vector<8x128xf32>
    %92 = arith.addi %13, %c1_i32 : i32
    %c8_i32_42 = arith.constant 8 : i32
    %93 = arith.cmpi slt, %92, %c8_i32_42 : i32
    %94 = arith.select %93, %91, %54 : vector<8x128xf32>
    %95 = arith.select %93, %89, %55 : vector<8x128xf32>
    %c2_i32 = arith.constant 2 : i32
    %96 = arith.index_cast %c2_i32 : i32 to index
    %c0_43 = arith.constant 0 : index
    %c0_44 = arith.constant 0 : index
    %97 = vector.load %arg9[%96, %c0_43, %c0_44] : memref<8x8x512xf32, #tpu.memory_space<vmem>>, vector<1x8x512xf32>
    %98 = vector.shape_cast %97 : vector<1x8x512xf32> to vector<8x512xf32>
    %cst_45 = arith.constant dense<0.000000e+00> : vector<8x512xf32>
    %99 = tpu.matmul %94, %12, %cst_45 {dimension_numbers = #tpu.dot_dimension_numbers<[1], [0], [0], [1], [0, 0, 1, 1], [], []>} : vector<8x128xf32>, vector<128x512xf32>, vector<8x512xf32> -> vector<8x512xf32>
    %100 = arith.addf %98, %99 : vector<8x512xf32>
    %101 = vector.extract_strided_slice %100 {offsets = [0, 0], sizes = [8, 128], strides = [1, 1]} : vector<8x512xf32> to vector<8x128xf32>
    %cst_46 = arith.constant 5.000000e-01 : f32
    %102 = vector.broadcast %cst_46 : f32 to vector<8x128xf32>
    %103 = arith.mulf %102, %101 : vector<8x128xf32>
    %104 = math.tanh %103 : vector<8x128xf32>
    %cst_47 = arith.constant 1.000000e+00 : f32
    %105 = vector.broadcast %cst_47 : f32 to vector<8x128xf32>
    %106 = arith.addf %104, %105 : vector<8x128xf32>
    %cst_48 = arith.constant 5.000000e-01 : f32
    %107 = vector.broadcast %cst_48 : f32 to vector<8x128xf32>
    %108 = arith.mulf %107, %106 : vector<8x128xf32>
    %109 = vector.extract_strided_slice %100 {offsets = [0, 128], sizes = [8, 128], strides = [1, 1]} : vector<8x512xf32> to vector<8x128xf32>
    %cst_49 = arith.constant 5.000000e-01 : f32
    %110 = vector.broadcast %cst_49 : f32 to vector<8x128xf32>
    %111 = arith.mulf %110, %109 : vector<8x128xf32>
    %112 = math.tanh %111 : vector<8x128xf32>
    %cst_50 = arith.constant 1.000000e+00 : f32
    %113 = vector.broadcast %cst_50 : f32 to vector<8x128xf32>
    %114 = arith.addf %112, %113 : vector<8x128xf32>
    %cst_51 = arith.constant 5.000000e-01 : f32
    %115 = vector.broadcast %cst_51 : f32 to vector<8x128xf32>
    %116 = arith.mulf %115, %114 : vector<8x128xf32>
    %117 = vector.extract_strided_slice %100 {offsets = [0, 256], sizes = [8, 128], strides = [1, 1]} : vector<8x512xf32> to vector<8x128xf32>
    %118 = math.tanh %117 : vector<8x128xf32>
    %119 = vector.extract_strided_slice %100 {offsets = [0, 384], sizes = [8, 128], strides = [1, 1]} : vector<8x512xf32> to vector<8x128xf32>
    %cst_52 = arith.constant 5.000000e-01 : f32
    %120 = vector.broadcast %cst_52 : f32 to vector<8x128xf32>
    %121 = arith.mulf %120, %119 : vector<8x128xf32>
    %122 = math.tanh %121 : vector<8x128xf32>
    %cst_53 = arith.constant 1.000000e+00 : f32
    %123 = vector.broadcast %cst_53 : f32 to vector<8x128xf32>
    %124 = arith.addf %122, %123 : vector<8x128xf32>
    %cst_54 = arith.constant 5.000000e-01 : f32
    %125 = vector.broadcast %cst_54 : f32 to vector<8x128xf32>
    %126 = arith.mulf %125, %124 : vector<8x128xf32>
    %127 = arith.mulf %116, %95 : vector<8x128xf32>
    %128 = arith.mulf %108, %118 : vector<8x128xf32>
    %129 = arith.addf %127, %128 : vector<8x128xf32>
    %130 = math.tanh %129 : vector<8x128xf32>
    %131 = arith.mulf %126, %130 : vector<8x128xf32>
    %132 = arith.addi %13, %c2_i32 : i32
    %c8_i32_55 = arith.constant 8 : i32
    %133 = arith.cmpi slt, %132, %c8_i32_55 : i32
    %134 = arith.select %133, %131, %94 : vector<8x128xf32>
    %135 = arith.select %133, %129, %95 : vector<8x128xf32>
    %c3_i32 = arith.constant 3 : i32
    %136 = arith.index_cast %c3_i32 : i32 to index
    %c0_56 = arith.constant 0 : index
    %c0_57 = arith.constant 0 : index
    %137 = vector.load %arg9[%136, %c0_56, %c0_57] : memref<8x8x512xf32, #tpu.memory_space<vmem>>, vector<1x8x512xf32>
    %138 = vector.shape_cast %137 : vector<1x8x512xf32> to vector<8x512xf32>
    %cst_58 = arith.constant dense<0.000000e+00> : vector<8x512xf32>
    %139 = tpu.matmul %134, %12, %cst_58 {dimension_numbers = #tpu.dot_dimension_numbers<[1], [0], [0], [1], [0, 0, 1, 1], [], []>} : vector<8x128xf32>, vector<128x512xf32>, vector<8x512xf32> -> vector<8x512xf32>
    %140 = arith.addf %138, %139 : vector<8x512xf32>
    %141 = vector.extract_strided_slice %140 {offsets = [0, 0], sizes = [8, 128], strides = [1, 1]} : vector<8x512xf32> to vector<8x128xf32>
    %cst_59 = arith.constant 5.000000e-01 : f32
    %142 = vector.broadcast %cst_59 : f32 to vector<8x128xf32>
    %143 = arith.mulf %142, %141 : vector<8x128xf32>
    %144 = math.tanh %143 : vector<8x128xf32>
    %cst_60 = arith.constant 1.000000e+00 : f32
    %145 = vector.broadcast %cst_60 : f32 to vector<8x128xf32>
    %146 = arith.addf %144, %145 : vector<8x128xf32>
    %cst_61 = arith.constant 5.000000e-01 : f32
    %147 = vector.broadcast %cst_61 : f32 to vector<8x128xf32>
    %148 = arith.mulf %147, %146 : vector<8x128xf32>
    %149 = vector.extract_strided_slice %140 {offsets = [0, 128], sizes = [8, 128], strides = [1, 1]} : vector<8x512xf32> to vector<8x128xf32>
    %cst_62 = arith.constant 5.000000e-01 : f32
    %150 = vector.broadcast %cst_62 : f32 to vector<8x128xf32>
    %151 = arith.mulf %150, %149 : vector<8x128xf32>
    %152 = math.tanh %151 : vector<8x128xf32>
    %cst_63 = arith.constant 1.000000e+00 : f32
    %153 = vector.broadcast %cst_63 : f32 to vector<8x128xf32>
    %154 = arith.addf %152, %153 : vector<8x128xf32>
    %cst_64 = arith.constant 5.000000e-01 : f32
    %155 = vector.broadcast %cst_64 : f32 to vector<8x128xf32>
    %156 = arith.mulf %155, %154 : vector<8x128xf32>
    %157 = vector.extract_strided_slice %140 {offsets = [0, 256], sizes = [8, 128], strides = [1, 1]} : vector<8x512xf32> to vector<8x128xf32>
    %158 = math.tanh %157 : vector<8x128xf32>
    %159 = vector.extract_strided_slice %140 {offsets = [0, 384], sizes = [8, 128], strides = [1, 1]} : vector<8x512xf32> to vector<8x128xf32>
    %cst_65 = arith.constant 5.000000e-01 : f32
    %160 = vector.broadcast %cst_65 : f32 to vector<8x128xf32>
    %161 = arith.mulf %160, %159 : vector<8x128xf32>
    %162 = math.tanh %161 : vector<8x128xf32>
    %cst_66 = arith.constant 1.000000e+00 : f32
    %163 = vector.broadcast %cst_66 : f32 to vector<8x128xf32>
    %164 = arith.addf %162, %163 : vector<8x128xf32>
    %cst_67 = arith.constant 5.000000e-01 : f32
    %165 = vector.broadcast %cst_67 : f32 to vector<8x128xf32>
    %166 = arith.mulf %165, %164 : vector<8x128xf32>
    %167 = arith.mulf %156, %135 : vector<8x128xf32>
    %168 = arith.mulf %148, %158 : vector<8x128xf32>
    %169 = arith.addf %167, %168 : vector<8x128xf32>
    %170 = math.tanh %169 : vector<8x128xf32>
    %171 = arith.mulf %166, %170 : vector<8x128xf32>
    %172 = arith.addi %13, %c3_i32 : i32
    %c8_i32_68 = arith.constant 8 : i32
    %173 = arith.cmpi slt, %172, %c8_i32_68 : i32
    %174 = arith.select %173, %171, %134 : vector<8x128xf32>
    %175 = arith.select %173, %169, %135 : vector<8x128xf32>
    %c4_i32 = arith.constant 4 : i32
    %176 = arith.index_cast %c4_i32 : i32 to index
    %c0_69 = arith.constant 0 : index
    %c0_70 = arith.constant 0 : index
    %177 = vector.load %arg9[%176, %c0_69, %c0_70] : memref<8x8x512xf32, #tpu.memory_space<vmem>>, vector<1x8x512xf32>
    %178 = vector.shape_cast %177 : vector<1x8x512xf32> to vector<8x512xf32>
    %cst_71 = arith.constant dense<0.000000e+00> : vector<8x512xf32>
    %179 = tpu.matmul %174, %12, %cst_71 {dimension_numbers = #tpu.dot_dimension_numbers<[1], [0], [0], [1], [0, 0, 1, 1], [], []>} : vector<8x128xf32>, vector<128x512xf32>, vector<8x512xf32> -> vector<8x512xf32>
    %180 = arith.addf %178, %179 : vector<8x512xf32>
    %181 = vector.extract_strided_slice %180 {offsets = [0, 0], sizes = [8, 128], strides = [1, 1]} : vector<8x512xf32> to vector<8x128xf32>
    %cst_72 = arith.constant 5.000000e-01 : f32
    %182 = vector.broadcast %cst_72 : f32 to vector<8x128xf32>
    %183 = arith.mulf %182, %181 : vector<8x128xf32>
    %184 = math.tanh %183 : vector<8x128xf32>
    %cst_73 = arith.constant 1.000000e+00 : f32
    %185 = vector.broadcast %cst_73 : f32 to vector<8x128xf32>
    %186 = arith.addf %184, %185 : vector<8x128xf32>
    %cst_74 = arith.constant 5.000000e-01 : f32
    %187 = vector.broadcast %cst_74 : f32 to vector<8x128xf32>
    %188 = arith.mulf %187, %186 : vector<8x128xf32>
    %189 = vector.extract_strided_slice %180 {offsets = [0, 128], sizes = [8, 128], strides = [1, 1]} : vector<8x512xf32> to vector<8x128xf32>
    %cst_75 = arith.constant 5.000000e-01 : f32
    %190 = vector.broadcast %cst_75 : f32 to vector<8x128xf32>
    %191 = arith.mulf %190, %189 : vector<8x128xf32>
    %192 = math.tanh %191 : vector<8x128xf32>
    %cst_76 = arith.constant 1.000000e+00 : f32
    %193 = vector.broadcast %cst_76 : f32 to vector<8x128xf32>
    %194 = arith.addf %192, %193 : vector<8x128xf32>
    %cst_77 = arith.constant 5.000000e-01 : f32
    %195 = vector.broadcast %cst_77 : f32 to vector<8x128xf32>
    %196 = arith.mulf %195, %194 : vector<8x128xf32>
    %197 = vector.extract_strided_slice %180 {offsets = [0, 256], sizes = [8, 128], strides = [1, 1]} : vector<8x512xf32> to vector<8x128xf32>
    %198 = math.tanh %197 : vector<8x128xf32>
    %199 = vector.extract_strided_slice %180 {offsets = [0, 384], sizes = [8, 128], strides = [1, 1]} : vector<8x512xf32> to vector<8x128xf32>
    %cst_78 = arith.constant 5.000000e-01 : f32
    %200 = vector.broadcast %cst_78 : f32 to vector<8x128xf32>
    %201 = arith.mulf %200, %199 : vector<8x128xf32>
    %202 = math.tanh %201 : vector<8x128xf32>
    %cst_79 = arith.constant 1.000000e+00 : f32
    %203 = vector.broadcast %cst_79 : f32 to vector<8x128xf32>
    %204 = arith.addf %202, %203 : vector<8x128xf32>
    %cst_80 = arith.constant 5.000000e-01 : f32
    %205 = vector.broadcast %cst_80 : f32 to vector<8x128xf32>
    %206 = arith.mulf %205, %204 : vector<8x128xf32>
    %207 = arith.mulf %196, %175 : vector<8x128xf32>
    %208 = arith.mulf %188, %198 : vector<8x128xf32>
    %209 = arith.addf %207, %208 : vector<8x128xf32>
    %210 = math.tanh %209 : vector<8x128xf32>
    %211 = arith.mulf %206, %210 : vector<8x128xf32>
    %212 = arith.addi %13, %c4_i32 : i32
    %c8_i32_81 = arith.constant 8 : i32
    %213 = arith.cmpi slt, %212, %c8_i32_81 : i32
    %214 = arith.select %213, %211, %174 : vector<8x128xf32>
    %215 = arith.select %213, %209, %175 : vector<8x128xf32>
    %c5_i32 = arith.constant 5 : i32
    %216 = arith.index_cast %c5_i32 : i32 to index
    %c0_82 = arith.constant 0 : index
    %c0_83 = arith.constant 0 : index
    %217 = vector.load %arg9[%216, %c0_82, %c0_83] : memref<8x8x512xf32, #tpu.memory_space<vmem>>, vector<1x8x512xf32>
    %218 = vector.shape_cast %217 : vector<1x8x512xf32> to vector<8x512xf32>
    %cst_84 = arith.constant dense<0.000000e+00> : vector<8x512xf32>
    %219 = tpu.matmul %214, %12, %cst_84 {dimension_numbers = #tpu.dot_dimension_numbers<[1], [0], [0], [1], [0, 0, 1, 1], [], []>} : vector<8x128xf32>, vector<128x512xf32>, vector<8x512xf32> -> vector<8x512xf32>
    %220 = arith.addf %218, %219 : vector<8x512xf32>
    %221 = vector.extract_strided_slice %220 {offsets = [0, 0], sizes = [8, 128], strides = [1, 1]} : vector<8x512xf32> to vector<8x128xf32>
    %cst_85 = arith.constant 5.000000e-01 : f32
    %222 = vector.broadcast %cst_85 : f32 to vector<8x128xf32>
    %223 = arith.mulf %222, %221 : vector<8x128xf32>
    %224 = math.tanh %223 : vector<8x128xf32>
    %cst_86 = arith.constant 1.000000e+00 : f32
    %225 = vector.broadcast %cst_86 : f32 to vector<8x128xf32>
    %226 = arith.addf %224, %225 : vector<8x128xf32>
    %cst_87 = arith.constant 5.000000e-01 : f32
    %227 = vector.broadcast %cst_87 : f32 to vector<8x128xf32>
    %228 = arith.mulf %227, %226 : vector<8x128xf32>
    %229 = vector.extract_strided_slice %220 {offsets = [0, 128], sizes = [8, 128], strides = [1, 1]} : vector<8x512xf32> to vector<8x128xf32>
    %cst_88 = arith.constant 5.000000e-01 : f32
    %230 = vector.broadcast %cst_88 : f32 to vector<8x128xf32>
    %231 = arith.mulf %230, %229 : vector<8x128xf32>
    %232 = math.tanh %231 : vector<8x128xf32>
    %cst_89 = arith.constant 1.000000e+00 : f32
    %233 = vector.broadcast %cst_89 : f32 to vector<8x128xf32>
    %234 = arith.addf %232, %233 : vector<8x128xf32>
    %cst_90 = arith.constant 5.000000e-01 : f32
    %235 = vector.broadcast %cst_90 : f32 to vector<8x128xf32>
    %236 = arith.mulf %235, %234 : vector<8x128xf32>
    %237 = vector.extract_strided_slice %220 {offsets = [0, 256], sizes = [8, 128], strides = [1, 1]} : vector<8x512xf32> to vector<8x128xf32>
    %238 = math.tanh %237 : vector<8x128xf32>
    %239 = vector.extract_strided_slice %220 {offsets = [0, 384], sizes = [8, 128], strides = [1, 1]} : vector<8x512xf32> to vector<8x128xf32>
    %cst_91 = arith.constant 5.000000e-01 : f32
    %240 = vector.broadcast %cst_91 : f32 to vector<8x128xf32>
    %241 = arith.mulf %240, %239 : vector<8x128xf32>
    %242 = math.tanh %241 : vector<8x128xf32>
    %cst_92 = arith.constant 1.000000e+00 : f32
    %243 = vector.broadcast %cst_92 : f32 to vector<8x128xf32>
    %244 = arith.addf %242, %243 : vector<8x128xf32>
    %cst_93 = arith.constant 5.000000e-01 : f32
    %245 = vector.broadcast %cst_93 : f32 to vector<8x128xf32>
    %246 = arith.mulf %245, %244 : vector<8x128xf32>
    %247 = arith.mulf %236, %215 : vector<8x128xf32>
    %248 = arith.mulf %228, %238 : vector<8x128xf32>
    %249 = arith.addf %247, %248 : vector<8x128xf32>
    %250 = math.tanh %249 : vector<8x128xf32>
    %251 = arith.mulf %246, %250 : vector<8x128xf32>
    %252 = arith.addi %13, %c5_i32 : i32
    %c8_i32_94 = arith.constant 8 : i32
    %253 = arith.cmpi slt, %252, %c8_i32_94 : i32
    %254 = arith.select %253, %251, %214 : vector<8x128xf32>
    %255 = arith.select %253, %249, %215 : vector<8x128xf32>
    %c6_i32 = arith.constant 6 : i32
    %256 = arith.index_cast %c6_i32 : i32 to index
    %c0_95 = arith.constant 0 : index
    %c0_96 = arith.constant 0 : index
    %257 = vector.load %arg9[%256, %c0_95, %c0_96] : memref<8x8x512xf32, #tpu.memory_space<vmem>>, vector<1x8x512xf32>
    %258 = vector.shape_cast %257 : vector<1x8x512xf32> to vector<8x512xf32>
    %cst_97 = arith.constant dense<0.000000e+00> : vector<8x512xf32>
    %259 = tpu.matmul %254, %12, %cst_97 {dimension_numbers = #tpu.dot_dimension_numbers<[1], [0], [0], [1], [0, 0, 1, 1], [], []>} : vector<8x128xf32>, vector<128x512xf32>, vector<8x512xf32> -> vector<8x512xf32>
    %260 = arith.addf %258, %259 : vector<8x512xf32>
    %261 = vector.extract_strided_slice %260 {offsets = [0, 0], sizes = [8, 128], strides = [1, 1]} : vector<8x512xf32> to vector<8x128xf32>
    %cst_98 = arith.constant 5.000000e-01 : f32
    %262 = vector.broadcast %cst_98 : f32 to vector<8x128xf32>
    %263 = arith.mulf %262, %261 : vector<8x128xf32>
    %264 = math.tanh %263 : vector<8x128xf32>
    %cst_99 = arith.constant 1.000000e+00 : f32
    %265 = vector.broadcast %cst_99 : f32 to vector<8x128xf32>
    %266 = arith.addf %264, %265 : vector<8x128xf32>
    %cst_100 = arith.constant 5.000000e-01 : f32
    %267 = vector.broadcast %cst_100 : f32 to vector<8x128xf32>
    %268 = arith.mulf %267, %266 : vector<8x128xf32>
    %269 = vector.extract_strided_slice %260 {offsets = [0, 128], sizes = [8, 128], strides = [1, 1]} : vector<8x512xf32> to vector<8x128xf32>
    %cst_101 = arith.constant 5.000000e-01 : f32
    %270 = vector.broadcast %cst_101 : f32 to vector<8x128xf32>
    %271 = arith.mulf %270, %269 : vector<8x128xf32>
    %272 = math.tanh %271 : vector<8x128xf32>
    %cst_102 = arith.constant 1.000000e+00 : f32
    %273 = vector.broadcast %cst_102 : f32 to vector<8x128xf32>
    %274 = arith.addf %272, %273 : vector<8x128xf32>
    %cst_103 = arith.constant 5.000000e-01 : f32
    %275 = vector.broadcast %cst_103 : f32 to vector<8x128xf32>
    %276 = arith.mulf %275, %274 : vector<8x128xf32>
    %277 = vector.extract_strided_slice %260 {offsets = [0, 256], sizes = [8, 128], strides = [1, 1]} : vector<8x512xf32> to vector<8x128xf32>
    %278 = math.tanh %277 : vector<8x128xf32>
    %279 = vector.extract_strided_slice %260 {offsets = [0, 384], sizes = [8, 128], strides = [1, 1]} : vector<8x512xf32> to vector<8x128xf32>
    %cst_104 = arith.constant 5.000000e-01 : f32
    %280 = vector.broadcast %cst_104 : f32 to vector<8x128xf32>
    %281 = arith.mulf %280, %279 : vector<8x128xf32>
    %282 = math.tanh %281 : vector<8x128xf32>
    %cst_105 = arith.constant 1.000000e+00 : f32
    %283 = vector.broadcast %cst_105 : f32 to vector<8x128xf32>
    %284 = arith.addf %282, %283 : vector<8x128xf32>
    %cst_106 = arith.constant 5.000000e-01 : f32
    %285 = vector.broadcast %cst_106 : f32 to vector<8x128xf32>
    %286 = arith.mulf %285, %284 : vector<8x128xf32>
    %287 = arith.mulf %276, %255 : vector<8x128xf32>
    %288 = arith.mulf %268, %278 : vector<8x128xf32>
    %289 = arith.addf %287, %288 : vector<8x128xf32>
    %290 = math.tanh %289 : vector<8x128xf32>
    %291 = arith.mulf %286, %290 : vector<8x128xf32>
    %292 = arith.addi %13, %c6_i32 : i32
    %c8_i32_107 = arith.constant 8 : i32
    %293 = arith.cmpi slt, %292, %c8_i32_107 : i32
    %294 = arith.select %293, %291, %254 : vector<8x128xf32>
    %295 = arith.select %293, %289, %255 : vector<8x128xf32>
    %c7_i32 = arith.constant 7 : i32
    %296 = arith.index_cast %c7_i32 : i32 to index
    %c0_108 = arith.constant 0 : index
    %c0_109 = arith.constant 0 : index
    %297 = vector.load %arg9[%296, %c0_108, %c0_109] : memref<8x8x512xf32, #tpu.memory_space<vmem>>, vector<1x8x512xf32>
    %298 = vector.shape_cast %297 : vector<1x8x512xf32> to vector<8x512xf32>
    %cst_110 = arith.constant dense<0.000000e+00> : vector<8x512xf32>
    %299 = tpu.matmul %294, %12, %cst_110 {dimension_numbers = #tpu.dot_dimension_numbers<[1], [0], [0], [1], [0, 0, 1, 1], [], []>} : vector<8x128xf32>, vector<128x512xf32>, vector<8x512xf32> -> vector<8x512xf32>
    %300 = arith.addf %298, %299 : vector<8x512xf32>
    %301 = vector.extract_strided_slice %300 {offsets = [0, 0], sizes = [8, 128], strides = [1, 1]} : vector<8x512xf32> to vector<8x128xf32>
    %cst_111 = arith.constant 5.000000e-01 : f32
    %302 = vector.broadcast %cst_111 : f32 to vector<8x128xf32>
    %303 = arith.mulf %302, %301 : vector<8x128xf32>
    %304 = math.tanh %303 : vector<8x128xf32>
    %cst_112 = arith.constant 1.000000e+00 : f32
    %305 = vector.broadcast %cst_112 : f32 to vector<8x128xf32>
    %306 = arith.addf %304, %305 : vector<8x128xf32>
    %cst_113 = arith.constant 5.000000e-01 : f32
    %307 = vector.broadcast %cst_113 : f32 to vector<8x128xf32>
    %308 = arith.mulf %307, %306 : vector<8x128xf32>
    %309 = vector.extract_strided_slice %300 {offsets = [0, 128], sizes = [8, 128], strides = [1, 1]} : vector<8x512xf32> to vector<8x128xf32>
    %cst_114 = arith.constant 5.000000e-01 : f32
    %310 = vector.broadcast %cst_114 : f32 to vector<8x128xf32>
    %311 = arith.mulf %310, %309 : vector<8x128xf32>
    %312 = math.tanh %311 : vector<8x128xf32>
    %cst_115 = arith.constant 1.000000e+00 : f32
    %313 = vector.broadcast %cst_115 : f32 to vector<8x128xf32>
    %314 = arith.addf %312, %313 : vector<8x128xf32>
    %cst_116 = arith.constant 5.000000e-01 : f32
    %315 = vector.broadcast %cst_116 : f32 to vector<8x128xf32>
    %316 = arith.mulf %315, %314 : vector<8x128xf32>
    %317 = vector.extract_strided_slice %300 {offsets = [0, 256], sizes = [8, 128], strides = [1, 1]} : vector<8x512xf32> to vector<8x128xf32>
    %318 = math.tanh %317 : vector<8x128xf32>
    %319 = vector.extract_strided_slice %300 {offsets = [0, 384], sizes = [8, 128], strides = [1, 1]} : vector<8x512xf32> to vector<8x128xf32>
    %cst_117 = arith.constant 5.000000e-01 : f32
    %320 = vector.broadcast %cst_117 : f32 to vector<8x128xf32>
    %321 = arith.mulf %320, %319 : vector<8x128xf32>
    %322 = math.tanh %321 : vector<8x128xf32>
    %cst_118 = arith.constant 1.000000e+00 : f32
    %323 = vector.broadcast %cst_118 : f32 to vector<8x128xf32>
    %324 = arith.addf %322, %323 : vector<8x128xf32>
    %cst_119 = arith.constant 5.000000e-01 : f32
    %325 = vector.broadcast %cst_119 : f32 to vector<8x128xf32>
    %326 = arith.mulf %325, %324 : vector<8x128xf32>
    %327 = arith.mulf %316, %295 : vector<8x128xf32>
    %328 = arith.mulf %308, %318 : vector<8x128xf32>
    %329 = arith.addf %327, %328 : vector<8x128xf32>
    %330 = math.tanh %329 : vector<8x128xf32>
    %331 = arith.mulf %326, %330 : vector<8x128xf32>
    %332 = arith.addi %13, %c7_i32 : i32
    %c8_i32_120 = arith.constant 8 : i32
    %333 = arith.cmpi slt, %332, %c8_i32_120 : i32
    %334 = arith.select %333, %331, %294 : vector<8x128xf32>
    %335 = arith.select %333, %329, %295 : vector<8x128xf32>
    %c8_i32_121 = arith.constant 8 : i32
    %c0_122 = arith.constant 0 : index
    %c0_123 = arith.constant 0 : index
    %336 = vector.load %arg7[%c0_122, %c0_123] : memref<8x128xf32, #tpu.memory_space<vmem>>, vector<8x128xf32>
    tpu.vector_store %arg7[%c0_122, %c0_123], %334 {strides = array<i32>} : memref<8x128xf32, #tpu.memory_space<vmem>>, vector<8x128xf32>,
    %c0_124 = arith.constant 0 : index
    %c0_125 = arith.constant 0 : index
    %337 = vector.load %arg8[%c0_124, %c0_125] : memref<8x128xf32, #tpu.memory_space<vmem>>, vector<8x128xf32>
    tpu.vector_store %arg8[%c0_124, %c0_125], %335 {strides = array<i32>} : memref<8x128xf32, #tpu.memory_space<vmem>>, vector<8x128xf32>,
    %c0_i32_126 = arith.constant 0 : i32
    %338 = arith.cmpi eq, %arg1, %c0_i32_126 : i32
    %339 = arith.extui %338 : i1 to i32
    %c0_i32_127 = arith.constant 0 : i32
    %340 = arith.cmpi ne, %339, %c0_i32_127 : i32
    scf.if %340 {
      %c0_128 = arith.constant 0 : index
      %c0_129 = arith.constant 0 : index
      %341 = vector.load %arg6[%c0_128, %c0_129] : memref<8x128xf32, #tpu.memory_space<vmem>>, vector<8x128xf32>
      tpu.vector_store %arg6[%c0_128, %c0_129], %334 {strides = array<i32>} : memref<8x128xf32, #tpu.memory_space<vmem>>, vector<8x128xf32>,
    } else {
    }
    return
  }
  func.func @transform_0(%arg0: i32, %arg1: i32) -> (i32, i32, i32) {
    %c0_i32 = arith.constant 0 : i32
    %c0_i32_0 = arith.constant 0 : i32
    return %arg1, %arg0, %c0_i32 : i32, i32, i32
  }
  func.func @transform_1(%arg0: i32, %arg1: i32) -> (i32, i32) {
    %c0_i32 = arith.constant 0 : i32
    %c0_i32_0 = arith.constant 0 : i32
    %c0_i32_1 = arith.constant 0 : i32
    return %c0_i32, %c0_i32_0 : i32, i32
  }
  func.func @transform_2(%arg0: i32, %arg1: i32) -> (i32, i32) {
    %c0_i32 = arith.constant 0 : i32
    %c0_i32_0 = arith.constant 0 : i32
    %c0_i32_1 = arith.constant 0 : i32
    return %c0_i32, %c0_i32_0 : i32, i32
  }
  func.func @transform_3(%arg0: i32, %arg1: i32) -> (i32, i32) {
    %c0_i32 = arith.constant 0 : i32
    %c0_i32_0 = arith.constant 0 : i32
    %c0_i32_1 = arith.constant 0 : i32
    return %c0_i32, %c0_i32_0 : i32, i32
  }
  func.func @transform_4(%arg0: i32, %arg1: i32) -> (i32, i32) {
    %c0_i32 = arith.constant 0 : i32
    %c0_i32_0 = arith.constant 0 : i32
    return %arg0, %c0_i32 : i32, i32
  }
}

</mosaic_0001>

<bundles_post_ra>
// kernel: many_to_one_rnn_forward.3
= control target key start
LH: loop header
LB: loop body
LE: loop exit
PB: predicated region body
PF: predicated region fallthrough
CT: control target
= control target key end

     0   :  { %v2579_v3 = vmov 0.0   ;;  %s3437_s1 = inlined_call_operand.vmem [shape: f32[128,512], index: 1, kind: input, shape index: {}]   ;;  %s3438_s2 = inlined_call_operand.vmem [shape: f32[128,512], index: 2, kind: input, shape index: {}]   ;;  %s3439_s0 = inlined_call_operand.vmem [shape: f32[8,8,128], index: 0, kind: input, shape index: {}]   ;;  %s3440_s3 = inlined_call_operand.vmem [shape: f32[1,512], index: 3, kind: input, shape index: {}]   ;;  %s3441_s4 = inlined_call_operand.vmem [shape: f32[8,128], index: 4, kind: output, shape index: {}]  }
   0x1   :  { %v32_v0 = vld [vmem:[%s3437_s1 + $0x8] sm:$0xff]  ;;  %v34_v2 = vld [vmem:[%s3437_s1 + $0x18] sm:$0xff]  ;;  %181 = vmatprep.mubr.f32.mxu0 %v2579_v3  ;;  %294 = vmatprep.mubr.f32.mxu1 %v2579_v3  ;;  %v31_v6 = vld [vmem:[%s3437_s1] sm:$0xff] }
   0x2   :  { %v36_v1 = vld [vmem:[%s3437_s1 + $0x28] sm:$0xff]  ;;  %v38_v5 = vld [vmem:[%s3437_s1 + $0x38] sm:$0xff]  ;;  %v35_v7 = vld [vmem:[%s3437_s1 + $0x20] sm:$0xff] }
   0x3   :  { %v1858_v4 = vpack.c.bf16 %v36_v1, %v32_v0  ;;  %v1890_v8 = vpack.c.bf16 %v38_v5, %v34_v2  ;;  %v1860_v9 = vpack.c.bf16 %v35_v7, %v31_v6  ;;  %v33_v10 = vld [vmem:[%s3437_s1 + $0x10] sm:$0xff]  ;;  %v40_v12 = vld [vmem:[%s3437_s1 + $0x48] sm:$0xff]  ;;  %v42_v15 = vld [vmem:[%s3437_s1 + $0x58] sm:$0xff] }
   0x4   :  { %v37_v11 = vld [vmem:[%s3437_s1 + $0x30] sm:$0xff]  ;;  %v44_v14 = vld [vmem:[%s3437_s1 + $0x68] sm:$0xff]  ;;  %v46_v16 = vld [vmem:[%s3437_s1 + $0x78] sm:$0xff] }
   0x5   :  { %1859 = vmatprep.subr.bf16.mxu0 %v1858_v4  ;;  %v1892_v13 = vpack.c.bf16 %v37_v11, %v33_v10  ;;  %1891 = vmatprep.subr.bf16.mxu1 %v1890_v8  ;;  %v1862_v17 = vpack.c.bf16 %v44_v14, %v40_v12  ;;  %v1894_v18 = vpack.c.bf16 %v46_v16, %v42_v15  ;;  %v39_v19 = vld [vmem:[%s3437_s1 + $0x40] sm:$0xff]  ;;  %v41_v21 = vld [vmem:[%s3437_s1 + $0x50] sm:$0xff]  ;;  %v48_v24 = vld [vmem:[%s3437_s1 + $0x88] sm:$0xff] }
   0x6   :  { %1861 = vmatpush1.bf16.msra.mxu0 %v1860_v9  ;;  %v43_v20 = vld [vmem:[%s3437_s1 + $0x60] sm:$0xff]  ;;  %v45_v23 = vld [vmem:[%s3437_s1 + $0x70] sm:$0xff]  ;;  %v52_v25 = vld [vmem:[%s3437_s1 + $0xa8] sm:$0xff] }
   0x7   :  { %1893 = vmatpush1.bf16.msra.mxu1 %v1892_v13  ;;  %v1864_v22 = vpack.c.bf16 %v43_v20, %v39_v19  ;;  %1863 = vmatprep.subr.bf16.mxu0 %v1862_v17  ;;  %v1896_v26 = vpack.c.bf16 %v45_v23, %v41_v21  ;;  %v1866_v27 = vpack.c.bf16 %v52_v25, %v48_v24  ;;  %v50_v28 = vld [vmem:[%s3437_s1 + $0x98] sm:$0xff]  ;;  %v47_v30 = vld [vmem:[%s3437_s1 + $0x80] sm:$0xff]  ;;  %v49_v33 = vld [vmem:[%s3437_s1 + $0x90] sm:$0xff] }
   0x8   :  { %1895 = vmatprep.subr.bf16.mxu1 %v1894_v18  ;;  %v54_v29 = vld [vmem:[%s3437_s1 + $0xb8] sm:$0xff]  ;;  %v51_v32 = vld [vmem:[%s3437_s1 + $0xa0] sm:$0xff]  ;;  %v53_v34 = vld [vmem:[%s3437_s1 + $0xb0] sm:$0xff] }
   0x9   :  { %v1898_v31 = vpack.c.bf16 %v54_v29, %v50_v28  ;;  %v1868_v35 = vpack.c.bf16 %v51_v32, %v47_v30  ;;  %v56_v36 = vld [vmem:[%s3437_s1 + $0xc8] sm:$0xff]  ;;  %v58_v38 = vld [vmem:[%s3437_s1 + $0xd8] sm:$0xff]  ;;  %v1900_v39 = vpack.c.bf16 %v53_v34, %v49_v33  ;;  %v55_v42 = vld [vmem:[%s3437_s1 + $0xc0] sm:$0xff] }
   0xa   :  { %1865 = vmatpush1.bf16.msra.mxu0 %v1864_v22  ;;  %v60_v37 = vld [vmem:[%s3437_s1 + $0xe8] sm:$0xff]  ;;  %v62_v41 = vld [vmem:[%s3437_s1 + $0xf8] sm:$0xff]  ;;  %v59_v43 = vld [vmem:[%s3437_s1 + $0xe0] sm:$0xff] }
   0xb   :  { %1897 = vmatpush1.bf16.msra.mxu1 %v1896_v26  ;;  %1867 = vmatprep.subr.bf16.mxu0 %v1866_v27  ;;  %v1870_v40 = vpack.c.bf16 %v60_v37, %v56_v36  ;;  %v1902_v44 = vpack.c.bf16 %v62_v41, %v58_v38  ;;  %v57_v45 = vld [vmem:[%s3437_s1 + $0xd0] sm:$0xff]  ;;  %v64_v47 = vld [vmem:[%s3437_s1 + $0x108] sm:$0xff]  ;;  %v66_v49 = vld [vmem:[%s3437_s1 + $0x118] sm:$0xff]  ;;  %v1872_v51 = vpack.c.bf16 %v59_v43, %v55_v42 }
   0xc   :  { %1899 = vmatprep.subr.bf16.mxu1 %v1898_v31  ;;  %v61_v46 = vld [vmem:[%s3437_s1 + $0xf0] sm:$0xff]  ;;  %v68_v48 = vld [vmem:[%s3437_s1 + $0x128] sm:$0xff]  ;;  %v70_v50 = vld [vmem:[%s3437_s1 + $0x138] sm:$0xff] }
   0xd   :  { %v1904_v52 = vpack.c.bf16 %v61_v46, %v57_v45  ;;  %v1874_v53 = vpack.c.bf16 %v68_v48, %v64_v47  ;;  %v63_v54 = vld [vmem:[%s3437_s1 + $0x100] sm:$0xff]  ;;  %v65_v56 = vld [vmem:[%s3437_s1 + $0x110] sm:$0xff]  ;;  %v1906_v57 = vpack.c.bf16 %v70_v50, %v66_v49  ;;  %v72_v59 = vld [vmem:[%s3437_s1 + $0x148] sm:$0xff] }
   0xe   :  { %1869 = vmatpush1.bf16.msra.mxu0 %v1868_v35  ;;  %v67_v55 = vld [vmem:[%s3437_s1 + $0x120] sm:$0xff]  ;;  %v69_v58 = vld [vmem:[%s3437_s1 + $0x130] sm:$0xff]  ;;  %v76_v60 = vld [vmem:[%s3437_s1 + $0x168] sm:$0xff] }
   0xf   :  { %1901 = vmatpush1.bf16.msra.mxu1 %v1900_v39  ;;  %1871 = vmatprep.subr.bf16.mxu0 %v1870_v40  ;;  %v74_v61 = vld [vmem:[%s3437_s1 + $0x158] sm:$0xff]  ;;  %v1876_v63 = vpack.c.bf16 %v67_v55, %v63_v54  ;;  %v1908_v0 = vpack.c.bf16 %v69_v58, %v65_v56  ;;  %v1878_v1 = vpack.c.bf16 %v76_v60, %v72_v59  ;;  %v71_v2 = vld [vmem:[%s3437_s1 + $0x140] sm:$0xff]  ;;  %v73_v5 = vld [vmem:[%s3437_s1 + $0x150] sm:$0xff] }
  0x10   :  { %1903 = vmatprep.subr.bf16.mxu1 %v1902_v44  ;;  %v78_v62 = vld [vmem:[%s3437_s1 + $0x178] sm:$0xff]  ;;  %v75_v4 = vld [vmem:[%s3437_s1 + $0x160] sm:$0xff]  ;;  %v77_v7 = vld [vmem:[%s3437_s1 + $0x170] sm:$0xff] }
  0x11   :  { %v1910_v6 = vpack.c.bf16 %v78_v62, %v74_v61  ;;  %v80_v8 = vld [vmem:[%s3437_s1 + $0x188] sm:$0xff]  ;;  %v82_v10 = vld [vmem:[%s3437_s1 + $0x198] sm:$0xff]  ;;  %v1880_v12 = vpack.c.bf16 %v75_v4, %v71_v2  ;;  %v1912_v13 = vpack.c.bf16 %v77_v7, %v73_v5  ;;  %v79_v15 = vld [vmem:[%s3437_s1 + $0x180] sm:$0xff] }
  0x12   :  { %1873 = vmatpush1.bf16.msra.mxu0 %v1872_v51  ;;  %v84_v9 = vld [vmem:[%s3437_s1 + $0x1a8] sm:$0xff]  ;;  %v86_v11 = vld [vmem:[%s3437_s1 + $0x1b8] sm:$0xff]  ;;  %v83_v16 = vld [vmem:[%s3437_s1 + $0x1a0] sm:$0xff] }
  0x13   :  { %1905 = vmatpush1.bf16.msra.mxu1 %v1904_v52  ;;  %1875 = vmatprep.subr.bf16.mxu0 %v1874_v53  ;;  %v1882_v14 = vpack.c.bf16 %v84_v9, %v80_v8  ;;  %v81_v17 = vld [vmem:[%s3437_s1 + $0x190] sm:$0xff]  ;;  %v1914_v18 = vpack.c.bf16 %v86_v11, %v82_v10  ;;  %v88_v20 = vld [vmem:[%s3437_s1 + $0x1c8] sm:$0xff]  ;;  %v90_v22 = vld [vmem:[%s3437_s1 + $0x1d8] sm:$0xff]  ;;  %v1884_v24 = vpack.c.bf16 %v83_v16, %v79_v15 }
  0x14   :  { %1907 = vmatprep.subr.bf16.mxu1 %v1906_v57  ;;  %v85_v19 = vld [vmem:[%s3437_s1 + $0x1b0] sm:$0xff]  ;;  %v92_v21 = vld [vmem:[%s3437_s1 + $0x1e8] sm:$0xff]  ;;  %v94_v23 = vld [vmem:[%s3437_s1 + $0x1f8] sm:$0xff] }
  0x15   :  { %v1916_v25 = vpack.c.bf16 %v85_v19, %v81_v17  ;;  %v1886_v26 = vpack.c.bf16 %v92_v21, %v88_v20  ;;  %v87_v27 = vld [vmem:[%s3437_s1 + $0x1c0] sm:$0xff]  ;;  %v89_v29 = vld [vmem:[%s3437_s1 + $0x1d0] sm:$0xff]  ;;  %v1918_v30 = vpack.c.bf16 %v94_v23, %v90_v22  ;;  %v376_v32 = vld [vmem:[%s3438_s2 + $0x8] sm:$0xff] }
  0x16   :  { %1877 = vmatpush1.bf16.msra.mxu0 %v1876_v63  ;;  %v91_v28 = vld [vmem:[%s3437_s1 + $0x1e0] sm:$0xff]  ;;  %v93_v31 = vld [vmem:[%s3437_s1 + $0x1f0] sm:$0xff]  ;;  %v380_v33 = vld [vmem:[%s3438_s2 + $0x28] sm:$0xff] }
  0x17   :  { %1909 = vmatpush1.bf16.msra.mxu1 %v1908_v0  ;;  %1879 = vmatprep.subr.bf16.mxu0 %v1878_v1  ;;  %v378_v34 = vld [vmem:[%s3438_s2 + $0x18] sm:$0xff]  ;;  %v1888_v36 = vpack.c.bf16 %v91_v28, %v87_v27  ;;  %v1920_v37 = vpack.c.bf16 %v93_v31, %v89_v29  ;;  %v2811_v38 = vpack.c.bf16 %v380_v33, %v376_v32  ;;  %v375_v39 = vld [vmem:[%s3438_s2] sm:$0xff]  ;;  %v377_v42 = vld [vmem:[%s3438_s2 + $0x10] sm:$0xff] }
  0x18   :  { %1911 = vmatprep.subr.bf16.mxu1 %v1910_v6  ;;  %v382_v35 = vld [vmem:[%s3438_s2 + $0x38] sm:$0xff]  ;;  %v379_v40 = vld [vmem:[%s3438_s2 + $0x20] sm:$0xff]  ;;  %v381_v43 = vld [vmem:[%s3438_s2 + $0x30] sm:$0xff] }
  0x19   :  { %v2819_v41 = vpack.c.bf16 %v382_v35, %v378_v34  ;;  %v384_v44 = vld [vmem:[%s3438_s2 + $0x48] sm:$0xff]  ;;  %v23_v46 = vld [vmem:[%s3439_s0] sm:$0xff]  ;;  %v2836_v47 = vpack.c.bf16 %v379_v40, %v375_v39  ;;  %v386_v48 = vld [vmem:[%s3438_s2 + $0x58] sm:$0xff]  ;;  %v2845_v50 = vpack.c.bf16 %v381_v43, %v377_v42 }
  0x1a   :  { %1881 = vmatpush1.bf16.msra.mxu0 %v1880_v12  ;;  %v388_v45 = vld [vmem:[%s3438_s2 + $0x68] sm:$0xff]  ;;  %v390_v49 = vld [vmem:[%s3438_s2 + $0x78] sm:$0xff]  ;;  %v383_v51 = vld [vmem:[%s3438_s2 + $0x40] sm:$0xff] }
  0x1b   :  { %1913 = vmatpush1.bf16.msra.mxu1 %v1912_v13  ;;  %1883 = vmatprep.subr.bf16.mxu0 %v1882_v14  ;;  %v387_v52 = vld [vmem:[%s3438_s2 + $0x60] sm:$0xff]  ;;  %v2854_v53 = vpack.c.bf16 %v388_v45, %v384_v44  ;;  %v385_v54 = vld [vmem:[%s3438_s2 + $0x50] sm:$0xff]  ;;  %v2862_v56 = vpack.c.bf16 %v390_v49, %v386_v48  ;;  %v392_v57 = vld [vmem:[%s3438_s2 + $0x88] sm:$0xff] }
  0x1c   :  { %1915 = vmatprep.subr.bf16.mxu1 %v1914_v18  ;;  %v389_v55 = vld [vmem:[%s3438_s2 + $0x70] sm:$0xff]  ;;  %v396_v58 = vld [vmem:[%s3438_s2 + $0xa8] sm:$0xff]  ;;  %v2874_v60 = vpack.c.bf16 %v387_v52, %v383_v51  ;;  %v394_v61 = vld [vmem:[%s3438_s2 + $0x98] sm:$0xff] }
  0x1d   :  { %v24_v59 = vld [vmem:[%s3439_s0 + $0x8] sm:$0xff]  ;;  %v398_v62 = vld [vmem:[%s3438_s2 + $0xb8] sm:$0xff]  ;;  %v2884_v63 = vpack.c.bf16 %v389_v55, %v385_v54  ;;  %v391_v0 = vld [vmem:[%s3438_s2 + $0x80] sm:$0xff]  ;;  %v2894_v2 = vpack.c.bf16 %v396_v58, %v392_v57 }
  0x1e   :  { %1885 = vmatpush1.bf16.msra.mxu0 %v1884_v24  ;;  %v395_v1 = vld [vmem:[%s3438_s2 + $0xa0] sm:$0xff]  ;;  %v393_v4 = vld [vmem:[%s3438_s2 + $0x90] sm:$0xff]  ;;  %v2903_v6 = vpack.c.bf16 %v398_v62, %v394_v61  ;;  %v400_v7 = vld [vmem:[%s3438_s2 + $0xc8] sm:$0xff] }
  0x1f   :  { %1917 = vmatpush1.bf16.msra.mxu1 %v1916_v25  ;;  %1887 = vmatprep.subr.bf16.mxu0 %v1886_v26  ;;  %v397_v5 = vld [vmem:[%s3438_s2 + $0xb0] sm:$0xff]  ;;  %v404_v8 = vld [vmem:[%s3438_s2 + $0xe8] sm:$0xff]  ;;  %v2915_v10 = vpack.c.bf16 %v395_v1, %v391_v0  ;;  %v402_v11 = vld [vmem:[%s3438_s2 + $0xd8] sm:$0xff] }
  0x20   :  { %1919 = vmatprep.subr.bf16.mxu1 %v1918_v30  ;;  %v25_v9 = vld [vmem:[%s3439_s0 + $0x10] sm:$0xff]  ;;  %v406_v12 = vld [vmem:[%s3438_s2 + $0xf8] sm:$0xff]  ;;  %v2925_v13 = vpack.c.bf16 %v397_v5, %v393_v4  ;;  %v399_v14 = vld [vmem:[%s3438_s2 + $0xc0] sm:$0xff]  ;;  %v2935_v16 = vpack.c.bf16 %v404_v8, %v400_v7 }
  0x21   :  { %v403_v15 = vld [vmem:[%s3438_s2 + $0xe0] sm:$0xff]  ;;  %v401_v17 = vld [vmem:[%s3438_s2 + $0xd0] sm:$0xff]  ;;  %v2944_v19 = vpack.c.bf16 %v406_v12, %v402_v11  ;;  %v408_v20 = vld [vmem:[%s3438_s2 + $0x108] sm:$0xff] }
  0x22   :  { %1889 = vmatpush1.bf16.msra.mxu0 %v1888_v36  ;;  %v405_v18 = vld [vmem:[%s3438_s2 + $0xf0] sm:$0xff]  ;;  %v412_v21 = vld [vmem:[%s3438_s2 + $0x128] sm:$0xff]  ;;  %v26_v22 = vld [vmem:[%s3439_s0 + $0x18] sm:$0xff]  ;;  %v2956_v23 = vpack.c.bf16 %v403_v15, %v399_v14 }
  0x23   :  { %1921 = vmatpush1.bf16.msra.mxu1 %v1920_v37  ;;  %1923 = vmatprep.subr.bf16.mxu0 %v2811_v38  ;;  %v410_v24 = vld [vmem:[%s3438_s2 + $0x118] sm:$0xff]  ;;  %v2966_v26 = vpack.c.bf16 %v405_v18, %v401_v17  ;;  %v407_v27 = vld [vmem:[%s3438_s2 + $0x100] sm:$0xff]  ;;  %v2976_v29 = vpack.c.bf16 %v412_v21, %v408_v20  ;;  %v409_v30 = vld [vmem:[%s3438_s2 + $0x110] sm:$0xff] }
  0x24   :  { %1955 = vmatprep.subr.bf16.mxu1 %v2819_v41  ;;  %v414_v25 = vld [vmem:[%s3438_s2 + $0x138] sm:$0xff]  ;;  %v411_v28 = vld [vmem:[%s3438_s2 + $0x120] sm:$0xff]  ;;  %v413_v31 = vld [vmem:[%s3438_s2 + $0x130] sm:$0xff] }
  0x25   :  { %182 = vmatmul.mubr.f32.vlgmr.msra.gmra.mrb[0].mxu0 %v23_v46  ;;  %v2985_v32 = vpack.c.bf16 %v414_v25, %v410_v24  ;;  %v416_v33 = vld [vmem:[%s3438_s2 + $0x148] sm:$0xff]  ;;  %v27_v35 = vld [vmem:[%s3439_s0 + $0x20] sm:$0xff]  ;;  %v2997_v36 = vpack.c.bf16 %v411_v28, %v407_v27  ;;  %v418_v37 = vld [vmem:[%s3438_s2 + $0x158] sm:$0xff]  ;;  %v3007_v40 = vpack.c.bf16 %v413_v31, %v409_v30  ;;  %v97_v28 = vlaneseq }
  0x26   :  { %295 = vmatmul.mubr.f32.vlgmr.msra.gmra.mrb[0].mxu1 %v23_v46  ;;  %1925 = vmatpush1.bf16.msra.mxu0 %v2836_v47  ;;  %v420_v34 = vld [vmem:[%s3438_s2 + $0x168] sm:$0xff]  ;;  %v422_v39 = vld [vmem:[%s3438_s2 + $0x178] sm:$0xff]  ;;  %v415_v42 = vld [vmem:[%s3438_s2 + $0x140] sm:$0xff] }
  0x27   :  { %1957 = vmatpush1.bf16.msra.mxu1 %v2845_v50  ;;  %187 = vmatprep.mubr.f32.mxu0 %v2579_v3  ;;  %v419_v43 = vld [vmem:[%s3438_s2 + $0x160] sm:$0xff]  ;;  %v3017_v44 = vpack.c.bf16 %v420_v34, %v416_v33  ;;  %v417_v45 = vld [vmem:[%s3438_s2 + $0x150] sm:$0xff]  ;;  %v3026_v48 = vpack.c.bf16 %v422_v39, %v418_v37  ;;  %v424_v49 = vld [vmem:[%s3438_s2 + $0x188] sm:$0xff]  ;;  %v98_v30 = vshrl.u32 %v97_v28, 7 }
  0x28   :  { %300 = vmatprep.mubr.f32.mxu1 %v2579_v3  ;;  %1927 = vmatprep.subr.bf16.mxu0 %v2854_v53  ;;  %v421_v46 = vld [vmem:[%s3438_s2 + $0x170] sm:$0xff]  ;;  %v428_v51 = vld [vmem:[%s3438_s2 + $0x1a8] sm:$0xff]  ;;  %v3038_v54 = vpack.c.bf16 %v419_v43, %v415_v42  ;;  %v426_v55 = vld [vmem:[%s3438_s2 + $0x198] sm:$0xff] }
  0x29   :  { %188 = vmatmul.mubr.f32.gmra.mrb[2].mxu0 %v24_v59  ;;  %1959 = vmatprep.subr.bf16.mxu1 %v2862_v56  ;;  %v28_v52 = vld [vmem:[%s3439_s0 + $0x28] sm:$0xff]  ;;  %v430_v57 = vld [vmem:[%s3438_s2 + $0x1b8] sm:$0xff]  ;;  %v3048_v58 = vpack.c.bf16 %v421_v46, %v417_v45  ;;  %v427_v61 = vld [vmem:[%s3438_s2 + $0x1a0] sm:$0xff]  ;;  %v3058_v62 = vpack.c.bf16 %v428_v51, %v424_v49  ;;  %v99_v31 = vsub.s32 0, %v98_v30  ;;  %v103_v34 = vsub.s32 1, %v98_v30 }
  0x2a   :  { %301 = vmatmul.mubr.f32.gmra.mrb[2].mxu1 %v24_v59  ;;  %1929 = vmatpush1.bf16.msra.mxu0 %v2874_v60  ;;  %v423_v59 = vld [vmem:[%s3438_s2 + $0x180] sm:$0xff]  ;;  %v425_v0 = vld [vmem:[%s3438_s2 + $0x190] sm:$0xff]  ;;  %v3067_v4 = vpack.c.bf16 %v430_v57, %v426_v55  ;;  %v432_v5 = vld [vmem:[%s3438_s2 + $0x1c8] sm:$0xff]  ;;  %v107_v37 = vsub.s32 2, %v98_v30  ;;  %v111_v51 = vsub.s32 3, %v98_v30 }
  0x2b   :  { %1961 = vmatpush1.bf16.msra.mxu1 %v2884_v63  ;;  %193 = vmatprep.mubr.f32.mxu0 %v2579_v3  ;;  %v429_v1 = vld [vmem:[%s3438_s2 + $0x1b0] sm:$0xff]  ;;  %v436_v7 = vld [vmem:[%s3438_s2 + $0x1e8] sm:$0xff]  ;;  %v434_v11 = vld [vmem:[%s3438_s2 + $0x1d8] sm:$0xff] }
  0x2c   :  { %306 = vmatprep.mubr.f32.mxu1 %v2579_v3  ;;  %1931 = vmatprep.subr.bf16.mxu0 %v2894_v2  ;;  %v29_v8 = vld [vmem:[%s3439_s0 + $0x30] sm:$0xff]  ;;  %v438_v12 = vld [vmem:[%s3438_s2 + $0x1f8] sm:$0xff]  ;;  %v3089_v14 = vpack.c.bf16 %v429_v1, %v425_v0  ;;  %v431_v15 = vld [vmem:[%s3438_s2 + $0x1c0] sm:$0xff]  ;;  %v3099_v18 = vpack.c.bf16 %v436_v7, %v432_v5 }
  0x2d   :  { %194 = vmatmul.mubr.f32.gmra.mrb[4].mxu0 %v25_v9  ;;  %1963 = vmatprep.subr.bf16.mxu1 %v2903_v6  ;;  %v435_v17 = vld [vmem:[%s3438_s2 + $0x1e0] sm:$0xff]  ;;  %v433_v20 = vld [vmem:[%s3438_s2 + $0x1d0] sm:$0xff]  ;;  %v30_v24 = vld [vmem:[%s3439_s0 + $0x38] sm:$0xff] }
  0x2e   :  { %307 = vmatmul.mubr.f32.gmra.mrb[4].mxu1 %v25_v9  ;;  %1933 = vmatpush1.bf16.msra.mxu0 %v2915_v10  ;;  %v3079_v9 = vpack.c.bf16 %v427_v61, %v423_v59  ;;  %v437_v21 = vld [vmem:[%s3438_s2 + $0x1f0] sm:$0xff]  ;;  %v3114_v25 = vpack.c.bf16 %v435_v17, %v431_v15  ;;  %v95_v33 = vld [vmem:[%s3440_s3] sm:$0xf] }
  0x2f   :  { %1965 = vmatpush1.bf16.msra.mxu1 %v2925_v13  ;;  %199 = vmatprep.mubr.f32.mxu0 %v2579_v3  ;;  %v3118_v27 = vpack.c.bf16 %v437_v21, %v433_v20  ;;  %v3170_v39 = vrot.slane %v95_v33, %v103_v34  ;;  %v3173_v45 = vrot.slane %v95_v33, %v107_v37 }
  0x30   :  { %312 = vmatprep.mubr.f32.mxu1 %v2579_v3  ;;  %1935 = vmatprep.subr.bf16.mxu0 %v2935_v16  ;;  %v3177_v0 = vrot.slane %v95_v33, %v111_v51 }
  0x31   :  { %200 = vmatmul.mubr.f32.gmra.mrb[6].mxu0 %v26_v22  ;;  %1967 = vmatprep.subr.bf16.mxu1 %v2944_v19 }
  0x32   :  { %313 = vmatmul.mubr.f32.gmra.mrb[6].mxu1 %v26_v22  ;;  %1937 = vmatpush1.bf16.msra.mxu0 %v2956_v23  ;;  %v3108_v22 = vpack.c.bf16 %v438_v12, %v434_v11 }
  0x33   :  { %1969 = vmatpush1.bf16.msra.mxu1 %v2966_v26  ;;  %205 = vmatprep.mubr.f32.mxu0 %v2579_v3 }
  0x34   :  { %318 = vmatprep.mubr.f32.mxu1 %v2579_v3  ;;  %1939 = vmatprep.subr.bf16.mxu0 %v2976_v29 }
  0x35   :  { %206 = vmatmul.mubr.f32.gmra.mrb[8].mxu0 %v27_v35  ;;  %1971 = vmatprep.subr.bf16.mxu1 %v2985_v32 }
  0x36   :  { %319 = vmatmul.mubr.f32.gmra.mrb[8].mxu1 %v27_v35  ;;  %1941 = vmatpush1.bf16.msra.mxu0 %v2997_v36  ;;  %v3168_v35 = vrot.slane %v95_v33, %v99_v31 }
  0x37   :  { %1973 = vmatpush1.bf16.msra.mxu1 %v3007_v40  ;;  %211 = vmatprep.mubr.f32.mxu0 %v2579_v3 }
  0x38   :  { %324 = vmatprep.mubr.f32.mxu1 %v2579_v3  ;;  %1943 = vmatprep.subr.bf16.mxu0 %v3017_v44 }
  0x39   :  { %212 = vmatmul.mubr.f32.gmra.mrb[10].mxu0 %v28_v52  ;;  %1975 = vmatprep.subr.bf16.mxu1 %v3026_v48 }
  0x3a   :  { %325 = vmatmul.mubr.f32.gmra.mrb[10].mxu1 %v28_v52  ;;  %1945 = vmatpush1.bf16.msra.mxu0 %v3038_v54 }
  0x3b   :  { %1977 = vmatpush1.bf16.msra.mxu1 %v3048_v58  ;;  %217 = vmatprep.mubr.f32.mxu0 %v2579_v3 }
  0x3c   :  { %330 = vmatprep.mubr.f32.mxu1 %v2579_v3  ;;  %1947 = vmatprep.subr.bf16.mxu0 %v3058_v62 }
  0x3d   :  { %218 = vmatmul.mubr.f32.gmra.mrb[12].mxu0 %v29_v8  ;;  %1979 = vmatprep.subr.bf16.mxu1 %v3067_v4 }
  0x3e   :  { %331 = vmatmul.mubr.f32.gmra.mrb[12].mxu1 %v29_v8  ;;  %1949 = vmatpush1.bf16.msra.mxu0 %v3079_v9 }
  0x3f   :  { %1981 = vmatpush1.bf16.msra.mxu1 %v3089_v14  ;;  %223 = vmatprep.mubr.f32.mxu0 %v2579_v3 }
  0x40   :  { %336 = vmatprep.mubr.f32.mxu1 %v2579_v3  ;;  %1951 = vmatprep.subr.bf16.mxu0 %v3099_v18 }
  0x41   :  { %224 = vmatmul.mubr.f32.gmra.mrb[14].mxu0 %v30_v24  ;;  %1983 = vmatprep.subr.bf16.mxu1 %v3108_v22 }
  0x42   :  { %337 = vmatmul.mubr.f32.gmra.mrb[14].mxu1 %v30_v24  ;;  %1953 = vmatpush1.bf16.msra.mxu0 %v3114_v25 }
  0x43   :  { %1985 = vmatpush1.bf16.msra.mxu1 %v3118_v27  ;;  %510 = vmatprep.mubr.f32.mxu0 %v2579_v3 }
  0x44   :  { %581 = vmatprep.mubr.f32.mxu1 %v2579_v3  ;;  %1987 = vmatprep.subr.bf16.mxu0 %v2811_v38 }
  0x45   :  { %511 = vmatmul.mubr.f32.vlgmr.msra.gmra.mrb[0].mxu0 %v2579_v3  ;;  %2019 = vmatprep.subr.bf16.mxu1 %v2819_v41 }
  0x46   :  { %582 = vmatmul.mubr.f32.vlgmr.msra.gmra.mrb[0].mxu1 %v2579_v3  ;;  %1989 = vmatpush1.bf16.msra.mxu0 %v2836_v47 }
  0x47   :  { %2021 = vmatpush1.bf16.msra.mxu1 %v2845_v50  ;;  %1991 = vmatprep.subr.bf16.mxu0 %v2854_v53 }
  0x48   :  { %2023 = vmatprep.subr.bf16.mxu1 %v2862_v56  ;;  %685 = vmatprep.mubr.f32.mxu0 %v2579_v3 }
  0x49   :  { %756 = vmatprep.mubr.f32.mxu1 %v2579_v3 }
  0x4a   :  { %1993 = vmatpush1.bf16.msra.mxu0 %v2874_v60 }
  0x4b   :  { %2025 = vmatpush1.bf16.msra.mxu1 %v2884_v63  ;;  %1995 = vmatprep.subr.bf16.mxu0 %v2894_v2 }
  0x4c   :  { %2027 = vmatprep.subr.bf16.mxu1 %v2903_v6 }
  0x4e   :  { %1997 = vmatpush1.bf16.msra.mxu0 %v2915_v10 }
  0x4f   :  { %2029 = vmatpush1.bf16.msra.mxu1 %v2925_v13  ;;  %1999 = vmatprep.subr.bf16.mxu0 %v2935_v16 }
  0x50   :  { %2031 = vmatprep.subr.bf16.mxu1 %v2944_v19 }
  0x52   :  { %2001 = vmatpush1.bf16.msra.mxu0 %v2956_v23 }
  0x53   :  { %2033 = vmatpush1.bf16.msra.mxu1 %v2966_v26  ;;  %2003 = vmatprep.subr.bf16.mxu0 %v2976_v29 }
  0x54   :  { %2035 = vmatprep.subr.bf16.mxu1 %v2985_v32 }
  0x56   :  { %2005 = vmatpush1.bf16.msra.mxu0 %v2997_v36 }
  0x57   :  { %2037 = vmatpush1.bf16.msra.mxu1 %v3007_v40  ;;  %2007 = vmatprep.subr.bf16.mxu0 %v3017_v44 }
  0x58   :  { %2039 = vmatprep.subr.bf16.mxu1 %v3026_v48 }
  0x5a   :  { %2009 = vmatpush1.bf16.msra.mxu0 %v3038_v54 }
  0x5b   :  { %2041 = vmatpush1.bf16.msra.mxu1 %v3048_v58  ;;  %2011 = vmatprep.subr.bf16.mxu0 %v3058_v62 }
  0x5c   :  { %2043 = vmatprep.subr.bf16.mxu1 %v3067_v4 }
  0x5e   :  { %2013 = vmatpush1.bf16.msra.mxu0 %v3079_v9 }
  0x5f   :  { %2045 = vmatpush1.bf16.msra.mxu1 %v3089_v14  ;;  %2015 = vmatprep.subr.bf16.mxu0 %v3099_v18 }
  0x60   :  { %2047 = vmatprep.subr.bf16.mxu1 %v3108_v22 }
  0x62   :  { %2017 = vmatpush1.bf16.msra.mxu0 %v3114_v25 }
  0x63   :  { %2049 = vmatpush1.bf16.msra.mxu1 %v3118_v27  ;;  %2051 = vmatprep.subr.bf16.mxu0 %v2811_v38 }
  0x64   :  { %2083 = vmatprep.subr.bf16.mxu1 %v2819_v41 }
 0x118   :  { %v512_v42 = vpop.f32.mrb[0].mxu0 }
 0x119   :  { %v2434_v43 = vadd.f32 %v512_v42, %v3168_v35  ;;  %v583_v46 = vpop.f32.mrb[0].mxu1  ;;  %v514_v49 = vpop.f32.mrb[1].mxu0 }
 0x11a   :  { %v2435_v52 = vadd.f32 %v514_v49, %v3170_v39  ;;  %v585_v55 = vpop.f32.mrb[1].mxu1  ;;  %v2450_v61 = vadd.f32 %v583_v46, %v3173_v45 }
 0x11b   :  { %v592_v57 = vmul.f32 0.5, %v2434_v43  ;;  %v2451_v1 = vadd.f32 %v585_v55, %v3177_v0 }
 0x11c   :  { %v596_v59 = vmul.f32 0.5, %v2435_v52 }
 0x11d   :  { %2499 = vtanh.f32 %v592_v57  ;;  %v601_v5 = vmul.f32 0.5, %v2451_v1 }
 0x11e   :  { %2501 = vtanh.f32 %v596_v59 }
 0x11f   :  { %2503 = vtanh.f32 %v2450_v61 }
 0x120   :  { %2505 = vtanh.f32 %v601_v5 }
 0x127   :  { %v2500_v7 = vpop.eup %2499 }
 0x128   :  { %v2502_v8 = vpop.eup %2501  ;;  %v594_v11 = vadd.f32 1.0, %v2500_v7 }
 0x129   :  { %v598_v12 = vadd.f32 1.0, %v2502_v8  ;;  %v2504_v17 = vpop.eup %2503 }
 0x12a   :  { %v595_v15 = vmul.f32 0.5, %v594_v11  ;;  %v2506_v30 = vpop.eup %2505 }
 0x12b   :  { %v599_v20 = vmul.f32 0.5, %v598_v12  ;;  %v603_v31 = vadd.f32 1.0, %v2506_v30 }
 0x12c   :  { %v606_v21 = vmul.f32 %v2504_v17, %v595_v15 }
 0x12d   :  { %v605_v24 = vmul.f32 0.0, %v599_v20  ;;  %v604_v33 = vmul.f32 0.5, %v603_v31 }
 0x12f   :  { %v3180_v28 = vadd.f32 %v606_v21, %v605_v24 }
 0x131   :  { %2507 = vtanh.f32 %v3180_v28 }
 0x13b   :  { %v2508_v34 = vpop.eup %2507 }
 0x13c   :  { %v609_v37 = vmul.f32 %v2508_v34, %v604_v33 }
 0x13e   :  { %686 = vmatmul.mubr.f32.vlgmr.msra.gmra.mrb[2].mxu0 %v609_v37  ;;  %757 = vmatmul.mubr.f32.vlgmr.msra.gmra.mrb[2].mxu1 %v609_v37 }
 0x13f   :  { %2053 = vmatpush1.bf16.msra.mxu0 %v2836_v47  ;;  %2085 = vmatpush1.bf16.msra.mxu1 %v2845_v50 }
 0x140   :  { %2055 = vmatprep.subr.bf16.mxu0 %v2854_v53  ;;  %2087 = vmatprep.subr.bf16.mxu1 %v2862_v56 }
 0x141   :  { %861 = vmatprep.mubr.f32.mxu0 %v2579_v3  ;;  %932 = vmatprep.mubr.f32.mxu1 %v2579_v3 }
 0x143   :  { %2057 = vmatpush1.bf16.msra.mxu0 %v2874_v60  ;;  %2089 = vmatpush1.bf16.msra.mxu1 %v2884_v63 }
 0x144   :  { %2059 = vmatprep.subr.bf16.mxu0 %v2894_v2  ;;  %2091 = vmatprep.subr.bf16.mxu1 %v2903_v6 }
 0x147   :  { %2061 = vmatpush1.bf16.msra.mxu0 %v2915_v10  ;;  %2093 = vmatpush1.bf16.msra.mxu1 %v2925_v13 }
 0x148   :  { %2063 = vmatprep.subr.bf16.mxu0 %v2935_v16  ;;  %2095 = vmatprep.subr.bf16.mxu1 %v2944_v19 }
 0x14b   :  { %2065 = vmatpush1.bf16.msra.mxu0 %v2956_v23  ;;  %2097 = vmatpush1.bf16.msra.mxu1 %v2966_v26 }
 0x14c   :  { %2067 = vmatprep.subr.bf16.mxu0 %v2976_v29  ;;  %2099 = vmatprep.subr.bf16.mxu1 %v2985_v32 }
 0x14f   :  { %2069 = vmatpush1.bf16.msra.mxu0 %v2997_v36  ;;  %2101 = vmatpush1.bf16.msra.mxu1 %v3007_v40 }
 0x150   :  { %2071 = vmatprep.subr.bf16.mxu0 %v3017_v44  ;;  %2103 = vmatprep.subr.bf16.mxu1 %v3026_v48 }
 0x153   :  { %2073 = vmatpush1.bf16.msra.mxu0 %v3038_v54  ;;  %2105 = vmatpush1.bf16.msra.mxu1 %v3048_v58 }
 0x154   :  { %2075 = vmatprep.subr.bf16.mxu0 %v3058_v62  ;;  %2107 = vmatprep.subr.bf16.mxu1 %v3067_v4 }
 0x157   :  { %2077 = vmatpush1.bf16.msra.mxu0 %v3079_v9  ;;  %2109 = vmatpush1.bf16.msra.mxu1 %v3089_v14 }
 0x158   :  { %2079 = vmatprep.subr.bf16.mxu0 %v3099_v18  ;;  %2111 = vmatprep.subr.bf16.mxu1 %v3108_v22 }
 0x15b   :  { %2081 = vmatpush1.bf16.msra.mxu0 %v3114_v25  ;;  %2113 = vmatpush1.bf16.msra.mxu1 %v3118_v27 }
 0x15c   :  { %2115 = vmatprep.subr.bf16.mxu0 %v2811_v38  ;;  %2147 = vmatprep.subr.bf16.mxu1 %v2819_v41 }
 0x211   :  { %v687_v42 = vpop.f32.mrb[2].mxu0  ;;  %v758_v43 = vpop.f32.mrb[2].mxu1 }
 0x212   :  { %v2436_v46 = vadd.f32 %v687_v42, %v3168_v35  ;;  %v689_v49 = vpop.f32.mrb[3].mxu0  ;;  %v760_v51 = vpop.f32.mrb[3].mxu1  ;;  %v2452_v59 = vadd.f32 %v758_v43, %v3173_v45 }
 0x213   :  { %v2437_v52 = vadd.f32 %v689_v49, %v3170_v39  ;;  %v2453_v61 = vadd.f32 %v760_v51, %v3177_v0 }
 0x214   :  { %v767_v55 = vmul.f32 0.5, %v2436_v46 }
 0x215   :  { %v771_v57 = vmul.f32 0.5, %v2437_v52  ;;  %v776_v1 = vmul.f32 0.5, %v2453_v61 }
 0x216   :  { %2509 = vtanh.f32 %v767_v55 }
 0x217   :  { %2511 = vtanh.f32 %v771_v57 }
 0x218   :  { %2513 = vtanh.f32 %v2452_v59 }
 0x219   :  { %2515 = vtanh.f32 %v776_v1 }
 0x220   :  { %v2510_v5 = vpop.eup %2509 }
 0x221   :  { %v2512_v7 = vpop.eup %2511  ;;  %v769_v8 = vadd.f32 1.0, %v2510_v5 }
 0x222   :  { %v773_v11 = vadd.f32 1.0, %v2512_v7  ;;  %v2514_v15 = vpop.eup %2513 }
 0x223   :  { %v770_v12 = vmul.f32 0.5, %v769_v8  ;;  %v2516_v30 = vpop.eup %2515 }
 0x224   :  { %v774_v17 = vmul.f32 0.5, %v773_v11  ;;  %v778_v31 = vadd.f32 1.0, %v2516_v30 }
 0x225   :  { %v781_v20 = vmul.f32 %v2514_v15, %v770_v12 }
 0x226   :  { %v780_v21 = vmul.f32 %v774_v17, %v3180_v28  ;;  %v779_v33 = vmul.f32 0.5, %v778_v31 }
 0x228   :  { %v3222_v24 = vadd.f32 %v781_v20, %v780_v21 }
 0x22a   :  { %2517 = vtanh.f32 %v3222_v24 }
 0x234   :  { %v2518_v34 = vpop.eup %2517 }
 0x235   :  { %v784_v37 = vmul.f32 %v2518_v34, %v779_v33 }
 0x237   :  { %862 = vmatmul.mubr.f32.vlgmr.msra.gmra.mrb[4].mxu0 %v784_v37  ;;  %933 = vmatmul.mubr.f32.vlgmr.msra.gmra.mrb[4].mxu1 %v784_v37 }
 0x238   :  { %2117 = vmatpush1.bf16.msra.mxu0 %v2836_v47  ;;  %2149 = vmatpush1.bf16.msra.mxu1 %v2845_v50 }
 0x239   :  { %2119 = vmatprep.subr.bf16.mxu0 %v2854_v53  ;;  %2151 = vmatprep.subr.bf16.mxu1 %v2862_v56 }
 0x23a   :  { %1037 = vmatprep.mubr.f32.mxu0 %v2579_v3  ;;  %1108 = vmatprep.mubr.f32.mxu1 %v2579_v3 }
 0x23c   :  { %2121 = vmatpush1.bf16.msra.mxu0 %v2874_v60  ;;  %2153 = vmatpush1.bf16.msra.mxu1 %v2884_v63 }
 0x23d   :  { %2123 = vmatprep.subr.bf16.mxu0 %v2894_v2  ;;  %2155 = vmatprep.subr.bf16.mxu1 %v2903_v6 }
 0x240   :  { %2125 = vmatpush1.bf16.msra.mxu0 %v2915_v10  ;;  %2157 = vmatpush1.bf16.msra.mxu1 %v2925_v13 }
 0x241   :  { %2127 = vmatprep.subr.bf16.mxu0 %v2935_v16  ;;  %2159 = vmatprep.subr.bf16.mxu1 %v2944_v19 }
 0x244   :  { %2129 = vmatpush1.bf16.msra.mxu0 %v2956_v23  ;;  %2161 = vmatpush1.bf16.msra.mxu1 %v2966_v26 }
 0x245   :  { %2131 = vmatprep.subr.bf16.mxu0 %v2976_v29  ;;  %2163 = vmatprep.subr.bf16.mxu1 %v2985_v32 }
 0x248   :  { %2133 = vmatpush1.bf16.msra.mxu0 %v2997_v36  ;;  %2165 = vmatpush1.bf16.msra.mxu1 %v3007_v40 }
 0x249   :  { %2135 = vmatprep.subr.bf16.mxu0 %v3017_v44  ;;  %2167 = vmatprep.subr.bf16.mxu1 %v3026_v48 }
 0x24c   :  { %2137 = vmatpush1.bf16.msra.mxu0 %v3038_v54  ;;  %2169 = vmatpush1.bf16.msra.mxu1 %v3048_v58 }
 0x24d   :  { %2139 = vmatprep.subr.bf16.mxu0 %v3058_v62  ;;  %2171 = vmatprep.subr.bf16.mxu1 %v3067_v4 }
 0x250   :  { %2141 = vmatpush1.bf16.msra.mxu0 %v3079_v9  ;;  %2173 = vmatpush1.bf16.msra.mxu1 %v3089_v14 }
 0x251   :  { %2143 = vmatprep.subr.bf16.mxu0 %v3099_v18  ;;  %2175 = vmatprep.subr.bf16.mxu1 %v3108_v22 }
 0x254   :  { %2145 = vmatpush1.bf16.msra.mxu0 %v3114_v25  ;;  %2177 = vmatpush1.bf16.msra.mxu1 %v3118_v27 }
 0x255   :  { %2179 = vmatprep.subr.bf16.mxu0 %v2811_v38  ;;  %2211 = vmatprep.subr.bf16.mxu1 %v2819_v41 }
 0x30a   :  { %v863_v28 = vpop.f32.mrb[4].mxu0  ;;  %v934_v42 = vpop.f32.mrb[4].mxu1 }
 0x30b   :  { %v2438_v43 = vadd.f32 %v863_v28, %v3168_v35  ;;  %v865_v46 = vpop.f32.mrb[5].mxu0  ;;  %v936_v49 = vpop.f32.mrb[5].mxu1  ;;  %v2454_v57 = vadd.f32 %v934_v42, %v3173_v45 }
 0x30c   :  { %v2439_v51 = vadd.f32 %v865_v46, %v3170_v39  ;;  %v2455_v59 = vadd.f32 %v936_v49, %v3177_v0 }
 0x30d   :  { %v943_v52 = vmul.f32 0.5, %v2438_v43 }
 0x30e   :  { %v947_v55 = vmul.f32 0.5, %v2439_v51  ;;  %v952_v61 = vmul.f32 0.5, %v2455_v59 }
 0x30f   :  { %2519 = vtanh.f32 %v943_v52 }
 0x310   :  { %2521 = vtanh.f32 %v947_v55 }
 0x311   :  { %2523 = vtanh.f32 %v2454_v57 }
 0x312   :  { %2525 = vtanh.f32 %v952_v61 }
 0x319   :  { %v2520_v1 = vpop.eup %2519 }
 0x31a   :  { %v2522_v5 = vpop.eup %2521  ;;  %v945_v7 = vadd.f32 1.0, %v2520_v1 }
 0x31b   :  { %v949_v8 = vadd.f32 1.0, %v2522_v5  ;;  %v2524_v12 = vpop.eup %2523 }
 0x31c   :  { %v946_v11 = vmul.f32 0.5, %v945_v7  ;;  %v2526_v30 = vpop.eup %2525 }
 0x31d   :  { %v950_v15 = vmul.f32 0.5, %v949_v8  ;;  %v954_v31 = vadd.f32 1.0, %v2526_v30 }
 0x31e   :  { %v957_v17 = vmul.f32 %v2524_v12, %v946_v11 }
 0x31f   :  { %v956_v20 = vmul.f32 %v950_v15, %v3222_v24  ;;  %v955_v33 = vmul.f32 0.5, %v954_v31 }
 0x321   :  { %v3264_v21 = vadd.f32 %v957_v17, %v956_v20 }
 0x323   :  { %2527 = vtanh.f32 %v3264_v21 }
 0x32d   :  { %v2528_v34 = vpop.eup %2527 }
 0x32e   :  { %v960_v37 = vmul.f32 %v2528_v34, %v955_v33 }
 0x330   :  { %1038 = vmatmul.mubr.f32.vlgmr.msra.gmra.mrb[6].mxu0 %v960_v37  ;;  %1109 = vmatmul.mubr.f32.vlgmr.msra.gmra.mrb[6].mxu1 %v960_v37 }
 0x331   :  { %2181 = vmatpush1.bf16.msra.mxu0 %v2836_v47  ;;  %2213 = vmatpush1.bf16.msra.mxu1 %v2845_v50 }
 0x332   :  { %2183 = vmatprep.subr.bf16.mxu0 %v2854_v53  ;;  %2215 = vmatprep.subr.bf16.mxu1 %v2862_v56 }
 0x333   :  { %1213 = vmatprep.mubr.f32.mxu0 %v2579_v3  ;;  %1284 = vmatprep.mubr.f32.mxu1 %v2579_v3 }
 0x335   :  { %2185 = vmatpush1.bf16.msra.mxu0 %v2874_v60  ;;  %2217 = vmatpush1.bf16.msra.mxu1 %v2884_v63 }
 0x336   :  { %2187 = vmatprep.subr.bf16.mxu0 %v2894_v2  ;;  %2219 = vmatprep.subr.bf16.mxu1 %v2903_v6 }
 0x339   :  { %2189 = vmatpush1.bf16.msra.mxu0 %v2915_v10  ;;  %2221 = vmatpush1.bf16.msra.mxu1 %v2925_v13 }
 0x33a   :  { %2191 = vmatprep.subr.bf16.mxu0 %v2935_v16  ;;  %2223 = vmatprep.subr.bf16.mxu1 %v2944_v19 }
 0x33d   :  { %2193 = vmatpush1.bf16.msra.mxu0 %v2956_v23  ;;  %2225 = vmatpush1.bf16.msra.mxu1 %v2966_v26 }
 0x33e   :  { %2195 = vmatprep.subr.bf16.mxu0 %v2976_v29  ;;  %2227 = vmatprep.subr.bf16.mxu1 %v2985_v32 }
 0x341   :  { %2197 = vmatpush1.bf16.msra.mxu0 %v2997_v36  ;;  %2229 = vmatpush1.bf16.msra.mxu1 %v3007_v40 }
 0x342   :  { %2199 = vmatprep.subr.bf16.mxu0 %v3017_v44  ;;  %2231 = vmatprep.subr.bf16.mxu1 %v3026_v48 }
 0x345   :  { %2201 = vmatpush1.bf16.msra.mxu0 %v3038_v54  ;;  %2233 = vmatpush1.bf16.msra.mxu1 %v3048_v58 }
 0x346   :  { %2203 = vmatprep.subr.bf16.mxu0 %v3058_v62  ;;  %2235 = vmatprep.subr.bf16.mxu1 %v3067_v4 }
 0x349   :  { %2205 = vmatpush1.bf16.msra.mxu0 %v3079_v9  ;;  %2237 = vmatpush1.bf16.msra.mxu1 %v3089_v14 }
 0x34a   :  { %2207 = vmatprep.subr.bf16.mxu0 %v3099_v18  ;;  %2239 = vmatprep.subr.bf16.mxu1 %v3108_v22 }
 0x34d   :  { %2209 = vmatpush1.bf16.msra.mxu0 %v3114_v25  ;;  %2241 = vmatpush1.bf16.msra.mxu1 %v3118_v27 }
 0x34e   :  { %2243 = vmatprep.subr.bf16.mxu0 %v2811_v38  ;;  %2275 = vmatprep.subr.bf16.mxu1 %v2819_v41 }
 0x403   :  { %v1039_v24 = vpop.f32.mrb[6].mxu0  ;;  %v1110_v28 = vpop.f32.mrb[6].mxu1 }
 0x404   :  { %v2440_v42 = vadd.f32 %v1039_v24, %v3168_v35  ;;  %v1041_v43 = vpop.f32.mrb[7].mxu0  ;;  %v1112_v46 = vpop.f32.mrb[7].mxu1  ;;  %v2456_v55 = vadd.f32 %v1110_v28, %v3173_v45 }
 0x405   :  { %v2441_v49 = vadd.f32 %v1041_v43, %v3170_v39  ;;  %v2457_v57 = vadd.f32 %v1112_v46, %v3177_v0 }
 0x406   :  { %v1119_v51 = vmul.f32 0.5, %v2440_v42 }
 0x407   :  { %v1123_v52 = vmul.f32 0.5, %v2441_v49  ;;  %v1128_v59 = vmul.f32 0.5, %v2457_v57 }
 0x408   :  { %2529 = vtanh.f32 %v1119_v51 }
 0x409   :  { %2531 = vtanh.f32 %v1123_v52 }
 0x40a   :  { %2533 = vtanh.f32 %v2456_v55 }
 0x40b   :  { %2535 = vtanh.f32 %v1128_v59 }
 0x412   :  { %v2530_v61 = vpop.eup %2529 }
 0x413   :  { %v2532_v1 = vpop.eup %2531  ;;  %v1121_v5 = vadd.f32 1.0, %v2530_v61 }
 0x414   :  { %v1125_v7 = vadd.f32 1.0, %v2532_v1  ;;  %v2534_v11 = vpop.eup %2533 }
 0x415   :  { %v1122_v8 = vmul.f32 0.5, %v1121_v5  ;;  %v2536_v30 = vpop.eup %2535 }
 0x416   :  { %v1126_v12 = vmul.f32 0.5, %v1125_v7  ;;  %v1130_v31 = vadd.f32 1.0, %v2536_v30 }
 0x417   :  { %v1133_v15 = vmul.f32 %v2534_v11, %v1122_v8 }
 0x418   :  { %v1132_v17 = vmul.f32 %v1126_v12, %v3264_v21  ;;  %v1131_v33 = vmul.f32 0.5, %v1130_v31 }
 0x41a   :  { %v3306_v20 = vadd.f32 %v1133_v15, %v1132_v17 }
 0x41c   :  { %2537 = vtanh.f32 %v3306_v20 }
 0x426   :  { %v2538_v34 = vpop.eup %2537 }
 0x427   :  { %v1136_v37 = vmul.f32 %v2538_v34, %v1131_v33 }
 0x429   :  { %1214 = vmatmul.mubr.f32.vlgmr.msra.gmra.mrb[8].mxu0 %v1136_v37  ;;  %1285 = vmatmul.mubr.f32.vlgmr.msra.gmra.mrb[8].mxu1 %v1136_v37 }
 0x42a   :  { %2245 = vmatpush1.bf16.msra.mxu0 %v2836_v47  ;;  %2277 = vmatpush1.bf16.msra.mxu1 %v2845_v50 }
 0x42b   :  { %2247 = vmatprep.subr.bf16.mxu0 %v2854_v53  ;;  %2279 = vmatprep.subr.bf16.mxu1 %v2862_v56 }
 0x42c   :  { %1389 = vmatprep.mubr.f32.mxu0 %v2579_v3  ;;  %1460 = vmatprep.mubr.f32.mxu1 %v2579_v3 }
 0x42e   :  { %2249 = vmatpush1.bf16.msra.mxu0 %v2874_v60  ;;  %2281 = vmatpush1.bf16.msra.mxu1 %v2884_v63 }
 0x42f   :  { %2251 = vmatprep.subr.bf16.mxu0 %v2894_v2  ;;  %2283 = vmatprep.subr.bf16.mxu1 %v2903_v6 }
 0x432   :  { %2253 = vmatpush1.bf16.msra.mxu0 %v2915_v10  ;;  %2285 = vmatpush1.bf16.msra.mxu1 %v2925_v13 }
 0x433   :  { %2255 = vmatprep.subr.bf16.mxu0 %v2935_v16  ;;  %2287 = vmatprep.subr.bf16.mxu1 %v2944_v19 }
 0x436   :  { %2257 = vmatpush1.bf16.msra.mxu0 %v2956_v23  ;;  %2289 = vmatpush1.bf16.msra.mxu1 %v2966_v26 }
 0x437   :  { %2259 = vmatprep.subr.bf16.mxu0 %v2976_v29  ;;  %2291 = vmatprep.subr.bf16.mxu1 %v2985_v32 }
 0x43a   :  { %2261 = vmatpush1.bf16.msra.mxu0 %v2997_v36  ;;  %2293 = vmatpush1.bf16.msra.mxu1 %v3007_v40 }
 0x43b   :  { %2263 = vmatprep.subr.bf16.mxu0 %v3017_v44  ;;  %2295 = vmatprep.subr.bf16.mxu1 %v3026_v48 }
 0x43e   :  { %2265 = vmatpush1.bf16.msra.mxu0 %v3038_v54  ;;  %2297 = vmatpush1.bf16.msra.mxu1 %v3048_v58 }
 0x43f   :  { %2267 = vmatprep.subr.bf16.mxu0 %v3058_v62  ;;  %2299 = vmatprep.subr.bf16.mxu1 %v3067_v4 }
 0x442   :  { %2269 = vmatpush1.bf16.msra.mxu0 %v3079_v9  ;;  %2301 = vmatpush1.bf16.msra.mxu1 %v3089_v14 }
 0x443   :  { %2271 = vmatprep.subr.bf16.mxu0 %v3099_v18  ;;  %2303 = vmatprep.subr.bf16.mxu1 %v3108_v22 }
 0x446   :  { %2273 = vmatpush1.bf16.msra.mxu0 %v3114_v25  ;;  %2305 = vmatpush1.bf16.msra.mxu1 %v3118_v27 }
 0x447   :  { %2307 = vmatprep.subr.bf16.mxu0 %v2811_v38  ;;  %2339 = vmatprep.subr.bf16.mxu1 %v2819_v41 }
 0x4fc   :  { %v1215_v21 = vpop.f32.mrb[8].mxu0  ;;  %v1286_v24 = vpop.f32.mrb[8].mxu1 }
 0x4fd   :  { %v2442_v28 = vadd.f32 %v1215_v21, %v3168_v35  ;;  %v1217_v42 = vpop.f32.mrb[9].mxu0  ;;  %v1288_v43 = vpop.f32.mrb[9].mxu1  ;;  %v2458_v52 = vadd.f32 %v1286_v24, %v3173_v45 }
 0x4fe   :  { %v2443_v46 = vadd.f32 %v1217_v42, %v3170_v39  ;;  %v2459_v55 = vadd.f32 %v1288_v43, %v3177_v0 }
 0x4ff   :  { %v1295_v49 = vmul.f32 0.5, %v2442_v28 }
 0x500   :  { %v1299_v51 = vmul.f32 0.5, %v2443_v46  ;;  %v1304_v57 = vmul.f32 0.5, %v2459_v55 }
 0x501   :  { %2539 = vtanh.f32 %v1295_v49 }
 0x502   :  { %2541 = vtanh.f32 %v1299_v51 }
 0x503   :  { %2543 = vtanh.f32 %v2458_v52 }
 0x504   :  { %2545 = vtanh.f32 %v1304_v57 }
 0x50b   :  { %v2540_v59 = vpop.eup %2539 }
 0x50c   :  { %v2542_v61 = vpop.eup %2541  ;;  %v1297_v1 = vadd.f32 1.0, %v2540_v59 }
 0x50d   :  { %v1301_v5 = vadd.f32 1.0, %v2542_v61  ;;  %v2544_v8 = vpop.eup %2543 }
 0x50e   :  { %v1298_v7 = vmul.f32 0.5, %v1297_v1  ;;  %v2546_v30 = vpop.eup %2545 }
 0x50f   :  { %v1302_v11 = vmul.f32 0.5, %v1301_v5  ;;  %v1306_v31 = vadd.f32 1.0, %v2546_v30 }
 0x510   :  { %v1309_v12 = vmul.f32 %v2544_v8, %v1298_v7 }
 0x511   :  { %v1308_v15 = vmul.f32 %v1302_v11, %v3306_v20  ;;  %v1307_v33 = vmul.f32 0.5, %v1306_v31 }
 0x513   :  { %v3348_v17 = vadd.f32 %v1309_v12, %v1308_v15 }
 0x515   :  { %2547 = vtanh.f32 %v3348_v17 }
 0x51f   :  { %v2548_v34 = vpop.eup %2547 }
 0x520   :  { %v1312_v37 = vmul.f32 %v2548_v34, %v1307_v33 }
 0x522   :  { %1390 = vmatmul.mubr.f32.vlgmr.msra.gmra.mrb[10].mxu0 %v1312_v37  ;;  %1461 = vmatmul.mubr.f32.vlgmr.msra.gmra.mrb[10].mxu1 %v1312_v37 }
 0x523   :  { %2309 = vmatpush1.bf16.msra.mxu0 %v2836_v47  ;;  %2341 = vmatpush1.bf16.msra.mxu1 %v2845_v50 }
 0x524   :  { %2311 = vmatprep.subr.bf16.mxu0 %v2854_v53  ;;  %2343 = vmatprep.subr.bf16.mxu1 %v2862_v56 }
 0x525   :  { %1565 = vmatprep.mubr.f32.mxu0 %v2579_v3  ;;  %1636 = vmatprep.mubr.f32.mxu1 %v2579_v3 }
 0x527   :  { %2313 = vmatpush1.bf16.msra.mxu0 %v2874_v60  ;;  %2345 = vmatpush1.bf16.msra.mxu1 %v2884_v63 }
 0x528   :  { %2315 = vmatprep.subr.bf16.mxu0 %v2894_v2  ;;  %2347 = vmatprep.subr.bf16.mxu1 %v2903_v6 }
 0x52b   :  { %2317 = vmatpush1.bf16.msra.mxu0 %v2915_v10  ;;  %2349 = vmatpush1.bf16.msra.mxu1 %v2925_v13 }
 0x52c   :  { %2319 = vmatprep.subr.bf16.mxu0 %v2935_v16  ;;  %2351 = vmatprep.subr.bf16.mxu1 %v2944_v19 }
 0x52f   :  { %2321 = vmatpush1.bf16.msra.mxu0 %v2956_v23  ;;  %2353 = vmatpush1.bf16.msra.mxu1 %v2966_v26 }
 0x530   :  { %2323 = vmatprep.subr.bf16.mxu0 %v2976_v29  ;;  %2355 = vmatprep.subr.bf16.mxu1 %v2985_v32 }
 0x533   :  { %2325 = vmatpush1.bf16.msra.mxu0 %v2997_v36  ;;  %2357 = vmatpush1.bf16.msra.mxu1 %v3007_v40 }
 0x534   :  { %2327 = vmatprep.subr.bf16.mxu0 %v3017_v44  ;;  %2359 = vmatprep.subr.bf16.mxu1 %v3026_v48 }
 0x537   :  { %2329 = vmatpush1.bf16.msra.mxu0 %v3038_v54  ;;  %2361 = vmatpush1.bf16.msra.mxu1 %v3048_v58 }
 0x538   :  { %2331 = vmatprep.subr.bf16.mxu0 %v3058_v62  ;;  %2363 = vmatprep.subr.bf16.mxu1 %v3067_v4 }
 0x53b   :  { %2333 = vmatpush1.bf16.msra.mxu0 %v3079_v9  ;;  %2365 = vmatpush1.bf16.msra.mxu1 %v3089_v14 }
 0x53c   :  { %2335 = vmatprep.subr.bf16.mxu0 %v3099_v18  ;;  %2367 = vmatprep.subr.bf16.mxu1 %v3108_v22 }
 0x53f   :  { %2337 = vmatpush1.bf16.msra.mxu0 %v3114_v25  ;;  %2369 = vmatpush1.bf16.msra.mxu1 %v3118_v27 }
 0x540   :  { %2371 = vmatprep.subr.bf16.mxu0 %v2811_v38  ;;  %2403 = vmatprep.subr.bf16.mxu1 %v2819_v41 }
 0x5f5   :  { %v1391_v20 = vpop.f32.mrb[10].mxu0  ;;  %v1462_v21 = vpop.f32.mrb[10].mxu1 }
 0x5f6   :  { %v2444_v24 = vadd.f32 %v1391_v20, %v3168_v35  ;;  %v1393_v28 = vpop.f32.mrb[11].mxu0  ;;  %v1464_v42 = vpop.f32.mrb[11].mxu1  ;;  %v2460_v51 = vadd.f32 %v1462_v21, %v3173_v45 }
 0x5f7   :  { %v2445_v43 = vadd.f32 %v1393_v28, %v3170_v39  ;;  %v2461_v52 = vadd.f32 %v1464_v42, %v3177_v0 }
 0x5f8   :  { %v1471_v46 = vmul.f32 0.5, %v2444_v24 }
 0x5f9   :  { %v1475_v49 = vmul.f32 0.5, %v2445_v43  ;;  %v1480_v38 = vmul.f32 0.5, %v2461_v52 }
 0x5fa   :  { %2549 = vtanh.f32 %v1471_v46 }
 0x5fb   :  { %2551 = vtanh.f32 %v1475_v49 }
 0x5fc   :  { %2553 = vtanh.f32 %v2460_v51 }
 0x5fd   :  { %2555 = vtanh.f32 %v1480_v38 }
 0x604   :  { %v2550_v55 = vpop.eup %2549 }
 0x605   :  { %v2552_v41 = vpop.eup %2551  ;;  %v1473_v57 = vadd.f32 1.0, %v2550_v55 }
 0x606   :  { %v1477_v59 = vadd.f32 1.0, %v2552_v41  ;;  %v2554_v1 = vpop.eup %2553 }
 0x607   :  { %v1474_v61 = vmul.f32 0.5, %v1473_v57  ;;  %v2556_v12 = vpop.eup %2555 }
 0x608   :  { %v1478_v5 = vmul.f32 0.5, %v1477_v59  ;;  %v1482_v15 = vadd.f32 1.0, %v2556_v12 }
 0x609   :  { %v1485_v7 = vmul.f32 %v2554_v1, %v1474_v61 }
 0x60a   :  { %v1484_v8 = vmul.f32 %v1478_v5, %v3348_v17  ;;  %v1483_v30 = vmul.f32 0.5, %v1482_v15 }
 0x60c   :  { %v3390_v11 = vadd.f32 %v1485_v7, %v1484_v8 }
 0x60e   :  { %2557 = vtanh.f32 %v3390_v11 }
 0x618   :  { %v2558_v31 = vpop.eup %2557 }
 0x619   :  { %v1488_v33 = vmul.f32 %v2558_v31, %v1483_v30 }
 0x61b   :  { %1566 = vmatmul.mubr.f32.vlgmr.msra.gmra.mrb[12].mxu0 %v1488_v33  ;;  %1637 = vmatmul.mubr.f32.vlgmr.msra.gmra.mrb[12].mxu1 %v1488_v33 }
 0x61c   :  { %2373 = vmatpush1.bf16.msra.mxu0 %v2836_v47  ;;  %2405 = vmatpush1.bf16.msra.mxu1 %v2845_v50 }
 0x61d   :  { %2375 = vmatprep.subr.bf16.mxu0 %v2854_v53  ;;  %2407 = vmatprep.subr.bf16.mxu1 %v2862_v56 }
 0x61e   :  { %1741 = vmatprep.mubr.f32.mxu0 %v2579_v3  ;;  %1812 = vmatprep.mubr.f32.mxu1 %v2579_v3 }
 0x620   :  { %2377 = vmatpush1.bf16.msra.mxu0 %v2874_v60  ;;  %2409 = vmatpush1.bf16.msra.mxu1 %v2884_v63 }
 0x621   :  { %2379 = vmatprep.subr.bf16.mxu0 %v2894_v2  ;;  %2411 = vmatprep.subr.bf16.mxu1 %v2903_v6 }
 0x624   :  { %2381 = vmatpush1.bf16.msra.mxu0 %v2915_v10  ;;  %2413 = vmatpush1.bf16.msra.mxu1 %v2925_v13 }
 0x625   :  { %2383 = vmatprep.subr.bf16.mxu0 %v2935_v16  ;;  %2415 = vmatprep.subr.bf16.mxu1 %v2944_v19 }
 0x628   :  { %2385 = vmatpush1.bf16.msra.mxu0 %v2956_v23  ;;  %2417 = vmatpush1.bf16.msra.mxu1 %v2966_v26 }
 0x629   :  { %2387 = vmatprep.subr.bf16.mxu0 %v2976_v29  ;;  %2419 = vmatprep.subr.bf16.mxu1 %v2985_v32 }
 0x62c   :  { %2389 = vmatpush1.bf16.msra.mxu0 %v2997_v36  ;;  %2421 = vmatpush1.bf16.msra.mxu1 %v3007_v40 }
 0x62d   :  { %2391 = vmatprep.subr.bf16.mxu0 %v3017_v44  ;;  %2423 = vmatprep.subr.bf16.mxu1 %v3026_v48 }
 0x630   :  { %2393 = vmatpush1.bf16.msra.mxu0 %v3038_v54  ;;  %2425 = vmatpush1.bf16.msra.mxu1 %v3048_v58 }
 0x631   :  { %2395 = vmatprep.subr.bf16.mxu0 %v3058_v62  ;;  %2427 = vmatprep.subr.bf16.mxu1 %v3067_v4 }
 0x634   :  { %2397 = vmatpush1.bf16.msra.mxu0 %v3079_v9  ;;  %2429 = vmatpush1.bf16.msra.mxu1 %v3089_v14 }
 0x635   :  { %2399 = vmatprep.subr.bf16.mxu0 %v3099_v18  ;;  %2431 = vmatprep.subr.bf16.mxu1 %v3108_v22 }
 0x638   :  { %2401 = vmatpush1.bf16.msra.mxu0 %v3114_v25  ;;  %2433 = vmatpush1.bf16.msra.mxu1 %v3118_v27 }
 0x6ee   :  { %v1567_v3 = vpop.f32.mrb[12].mxu0  ;;  %v1638_v47 = vpop.f32.mrb[12].mxu1 }
 0x6ef   :  { %v2446_v50 = vadd.f32 %v1567_v3, %v3168_v35  ;;  %v1569_v53 = vpop.f32.mrb[13].mxu0  ;;  %v1640_v56 = vpop.f32.mrb[13].mxu1  ;;  %v2462_v6 = vadd.f32 %v1638_v47, %v3173_v45 }
 0x6f0   :  { %v2447_v60 = vadd.f32 %v1569_v53, %v3170_v39  ;;  %v2463_v10 = vadd.f32 %v1640_v56, %v3177_v0 }
 0x6f1   :  { %v1647_v63 = vmul.f32 0.5, %v2446_v50 }
 0x6f2   :  { %v1651_v2 = vmul.f32 0.5, %v2447_v60  ;;  %v1656_v13 = vmul.f32 0.5, %v2463_v10 }
 0x6f3   :  { %2559 = vtanh.f32 %v1647_v63 }
 0x6f4   :  { %2561 = vtanh.f32 %v1651_v2 }
 0x6f5   :  { %2563 = vtanh.f32 %v2462_v6 }
 0x6f6   :  { %2565 = vtanh.f32 %v1656_v13 }
 0x6fd   :  { %v2560_v16 = vpop.eup %2559 }
 0x6fe   :  { %v2562_v19 = vpop.eup %2561  ;;  %v1649_v23 = vadd.f32 1.0, %v2560_v16 }
 0x6ff   :  { %v1653_v26 = vadd.f32 1.0, %v2562_v19  ;;  %v2564_v32 = vpop.eup %2563 }
 0x700   :  { %v1650_v29 = vmul.f32 0.5, %v1649_v23  ;;  %v2566_v54 = vpop.eup %2565 }
 0x701   :  { %v1654_v36 = vmul.f32 0.5, %v1653_v26  ;;  %v1658_v58 = vadd.f32 1.0, %v2566_v54 }
 0x702   :  { %v1661_v40 = vmul.f32 %v2564_v32, %v1650_v29 }
 0x703   :  { %v1660_v44 = vmul.f32 %v1654_v36, %v3390_v11  ;;  %v1659_v62 = vmul.f32 0.5, %v1658_v58 }
 0x705   :  { %v1662_v48 = vadd.f32 %v1661_v40, %v1660_v44 }
 0x707   :  { %2567 = vtanh.f32 %v1662_v48 }
 0x711   :  { %v2568_v4 = vpop.eup %2567 }
 0x712   :  { %v1664_v9 = vmul.f32 %v2568_v4, %v1659_v62 }
 0x714   :  { %1742 = vmatmul.mubr.f32.vlgmr.msra.gmra.mrb[14].mxu0 %v1664_v9  ;;  %1813 = vmatmul.mubr.f32.vlgmr.msra.gmra.mrb[14].mxu1 %v1664_v9 }
 0x7e7   :  { %v1743_v14 = vpop.f32.mrb[14].mxu0  ;;  %v1814_v18 = vpop.f32.mrb[14].mxu1 }
 0x7e8   :  { %v2448_v22 = vadd.f32 %v1743_v14, %v3168_v35  ;;  %v1745_v25 = vpop.f32.mrb[15].mxu0  ;;  %v1816_v27 = vpop.f32.mrb[15].mxu1  ;;  %v2464_v20 = vadd.f32 %v1814_v18, %v3173_v45 }
 0x7e9   :  { %v2449_v17 = vadd.f32 %v1745_v25, %v3170_v39  ;;  %v2465_v21 = vadd.f32 %v1816_v27, %v3177_v0 }
 0x7ea   :  { %v1823_v34 = vmul.f32 0.5, %v2448_v22 }
 0x7eb   :  { %v1827_v37 = vmul.f32 0.5, %v2449_v17  ;;  %v1832_v24 = vmul.f32 0.5, %v2465_v21 }
 0x7ec   :  { %2569 = vtanh.f32 %v1823_v34 }
 0x7ed   :  { %2571 = vtanh.f32 %v1827_v37 }
 0x7ee   :  { %2573 = vtanh.f32 %v2464_v20 }
 0x7ef   :  { %2575 = vtanh.f32 %v1832_v24 }
 0x7f6   :  { %v2570_v28 = vpop.eup %2569 }
 0x7f7   :  { %v2572_v42 = vpop.eup %2571  ;;  %v1825_v43 = vadd.f32 1.0, %v2570_v28 }
 0x7f8   :  { %v1829_v46 = vadd.f32 1.0, %v2572_v42  ;;  %v2574_v49 = vpop.eup %2573 }
 0x7f9   :  { %v1826_v35 = vmul.f32 0.5, %v1825_v43  ;;  %v2576_v55 = vpop.eup %2575 }
 0x7fa   :  { %v1830_v51 = vmul.f32 0.5, %v1829_v46  ;;  %v1834_v41 = vadd.f32 1.0, %v2576_v55 }
 0x7fb   :  { %v1837_v52 = vmul.f32 %v2574_v49, %v1826_v35 }
 0x7fc   :  { %v1836_v39 = vmul.f32 %v1830_v51, %v1662_v48  ;;  %v1835_v45 = vmul.f32 0.5, %v1834_v41 }
 0x7fe   :  { %v1838_v38 = vadd.f32 %v1837_v52, %v1836_v39 }
 0x800   :  { %2577 = vtanh.f32 %v1838_v38 }
 0x80a   :  { %v2578_v57 = vpop.eup %2577 }
 0x80b   :  { %v1840_v59 = vmul.f32 %v2578_v57, %v1835_v45 }
 0x80d   :  { %1853 = vst [vmem:[%s3441_s4] sm:$0xff] %v1840_v59 }

// kernel: many_to_one_rnn_forward.2
= control target key start
LH: loop header
LB: loop body
LE: loop exit
PB: predicated region body
PF: predicated region fallthrough
CT: control target
= control target key end

     0   :  { %v2597_v3 = vmov 0.0   ;;  %s3476_s1 = inlined_call_operand.vmem [shape: f32[128,512], index: 1, kind: input, shape index: {}]   ;;  %s3477_s2 = inlined_call_operand.vmem [shape: f32[128,512], index: 2, kind: input, shape index: {}]   ;;  %s3478_s0 = inlined_call_operand.vmem [shape: f32[8,8,128], index: 0, kind: input, shape index: {}]   ;;  %s3479_s3 = inlined_call_operand.vmem [shape: f32[1,512], index: 3, kind: input, shape index: {}]   ;;  %s3480_s4 = inlined_call_operand.vmem [shape: f32[8,8,128], index: 4, kind: output, shape index: {}]  }
   0x1   :  { %v32_v0 = vld [vmem:[%s3476_s1 + $0x8] sm:$0xff]  ;;  %v34_v2 = vld [vmem:[%s3476_s1 + $0x18] sm:$0xff]  ;;  %181 = vmatprep.mubr.f32.mxu0 %v2597_v3  ;;  %294 = vmatprep.mubr.f32.mxu1 %v2597_v3  ;;  %v31_v6 = vld [vmem:[%s3476_s1] sm:$0xff] }
   0x2   :  { %v36_v1 = vld [vmem:[%s3476_s1 + $0x28] sm:$0xff]  ;;  %v38_v5 = vld [vmem:[%s3476_s1 + $0x38] sm:$0xff]  ;;  %v35_v7 = vld [vmem:[%s3476_s1 + $0x20] sm:$0xff] }
   0x3   :  { %v1876_v4 = vpack.c.bf16 %v36_v1, %v32_v0  ;;  %v1908_v8 = vpack.c.bf16 %v38_v5, %v34_v2  ;;  %v1878_v9 = vpack.c.bf16 %v35_v7, %v31_v6  ;;  %v33_v10 = vld [vmem:[%s3476_s1 + $0x10] sm:$0xff]  ;;  %v40_v12 = vld [vmem:[%s3476_s1 + $0x48] sm:$0xff]  ;;  %v42_v15 = vld [vmem:[%s3476_s1 + $0x58] sm:$0xff] }
   0x4   :  { %v37_v11 = vld [vmem:[%s3476_s1 + $0x30] sm:$0xff]  ;;  %v44_v14 = vld [vmem:[%s3476_s1 + $0x68] sm:$0xff]  ;;  %v46_v16 = vld [vmem:[%s3476_s1 + $0x78] sm:$0xff] }
   0x5   :  { %1877 = vmatprep.subr.bf16.mxu0 %v1876_v4  ;;  %v1910_v13 = vpack.c.bf16 %v37_v11, %v33_v10  ;;  %1909 = vmatprep.subr.bf16.mxu1 %v1908_v8  ;;  %v1880_v17 = vpack.c.bf16 %v44_v14, %v40_v12  ;;  %v1912_v18 = vpack.c.bf16 %v46_v16, %v42_v15  ;;  %v39_v19 = vld [vmem:[%s3476_s1 + $0x40] sm:$0xff]  ;;  %v41_v21 = vld [vmem:[%s3476_s1 + $0x50] sm:$0xff]  ;;  %v48_v24 = vld [vmem:[%s3476_s1 + $0x88] sm:$0xff] }
   0x6   :  { %1879 = vmatpush1.bf16.msra.mxu0 %v1878_v9  ;;  %v43_v20 = vld [vmem:[%s3476_s1 + $0x60] sm:$0xff]  ;;  %v45_v23 = vld [vmem:[%s3476_s1 + $0x70] sm:$0xff]  ;;  %v52_v25 = vld [vmem:[%s3476_s1 + $0xa8] sm:$0xff] }
   0x7   :  { %1911 = vmatpush1.bf16.msra.mxu1 %v1910_v13  ;;  %v1882_v22 = vpack.c.bf16 %v43_v20, %v39_v19  ;;  %1881 = vmatprep.subr.bf16.mxu0 %v1880_v17  ;;  %v1914_v26 = vpack.c.bf16 %v45_v23, %v41_v21  ;;  %v1884_v27 = vpack.c.bf16 %v52_v25, %v48_v24  ;;  %v50_v28 = vld [vmem:[%s3476_s1 + $0x98] sm:$0xff]  ;;  %v47_v30 = vld [vmem:[%s3476_s1 + $0x80] sm:$0xff]  ;;  %v49_v33 = vld [vmem:[%s3476_s1 + $0x90] sm:$0xff] }
   0x8   :  { %1913 = vmatprep.subr.bf16.mxu1 %v1912_v18  ;;  %v54_v29 = vld [vmem:[%s3476_s1 + $0xb8] sm:$0xff]  ;;  %v51_v32 = vld [vmem:[%s3476_s1 + $0xa0] sm:$0xff]  ;;  %v53_v34 = vld [vmem:[%s3476_s1 + $0xb0] sm:$0xff] }
   0x9   :  { %v1916_v31 = vpack.c.bf16 %v54_v29, %v50_v28  ;;  %v1886_v35 = vpack.c.bf16 %v51_v32, %v47_v30  ;;  %v56_v36 = vld [vmem:[%s3476_s1 + $0xc8] sm:$0xff]  ;;  %v58_v38 = vld [vmem:[%s3476_s1 + $0xd8] sm:$0xff]  ;;  %v1918_v39 = vpack.c.bf16 %v53_v34, %v49_v33  ;;  %v55_v42 = vld [vmem:[%s3476_s1 + $0xc0] sm:$0xff] }
   0xa   :  { %1883 = vmatpush1.bf16.msra.mxu0 %v1882_v22  ;;  %v60_v37 = vld [vmem:[%s3476_s1 + $0xe8] sm:$0xff]  ;;  %v62_v41 = vld [vmem:[%s3476_s1 + $0xf8] sm:$0xff]  ;;  %v59_v43 = vld [vmem:[%s3476_s1 + $0xe0] sm:$0xff] }
   0xb   :  { %1915 = vmatpush1.bf16.msra.mxu1 %v1914_v26  ;;  %1885 = vmatprep.subr.bf16.mxu0 %v1884_v27  ;;  %v1888_v40 = vpack.c.bf16 %v60_v37, %v56_v36  ;;  %v1920_v44 = vpack.c.bf16 %v62_v41, %v58_v38  ;;  %v57_v45 = vld [vmem:[%s3476_s1 + $0xd0] sm:$0xff]  ;;  %v64_v47 = vld [vmem:[%s3476_s1 + $0x108] sm:$0xff]  ;;  %v66_v49 = vld [vmem:[%s3476_s1 + $0x118] sm:$0xff]  ;;  %v1890_v51 = vpack.c.bf16 %v59_v43, %v55_v42 }
   0xc   :  { %1917 = vmatprep.subr.bf16.mxu1 %v1916_v31  ;;  %v61_v46 = vld [vmem:[%s3476_s1 + $0xf0] sm:$0xff]  ;;  %v68_v48 = vld [vmem:[%s3476_s1 + $0x128] sm:$0xff]  ;;  %v70_v50 = vld [vmem:[%s3476_s1 + $0x138] sm:$0xff] }
   0xd   :  { %v1922_v52 = vpack.c.bf16 %v61_v46, %v57_v45  ;;  %v1892_v53 = vpack.c.bf16 %v68_v48, %v64_v47  ;;  %v63_v54 = vld [vmem:[%s3476_s1 + $0x100] sm:$0xff]  ;;  %v65_v56 = vld [vmem:[%s3476_s1 + $0x110] sm:$0xff]  ;;  %v1924_v57 = vpack.c.bf16 %v70_v50, %v66_v49  ;;  %v72_v59 = vld [vmem:[%s3476_s1 + $0x148] sm:$0xff] }
   0xe   :  { %1887 = vmatpush1.bf16.msra.mxu0 %v1886_v35  ;;  %v67_v55 = vld [vmem:[%s3476_s1 + $0x120] sm:$0xff]  ;;  %v69_v58 = vld [vmem:[%s3476_s1 + $0x130] sm:$0xff]  ;;  %v76_v60 = vld [vmem:[%s3476_s1 + $0x168] sm:$0xff] }
   0xf   :  { %1919 = vmatpush1.bf16.msra.mxu1 %v1918_v39  ;;  %1889 = vmatprep.subr.bf16.mxu0 %v1888_v40  ;;  %v74_v61 = vld [vmem:[%s3476_s1 + $0x158] sm:$0xff]  ;;  %v1894_v63 = vpack.c.bf16 %v67_v55, %v63_v54  ;;  %v1926_v0 = vpack.c.bf16 %v69_v58, %v65_v56  ;;  %v1896_v1 = vpack.c.bf16 %v76_v60, %v72_v59  ;;  %v71_v2 = vld [vmem:[%s3476_s1 + $0x140] sm:$0xff]  ;;  %v73_v5 = vld [vmem:[%s3476_s1 + $0x150] sm:$0xff] }
  0x10   :  { %1921 = vmatprep.subr.bf16.mxu1 %v1920_v44  ;;  %v78_v62 = vld [vmem:[%s3476_s1 + $0x178] sm:$0xff]  ;;  %v75_v4 = vld [vmem:[%s3476_s1 + $0x160] sm:$0xff]  ;;  %v77_v7 = vld [vmem:[%s3476_s1 + $0x170] sm:$0xff] }
  0x11   :  { %v1928_v6 = vpack.c.bf16 %v78_v62, %v74_v61  ;;  %v80_v8 = vld [vmem:[%s3476_s1 + $0x188] sm:$0xff]  ;;  %v82_v10 = vld [vmem:[%s3476_s1 + $0x198] sm:$0xff]  ;;  %v1898_v12 = vpack.c.bf16 %v75_v4, %v71_v2  ;;  %v1930_v13 = vpack.c.bf16 %v77_v7, %v73_v5  ;;  %v79_v15 = vld [vmem:[%s3476_s1 + $0x180] sm:$0xff] }
  0x12   :  { %1891 = vmatpush1.bf16.msra.mxu0 %v1890_v51  ;;  %v84_v9 = vld [vmem:[%s3476_s1 + $0x1a8] sm:$0xff]  ;;  %v86_v11 = vld [vmem:[%s3476_s1 + $0x1b8] sm:$0xff]  ;;  %v83_v16 = vld [vmem:[%s3476_s1 + $0x1a0] sm:$0xff] }
  0x13   :  { %1923 = vmatpush1.bf16.msra.mxu1 %v1922_v52  ;;  %1893 = vmatprep.subr.bf16.mxu0 %v1892_v53  ;;  %v1900_v14 = vpack.c.bf16 %v84_v9, %v80_v8  ;;  %v81_v17 = vld [vmem:[%s3476_s1 + $0x190] sm:$0xff]  ;;  %v1932_v18 = vpack.c.bf16 %v86_v11, %v82_v10  ;;  %v88_v20 = vld [vmem:[%s3476_s1 + $0x1c8] sm:$0xff]  ;;  %v90_v22 = vld [vmem:[%s3476_s1 + $0x1d8] sm:$0xff]  ;;  %v1902_v24 = vpack.c.bf16 %v83_v16, %v79_v15 }
  0x14   :  { %1925 = vmatprep.subr.bf16.mxu1 %v1924_v57  ;;  %v85_v19 = vld [vmem:[%s3476_s1 + $0x1b0] sm:$0xff]  ;;  %v92_v21 = vld [vmem:[%s3476_s1 + $0x1e8] sm:$0xff]  ;;  %v94_v23 = vld [vmem:[%s3476_s1 + $0x1f8] sm:$0xff] }
  0x15   :  { %v1934_v25 = vpack.c.bf16 %v85_v19, %v81_v17  ;;  %v1904_v26 = vpack.c.bf16 %v92_v21, %v88_v20  ;;  %v87_v27 = vld [vmem:[%s3476_s1 + $0x1c0] sm:$0xff]  ;;  %v89_v29 = vld [vmem:[%s3476_s1 + $0x1d0] sm:$0xff]  ;;  %v1936_v30 = vpack.c.bf16 %v94_v23, %v90_v22  ;;  %v376_v32 = vld [vmem:[%s3477_s2 + $0x8] sm:$0xff] }
  0x16   :  { %1895 = vmatpush1.bf16.msra.mxu0 %v1894_v63  ;;  %v91_v28 = vld [vmem:[%s3476_s1 + $0x1e0] sm:$0xff]  ;;  %v93_v31 = vld [vmem:[%s3476_s1 + $0x1f0] sm:$0xff]  ;;  %v380_v33 = vld [vmem:[%s3477_s2 + $0x28] sm:$0xff] }
  0x17   :  { %1927 = vmatpush1.bf16.msra.mxu1 %v1926_v0  ;;  %1897 = vmatprep.subr.bf16.mxu0 %v1896_v1  ;;  %v378_v34 = vld [vmem:[%s3477_s2 + $0x18] sm:$0xff]  ;;  %v1906_v36 = vpack.c.bf16 %v91_v28, %v87_v27  ;;  %v1938_v37 = vpack.c.bf16 %v93_v31, %v89_v29  ;;  %v2829_v38 = vpack.c.bf16 %v380_v33, %v376_v32  ;;  %v375_v39 = vld [vmem:[%s3477_s2] sm:$0xff]  ;;  %v377_v42 = vld [vmem:[%s3477_s2 + $0x10] sm:$0xff] }
  0x18   :  { %1929 = vmatprep.subr.bf16.mxu1 %v1928_v6  ;;  %v382_v35 = vld [vmem:[%s3477_s2 + $0x38] sm:$0xff]  ;;  %v379_v40 = vld [vmem:[%s3477_s2 + $0x20] sm:$0xff]  ;;  %v381_v43 = vld [vmem:[%s3477_s2 + $0x30] sm:$0xff] }
  0x19   :  { %v2837_v41 = vpack.c.bf16 %v382_v35, %v378_v34  ;;  %v384_v44 = vld [vmem:[%s3477_s2 + $0x48] sm:$0xff]  ;;  %v23_v46 = vld [vmem:[%s3478_s0] sm:$0xff]  ;;  %v2854_v47 = vpack.c.bf16 %v379_v40, %v375_v39  ;;  %v386_v48 = vld [vmem:[%s3477_s2 + $0x58] sm:$0xff]  ;;  %v2863_v50 = vpack.c.bf16 %v381_v43, %v377_v42 }
  0x1a   :  { %1899 = vmatpush1.bf16.msra.mxu0 %v1898_v12  ;;  %v388_v45 = vld [vmem:[%s3477_s2 + $0x68] sm:$0xff]  ;;  %v390_v49 = vld [vmem:[%s3477_s2 + $0x78] sm:$0xff]  ;;  %v383_v51 = vld [vmem:[%s3477_s2 + $0x40] sm:$0xff] }
  0x1b   :  { %1931 = vmatpush1.bf16.msra.mxu1 %v1930_v13  ;;  %1901 = vmatprep.subr.bf16.mxu0 %v1900_v14  ;;  %v387_v52 = vld [vmem:[%s3477_s2 + $0x60] sm:$0xff]  ;;  %v2872_v53 = vpack.c.bf16 %v388_v45, %v384_v44  ;;  %v385_v54 = vld [vmem:[%s3477_s2 + $0x50] sm:$0xff]  ;;  %v2880_v56 = vpack.c.bf16 %v390_v49, %v386_v48  ;;  %v392_v57 = vld [vmem:[%s3477_s2 + $0x88] sm:$0xff] }
  0x1c   :  { %1933 = vmatprep.subr.bf16.mxu1 %v1932_v18  ;;  %v389_v55 = vld [vmem:[%s3477_s2 + $0x70] sm:$0xff]  ;;  %v396_v58 = vld [vmem:[%s3477_s2 + $0xa8] sm:$0xff]  ;;  %v2892_v60 = vpack.c.bf16 %v387_v52, %v383_v51  ;;  %v394_v61 = vld [vmem:[%s3477_s2 + $0x98] sm:$0xff] }
  0x1d   :  { %v24_v59 = vld [vmem:[%s3478_s0 + $0x8] sm:$0xff]  ;;  %v398_v62 = vld [vmem:[%s3477_s2 + $0xb8] sm:$0xff]  ;;  %v2902_v63 = vpack.c.bf16 %v389_v55, %v385_v54  ;;  %v391_v0 = vld [vmem:[%s3477_s2 + $0x80] sm:$0xff]  ;;  %v2912_v2 = vpack.c.bf16 %v396_v58, %v392_v57 }
  0x1e   :  { %1903 = vmatpush1.bf16.msra.mxu0 %v1902_v24  ;;  %v395_v1 = vld [vmem:[%s3477_s2 + $0xa0] sm:$0xff]  ;;  %v393_v4 = vld [vmem:[%s3477_s2 + $0x90] sm:$0xff]  ;;  %v2921_v6 = vpack.c.bf16 %v398_v62, %v394_v61  ;;  %v400_v7 = vld [vmem:[%s3477_s2 + $0xc8] sm:$0xff] }
  0x1f   :  { %1935 = vmatpush1.bf16.msra.mxu1 %v1934_v25  ;;  %1905 = vmatprep.subr.bf16.mxu0 %v1904_v26  ;;  %v397_v5 = vld [vmem:[%s3477_s2 + $0xb0] sm:$0xff]  ;;  %v404_v8 = vld [vmem:[%s3477_s2 + $0xe8] sm:$0xff]  ;;  %v2933_v10 = vpack.c.bf16 %v395_v1, %v391_v0  ;;  %v402_v11 = vld [vmem:[%s3477_s2 + $0xd8] sm:$0xff] }
  0x20   :  { %1937 = vmatprep.subr.bf16.mxu1 %v1936_v30  ;;  %v25_v9 = vld [vmem:[%s3478_s0 + $0x10] sm:$0xff]  ;;  %v406_v12 = vld [vmem:[%s3477_s2 + $0xf8] sm:$0xff]  ;;  %v2943_v13 = vpack.c.bf16 %v397_v5, %v393_v4  ;;  %v399_v14 = vld [vmem:[%s3477_s2 + $0xc0] sm:$0xff]  ;;  %v2953_v16 = vpack.c.bf16 %v404_v8, %v400_v7 }
  0x21   :  { %v403_v15 = vld [vmem:[%s3477_s2 + $0xe0] sm:$0xff]  ;;  %v401_v17 = vld [vmem:[%s3477_s2 + $0xd0] sm:$0xff]  ;;  %v2962_v19 = vpack.c.bf16 %v406_v12, %v402_v11  ;;  %v408_v20 = vld [vmem:[%s3477_s2 + $0x108] sm:$0xff] }
  0x22   :  { %1907 = vmatpush1.bf16.msra.mxu0 %v1906_v36  ;;  %v405_v18 = vld [vmem:[%s3477_s2 + $0xf0] sm:$0xff]  ;;  %v412_v21 = vld [vmem:[%s3477_s2 + $0x128] sm:$0xff]  ;;  %v26_v22 = vld [vmem:[%s3478_s0 + $0x18] sm:$0xff]  ;;  %v2974_v23 = vpack.c.bf16 %v403_v15, %v399_v14 }
  0x23   :  { %1939 = vmatpush1.bf16.msra.mxu1 %v1938_v37  ;;  %1941 = vmatprep.subr.bf16.mxu0 %v2829_v38  ;;  %v410_v24 = vld [vmem:[%s3477_s2 + $0x118] sm:$0xff]  ;;  %v2984_v26 = vpack.c.bf16 %v405_v18, %v401_v17  ;;  %v407_v27 = vld [vmem:[%s3477_s2 + $0x100] sm:$0xff]  ;;  %v2994_v29 = vpack.c.bf16 %v412_v21, %v408_v20  ;;  %v409_v30 = vld [vmem:[%s3477_s2 + $0x110] sm:$0xff] }
  0x24   :  { %1973 = vmatprep.subr.bf16.mxu1 %v2837_v41  ;;  %v414_v25 = vld [vmem:[%s3477_s2 + $0x138] sm:$0xff]  ;;  %v411_v28 = vld [vmem:[%s3477_s2 + $0x120] sm:$0xff]  ;;  %v413_v31 = vld [vmem:[%s3477_s2 + $0x130] sm:$0xff] }
  0x25   :  { %182 = vmatmul.mubr.f32.vlgmr.msra.gmra.mrb[0].mxu0 %v23_v46  ;;  %v3003_v32 = vpack.c.bf16 %v414_v25, %v410_v24  ;;  %v416_v33 = vld [vmem:[%s3477_s2 + $0x148] sm:$0xff]  ;;  %v27_v35 = vld [vmem:[%s3478_s0 + $0x20] sm:$0xff]  ;;  %v3015_v36 = vpack.c.bf16 %v411_v28, %v407_v27  ;;  %v418_v37 = vld [vmem:[%s3477_s2 + $0x158] sm:$0xff]  ;;  %v3025_v40 = vpack.c.bf16 %v413_v31, %v409_v30  ;;  %v97_v28 = vlaneseq }
  0x26   :  { %295 = vmatmul.mubr.f32.vlgmr.msra.gmra.mrb[0].mxu1 %v23_v46  ;;  %1943 = vmatpush1.bf16.msra.mxu0 %v2854_v47  ;;  %v420_v34 = vld [vmem:[%s3477_s2 + $0x168] sm:$0xff]  ;;  %v422_v39 = vld [vmem:[%s3477_s2 + $0x178] sm:$0xff]  ;;  %v415_v42 = vld [vmem:[%s3477_s2 + $0x140] sm:$0xff] }
  0x27   :  { %1975 = vmatpush1.bf16.msra.mxu1 %v2863_v50  ;;  %187 = vmatprep.mubr.f32.mxu0 %v2597_v3  ;;  %v419_v43 = vld [vmem:[%s3477_s2 + $0x160] sm:$0xff]  ;;  %v3035_v44 = vpack.c.bf16 %v420_v34, %v416_v33  ;;  %v417_v45 = vld [vmem:[%s3477_s2 + $0x150] sm:$0xff]  ;;  %v3044_v48 = vpack.c.bf16 %v422_v39, %v418_v37  ;;  %v424_v49 = vld [vmem:[%s3477_s2 + $0x188] sm:$0xff]  ;;  %v98_v30 = vshrl.u32 %v97_v28, 7 }
  0x28   :  { %300 = vmatprep.mubr.f32.mxu1 %v2597_v3  ;;  %1945 = vmatprep.subr.bf16.mxu0 %v2872_v53  ;;  %v421_v46 = vld [vmem:[%s3477_s2 + $0x170] sm:$0xff]  ;;  %v428_v51 = vld [vmem:[%s3477_s2 + $0x1a8] sm:$0xff]  ;;  %v3056_v54 = vpack.c.bf16 %v419_v43, %v415_v42  ;;  %v426_v55 = vld [vmem:[%s3477_s2 + $0x198] sm:$0xff] }
  0x29   :  { %188 = vmatmul.mubr.f32.gmra.mrb[2].mxu0 %v24_v59  ;;  %1977 = vmatprep.subr.bf16.mxu1 %v2880_v56  ;;  %v28_v52 = vld [vmem:[%s3478_s0 + $0x28] sm:$0xff]  ;;  %v430_v57 = vld [vmem:[%s3477_s2 + $0x1b8] sm:$0xff]  ;;  %v3066_v58 = vpack.c.bf16 %v421_v46, %v417_v45  ;;  %v427_v61 = vld [vmem:[%s3477_s2 + $0x1a0] sm:$0xff]  ;;  %v3076_v62 = vpack.c.bf16 %v428_v51, %v424_v49  ;;  %v99_v31 = vsub.s32 0, %v98_v30  ;;  %v103_v34 = vsub.s32 1, %v98_v30 }
  0x2a   :  { %301 = vmatmul.mubr.f32.gmra.mrb[2].mxu1 %v24_v59  ;;  %1947 = vmatpush1.bf16.msra.mxu0 %v2892_v60  ;;  %v423_v59 = vld [vmem:[%s3477_s2 + $0x180] sm:$0xff]  ;;  %v425_v0 = vld [vmem:[%s3477_s2 + $0x190] sm:$0xff]  ;;  %v3085_v4 = vpack.c.bf16 %v430_v57, %v426_v55  ;;  %v432_v5 = vld [vmem:[%s3477_s2 + $0x1c8] sm:$0xff]  ;;  %v107_v37 = vsub.s32 2, %v98_v30  ;;  %v111_v51 = vsub.s32 3, %v98_v30 }
  0x2b   :  { %1979 = vmatpush1.bf16.msra.mxu1 %v2902_v63  ;;  %193 = vmatprep.mubr.f32.mxu0 %v2597_v3  ;;  %v429_v1 = vld [vmem:[%s3477_s2 + $0x1b0] sm:$0xff]  ;;  %v436_v7 = vld [vmem:[%s3477_s2 + $0x1e8] sm:$0xff]  ;;  %v434_v11 = vld [vmem:[%s3477_s2 + $0x1d8] sm:$0xff] }
  0x2c   :  { %306 = vmatprep.mubr.f32.mxu1 %v2597_v3  ;;  %1949 = vmatprep.subr.bf16.mxu0 %v2912_v2  ;;  %v29_v8 = vld [vmem:[%s3478_s0 + $0x30] sm:$0xff]  ;;  %v438_v12 = vld [vmem:[%s3477_s2 + $0x1f8] sm:$0xff]  ;;  %v3107_v14 = vpack.c.bf16 %v429_v1, %v425_v0  ;;  %v431_v15 = vld [vmem:[%s3477_s2 + $0x1c0] sm:$0xff]  ;;  %v3117_v18 = vpack.c.bf16 %v436_v7, %v432_v5 }
  0x2d   :  { %194 = vmatmul.mubr.f32.gmra.mrb[4].mxu0 %v25_v9  ;;  %1981 = vmatprep.subr.bf16.mxu1 %v2921_v6  ;;  %v435_v17 = vld [vmem:[%s3477_s2 + $0x1e0] sm:$0xff]  ;;  %v433_v20 = vld [vmem:[%s3477_s2 + $0x1d0] sm:$0xff]  ;;  %v30_v24 = vld [vmem:[%s3478_s0 + $0x38] sm:$0xff] }
  0x2e   :  { %307 = vmatmul.mubr.f32.gmra.mrb[4].mxu1 %v25_v9  ;;  %1951 = vmatpush1.bf16.msra.mxu0 %v2933_v10  ;;  %v3097_v9 = vpack.c.bf16 %v427_v61, %v423_v59  ;;  %v437_v21 = vld [vmem:[%s3477_s2 + $0x1f0] sm:$0xff]  ;;  %v3132_v25 = vpack.c.bf16 %v435_v17, %v431_v15  ;;  %v95_v33 = vld [vmem:[%s3479_s3] sm:$0xf] }
  0x2f   :  { %1983 = vmatpush1.bf16.msra.mxu1 %v2943_v13  ;;  %199 = vmatprep.mubr.f32.mxu0 %v2597_v3  ;;  %v3136_v27 = vpack.c.bf16 %v437_v21, %v433_v20  ;;  %v3188_v39 = vrot.slane %v95_v33, %v103_v34  ;;  %v3191_v45 = vrot.slane %v95_v33, %v107_v37 }
  0x30   :  { %312 = vmatprep.mubr.f32.mxu1 %v2597_v3  ;;  %1953 = vmatprep.subr.bf16.mxu0 %v2953_v16  ;;  %v3195_v0 = vrot.slane %v95_v33, %v111_v51 }
  0x31   :  { %200 = vmatmul.mubr.f32.gmra.mrb[6].mxu0 %v26_v22  ;;  %1985 = vmatprep.subr.bf16.mxu1 %v2962_v19 }
  0x32   :  { %313 = vmatmul.mubr.f32.gmra.mrb[6].mxu1 %v26_v22  ;;  %1955 = vmatpush1.bf16.msra.mxu0 %v2974_v23  ;;  %v3126_v22 = vpack.c.bf16 %v438_v12, %v434_v11 }
  0x33   :  { %1987 = vmatpush1.bf16.msra.mxu1 %v2984_v26  ;;  %205 = vmatprep.mubr.f32.mxu0 %v2597_v3 }
  0x34   :  { %318 = vmatprep.mubr.f32.mxu1 %v2597_v3  ;;  %1957 = vmatprep.subr.bf16.mxu0 %v2994_v29 }
  0x35   :  { %206 = vmatmul.mubr.f32.gmra.mrb[8].mxu0 %v27_v35  ;;  %1989 = vmatprep.subr.bf16.mxu1 %v3003_v32 }
  0x36   :  { %319 = vmatmul.mubr.f32.gmra.mrb[8].mxu1 %v27_v35  ;;  %1959 = vmatpush1.bf16.msra.mxu0 %v3015_v36  ;;  %v3186_v35 = vrot.slane %v95_v33, %v99_v31 }
  0x37   :  { %1991 = vmatpush1.bf16.msra.mxu1 %v3025_v40  ;;  %211 = vmatprep.mubr.f32.mxu0 %v2597_v3 }
  0x38   :  { %324 = vmatprep.mubr.f32.mxu1 %v2597_v3  ;;  %1961 = vmatprep.subr.bf16.mxu0 %v3035_v44 }
  0x39   :  { %212 = vmatmul.mubr.f32.gmra.mrb[10].mxu0 %v28_v52  ;;  %1993 = vmatprep.subr.bf16.mxu1 %v3044_v48 }
  0x3a   :  { %325 = vmatmul.mubr.f32.gmra.mrb[10].mxu1 %v28_v52  ;;  %1963 = vmatpush1.bf16.msra.mxu0 %v3056_v54 }
  0x3b   :  { %1995 = vmatpush1.bf16.msra.mxu1 %v3066_v58  ;;  %217 = vmatprep.mubr.f32.mxu0 %v2597_v3 }
  0x3c   :  { %330 = vmatprep.mubr.f32.mxu1 %v2597_v3  ;;  %1965 = vmatprep.subr.bf16.mxu0 %v3076_v62 }
  0x3d   :  { %218 = vmatmul.mubr.f32.gmra.mrb[12].mxu0 %v29_v8  ;;  %1997 = vmatprep.subr.bf16.mxu1 %v3085_v4 }
  0x3e   :  { %331 = vmatmul.mubr.f32.gmra.mrb[12].mxu1 %v29_v8  ;;  %1967 = vmatpush1.bf16.msra.mxu0 %v3097_v9 }
  0x3f   :  { %1999 = vmatpush1.bf16.msra.mxu1 %v3107_v14  ;;  %223 = vmatprep.mubr.f32.mxu0 %v2597_v3 }
  0x40   :  { %336 = vmatprep.mubr.f32.mxu1 %v2597_v3  ;;  %1969 = vmatprep.subr.bf16.mxu0 %v3117_v18 }
  0x41   :  { %224 = vmatmul.mubr.f32.gmra.mrb[14].mxu0 %v30_v24  ;;  %2001 = vmatprep.subr.bf16.mxu1 %v3126_v22 }
  0x42   :  { %337 = vmatmul.mubr.f32.gmra.mrb[14].mxu1 %v30_v24  ;;  %1971 = vmatpush1.bf16.msra.mxu0 %v3132_v25 }
  0x43   :  { %2003 = vmatpush1.bf16.msra.mxu1 %v3136_v27  ;;  %510 = vmatprep.mubr.f32.mxu0 %v2597_v3 }
  0x44   :  { %581 = vmatprep.mubr.f32.mxu1 %v2597_v3  ;;  %2005 = vmatprep.subr.bf16.mxu0 %v2829_v38 }
  0x45   :  { %511 = vmatmul.mubr.f32.vlgmr.msra.gmra.mrb[0].mxu0 %v2597_v3  ;;  %2037 = vmatprep.subr.bf16.mxu1 %v2837_v41 }
  0x46   :  { %582 = vmatmul.mubr.f32.vlgmr.msra.gmra.mrb[0].mxu1 %v2597_v3  ;;  %2007 = vmatpush1.bf16.msra.mxu0 %v2854_v47 }
  0x47   :  { %2039 = vmatpush1.bf16.msra.mxu1 %v2863_v50  ;;  %2009 = vmatprep.subr.bf16.mxu0 %v2872_v53 }
  0x48   :  { %2041 = vmatprep.subr.bf16.mxu1 %v2880_v56  ;;  %686 = vmatprep.mubr.f32.mxu0 %v2597_v3 }
  0x49   :  { %757 = vmatprep.mubr.f32.mxu1 %v2597_v3 }
  0x4a   :  { %2011 = vmatpush1.bf16.msra.mxu0 %v2892_v60 }
  0x4b   :  { %2043 = vmatpush1.bf16.msra.mxu1 %v2902_v63  ;;  %2013 = vmatprep.subr.bf16.mxu0 %v2912_v2 }
  0x4c   :  { %2045 = vmatprep.subr.bf16.mxu1 %v2921_v6 }
  0x4e   :  { %2015 = vmatpush1.bf16.msra.mxu0 %v2933_v10 }
  0x4f   :  { %2047 = vmatpush1.bf16.msra.mxu1 %v2943_v13  ;;  %2017 = vmatprep.subr.bf16.mxu0 %v2953_v16 }
  0x50   :  { %2049 = vmatprep.subr.bf16.mxu1 %v2962_v19 }
  0x52   :  { %2019 = vmatpush1.bf16.msra.mxu0 %v2974_v23 }
  0x53   :  { %2051 = vmatpush1.bf16.msra.mxu1 %v2984_v26  ;;  %2021 = vmatprep.subr.bf16.mxu0 %v2994_v29 }
  0x54   :  { %2053 = vmatprep.subr.bf16.mxu1 %v3003_v32 }
  0x56   :  { %2023 = vmatpush1.bf16.msra.mxu0 %v3015_v36 }
  0x57   :  { %2055 = vmatpush1.bf16.msra.mxu1 %v3025_v40  ;;  %2025 = vmatprep.subr.bf16.mxu0 %v3035_v44 }
  0x58   :  { %2057 = vmatprep.subr.bf16.mxu1 %v3044_v48 }
  0x5a   :  { %2027 = vmatpush1.bf16.msra.mxu0 %v3056_v54 }
  0x5b   :  { %2059 = vmatpush1.bf16.msra.mxu1 %v3066_v58  ;;  %2029 = vmatprep.subr.bf16.mxu0 %v3076_v62 }
  0x5c   :  { %2061 = vmatprep.subr.bf16.mxu1 %v3085_v4 }
  0x5e   :  { %2031 = vmatpush1.bf16.msra.mxu0 %v3097_v9 }
  0x5f   :  { %2063 = vmatpush1.bf16.msra.mxu1 %v3107_v14  ;;  %2033 = vmatprep.subr.bf16.mxu0 %v3117_v18 }
  0x60   :  { %2065 = vmatprep.subr.bf16.mxu1 %v3126_v22 }
  0x62   :  { %2035 = vmatpush1.bf16.msra.mxu0 %v3132_v25 }
  0x63   :  { %2067 = vmatpush1.bf16.msra.mxu1 %v3136_v27  ;;  %2069 = vmatprep.subr.bf16.mxu0 %v2829_v38 }
  0x64   :  { %2101 = vmatprep.subr.bf16.mxu1 %v2837_v41 }
 0x118   :  { %v512_v42 = vpop.f32.mrb[0].mxu0 }
 0x119   :  { %v2452_v43 = vadd.f32 %v512_v42, %v3186_v35  ;;  %v583_v46 = vpop.f32.mrb[0].mxu1  ;;  %v514_v49 = vpop.f32.mrb[1].mxu0 }
 0x11a   :  { %v2453_v52 = vadd.f32 %v514_v49, %v3188_v39  ;;  %v585_v55 = vpop.f32.mrb[1].mxu1  ;;  %v2468_v61 = vadd.f32 %v583_v46, %v3191_v45 }
 0x11b   :  { %v592_v57 = vmul.f32 0.5, %v2452_v43  ;;  %v2469_v1 = vadd.f32 %v585_v55, %v3195_v0 }
 0x11c   :  { %v596_v59 = vmul.f32 0.5, %v2453_v52 }
 0x11d   :  { %2517 = vtanh.f32 %v592_v57  ;;  %v601_v5 = vmul.f32 0.5, %v2469_v1 }
 0x11e   :  { %2519 = vtanh.f32 %v596_v59 }
 0x11f   :  { %2521 = vtanh.f32 %v2468_v61 }
 0x120   :  { %2523 = vtanh.f32 %v601_v5 }
 0x127   :  { %v2518_v7 = vpop.eup %2517 }
 0x128   :  { %v2520_v8 = vpop.eup %2519  ;;  %v594_v11 = vadd.f32 1.0, %v2518_v7 }
 0x129   :  { %v598_v12 = vadd.f32 1.0, %v2520_v8  ;;  %v2522_v17 = vpop.eup %2521 }
 0x12a   :  { %v595_v15 = vmul.f32 0.5, %v594_v11  ;;  %v2524_v30 = vpop.eup %2523 }
 0x12b   :  { %v599_v20 = vmul.f32 0.5, %v598_v12  ;;  %v603_v31 = vadd.f32 1.0, %v2524_v30 }
 0x12c   :  { %v606_v21 = vmul.f32 %v2522_v17, %v595_v15 }
 0x12d   :  { %v605_v24 = vmul.f32 0.0, %v599_v20  ;;  %v604_v33 = vmul.f32 0.5, %v603_v31 }
 0x12f   :  { %v3198_v28 = vadd.f32 %v606_v21, %v605_v24 }
 0x131   :  { %2525 = vtanh.f32 %v3198_v28 }
 0x13b   :  { %v2526_v34 = vpop.eup %2525 }
 0x13c   :  { %v609_v37 = vmul.f32 %v2526_v34, %v604_v33 }
 0x13e   :  { %616 = vst [vmem:[%s3480_s4] sm:$0xff] %v609_v37  ;;  %687 = vmatmul.mubr.f32.vlgmr.msra.gmra.mrb[2].mxu0 %v609_v37  ;;  %758 = vmatmul.mubr.f32.vlgmr.msra.gmra.mrb[2].mxu1 %v609_v37 }
 0x13f   :  { %2071 = vmatpush1.bf16.msra.mxu0 %v2854_v47  ;;  %2103 = vmatpush1.bf16.msra.mxu1 %v2863_v50 }
 0x140   :  { %2073 = vmatprep.subr.bf16.mxu0 %v2872_v53  ;;  %2105 = vmatprep.subr.bf16.mxu1 %v2880_v56 }
 0x141   :  { %864 = vmatprep.mubr.f32.mxu0 %v2597_v3  ;;  %935 = vmatprep.mubr.f32.mxu1 %v2597_v3 }
 0x143   :  { %2075 = vmatpush1.bf16.msra.mxu0 %v2892_v60  ;;  %2107 = vmatpush1.bf16.msra.mxu1 %v2902_v63 }
 0x144   :  { %2077 = vmatprep.subr.bf16.mxu0 %v2912_v2  ;;  %2109 = vmatprep.subr.bf16.mxu1 %v2921_v6 }
 0x147   :  { %2079 = vmatpush1.bf16.msra.mxu0 %v2933_v10  ;;  %2111 = vmatpush1.bf16.msra.mxu1 %v2943_v13 }
 0x148   :  { %2081 = vmatprep.subr.bf16.mxu0 %v2953_v16  ;;  %2113 = vmatprep.subr.bf16.mxu1 %v2962_v19 }
 0x14b   :  { %2083 = vmatpush1.bf16.msra.mxu0 %v2974_v23  ;;  %2115 = vmatpush1.bf16.msra.mxu1 %v2984_v26 }
 0x14c   :  { %2085 = vmatprep.subr.bf16.mxu0 %v2994_v29  ;;  %2117 = vmatprep.subr.bf16.mxu1 %v3003_v32 }
 0x14f   :  { %2087 = vmatpush1.bf16.msra.mxu0 %v3015_v36  ;;  %2119 = vmatpush1.bf16.msra.mxu1 %v3025_v40 }
 0x150   :  { %2089 = vmatprep.subr.bf16.mxu0 %v3035_v44  ;;  %2121 = vmatprep.subr.bf16.mxu1 %v3044_v48 }
 0x153   :  { %2091 = vmatpush1.bf16.msra.mxu0 %v3056_v54  ;;  %2123 = vmatpush1.bf16.msra.mxu1 %v3066_v58 }
 0x154   :  { %2093 = vmatprep.subr.bf16.mxu0 %v3076_v62  ;;  %2125 = vmatprep.subr.bf16.mxu1 %v3085_v4 }
 0x157   :  { %2095 = vmatpush1.bf16.msra.mxu0 %v3097_v9  ;;  %2127 = vmatpush1.bf16.msra.mxu1 %v3107_v14 }
 0x158   :  { %2097 = vmatprep.subr.bf16.mxu0 %v3117_v18  ;;  %2129 = vmatprep.subr.bf16.mxu1 %v3126_v22 }
 0x15b   :  { %2099 = vmatpush1.bf16.msra.mxu0 %v3132_v25  ;;  %2131 = vmatpush1.bf16.msra.mxu1 %v3136_v27 }
 0x15c   :  { %2133 = vmatprep.subr.bf16.mxu0 %v2829_v38  ;;  %2165 = vmatprep.subr.bf16.mxu1 %v2837_v41 }
 0x211   :  { %v688_v42 = vpop.f32.mrb[2].mxu0  ;;  %v759_v43 = vpop.f32.mrb[2].mxu1 }
 0x212   :  { %v2454_v46 = vadd.f32 %v688_v42, %v3186_v35  ;;  %v690_v49 = vpop.f32.mrb[3].mxu0  ;;  %v761_v51 = vpop.f32.mrb[3].mxu1  ;;  %v2470_v59 = vadd.f32 %v759_v43, %v3191_v45 }
 0x213   :  { %v2455_v52 = vadd.f32 %v690_v49, %v3188_v39  ;;  %v2471_v61 = vadd.f32 %v761_v51, %v3195_v0 }
 0x214   :  { %v768_v55 = vmul.f32 0.5, %v2454_v46 }
 0x215   :  { %v772_v57 = vmul.f32 0.5, %v2455_v52  ;;  %v777_v1 = vmul.f32 0.5, %v2471_v61 }
 0x216   :  { %2527 = vtanh.f32 %v768_v55 }
 0x217   :  { %2529 = vtanh.f32 %v772_v57 }
 0x218   :  { %2531 = vtanh.f32 %v2470_v59 }
 0x219   :  { %2533 = vtanh.f32 %v777_v1 }
 0x220   :  { %v2528_v5 = vpop.eup %2527 }
 0x221   :  { %v2530_v7 = vpop.eup %2529  ;;  %v770_v8 = vadd.f32 1.0, %v2528_v5 }
 0x222   :  { %v774_v11 = vadd.f32 1.0, %v2530_v7  ;;  %v2532_v15 = vpop.eup %2531 }
 0x223   :  { %v771_v12 = vmul.f32 0.5, %v770_v8  ;;  %v2534_v30 = vpop.eup %2533 }
 0x224   :  { %v775_v17 = vmul.f32 0.5, %v774_v11  ;;  %v779_v31 = vadd.f32 1.0, %v2534_v30 }
 0x225   :  { %v782_v20 = vmul.f32 %v2532_v15, %v771_v12 }
 0x226   :  { %v781_v21 = vmul.f32 %v775_v17, %v3198_v28  ;;  %v780_v33 = vmul.f32 0.5, %v779_v31 }
 0x228   :  { %v3243_v24 = vadd.f32 %v782_v20, %v781_v21 }
 0x22a   :  { %2535 = vtanh.f32 %v3243_v24 }
 0x234   :  { %v2536_v34 = vpop.eup %2535 }
 0x235   :  { %v785_v37 = vmul.f32 %v2536_v34, %v780_v33 }
 0x237   :  { %1869 = vst [vmem:[%s3480_s4 + $0x8] sm:$0xff] %v785_v37  ;;  %865 = vmatmul.mubr.f32.vlgmr.msra.gmra.mrb[4].mxu0 %v785_v37  ;;  %936 = vmatmul.mubr.f32.vlgmr.msra.gmra.mrb[4].mxu1 %v785_v37 }
 0x238   :  { %2135 = vmatpush1.bf16.msra.mxu0 %v2854_v47  ;;  %2167 = vmatpush1.bf16.msra.mxu1 %v2863_v50 }
 0x239   :  { %2137 = vmatprep.subr.bf16.mxu0 %v2872_v53  ;;  %2169 = vmatprep.subr.bf16.mxu1 %v2880_v56 }
 0x23a   :  { %1042 = vmatprep.mubr.f32.mxu0 %v2597_v3  ;;  %1113 = vmatprep.mubr.f32.mxu1 %v2597_v3 }
 0x23c   :  { %2139 = vmatpush1.bf16.msra.mxu0 %v2892_v60  ;;  %2171 = vmatpush1.bf16.msra.mxu1 %v2902_v63 }
 0x23d   :  { %2141 = vmatprep.subr.bf16.mxu0 %v2912_v2  ;;  %2173 = vmatprep.subr.bf16.mxu1 %v2921_v6 }
 0x240   :  { %2143 = vmatpush1.bf16.msra.mxu0 %v2933_v10  ;;  %2175 = vmatpush1.bf16.msra.mxu1 %v2943_v13 }
 0x241   :  { %2145 = vmatprep.subr.bf16.mxu0 %v2953_v16  ;;  %2177 = vmatprep.subr.bf16.mxu1 %v2962_v19 }
 0x244   :  { %2147 = vmatpush1.bf16.msra.mxu0 %v2974_v23  ;;  %2179 = vmatpush1.bf16.msra.mxu1 %v2984_v26 }
 0x245   :  { %2149 = vmatprep.subr.bf16.mxu0 %v2994_v29  ;;  %2181 = vmatprep.subr.bf16.mxu1 %v3003_v32 }
 0x248   :  { %2151 = vmatpush1.bf16.msra.mxu0 %v3015_v36  ;;  %2183 = vmatpush1.bf16.msra.mxu1 %v3025_v40 }
 0x249   :  { %2153 = vmatprep.subr.bf16.mxu0 %v3035_v44  ;;  %2185 = vmatprep.subr.bf16.mxu1 %v3044_v48 }
 0x24c   :  { %2155 = vmatpush1.bf16.msra.mxu0 %v3056_v54  ;;  %2187 = vmatpush1.bf16.msra.mxu1 %v3066_v58 }
 0x24d   :  { %2157 = vmatprep.subr.bf16.mxu0 %v3076_v62  ;;  %2189 = vmatprep.subr.bf16.mxu1 %v3085_v4 }
 0x250   :  { %2159 = vmatpush1.bf16.msra.mxu0 %v3097_v9  ;;  %2191 = vmatpush1.bf16.msra.mxu1 %v3107_v14 }
 0x251   :  { %2161 = vmatprep.subr.bf16.mxu0 %v3117_v18  ;;  %2193 = vmatprep.subr.bf16.mxu1 %v3126_v22 }
 0x254   :  { %2163 = vmatpush1.bf16.msra.mxu0 %v3132_v25  ;;  %2195 = vmatpush1.bf16.msra.mxu1 %v3136_v27 }
 0x255   :  { %2197 = vmatprep.subr.bf16.mxu0 %v2829_v38  ;;  %2229 = vmatprep.subr.bf16.mxu1 %v2837_v41 }
 0x30a   :  { %v866_v28 = vpop.f32.mrb[4].mxu0  ;;  %v937_v42 = vpop.f32.mrb[4].mxu1 }
 0x30b   :  { %v2456_v43 = vadd.f32 %v866_v28, %v3186_v35  ;;  %v868_v46 = vpop.f32.mrb[5].mxu0  ;;  %v939_v49 = vpop.f32.mrb[5].mxu1  ;;  %v2472_v57 = vadd.f32 %v937_v42, %v3191_v45 }
 0x30c   :  { %v2457_v51 = vadd.f32 %v868_v46, %v3188_v39  ;;  %v2473_v59 = vadd.f32 %v939_v49, %v3195_v0 }
 0x30d   :  { %v946_v52 = vmul.f32 0.5, %v2456_v43 }
 0x30e   :  { %v950_v55 = vmul.f32 0.5, %v2457_v51  ;;  %v955_v61 = vmul.f32 0.5, %v2473_v59 }
 0x30f   :  { %2537 = vtanh.f32 %v946_v52 }
 0x310   :  { %2539 = vtanh.f32 %v950_v55 }
 0x311   :  { %2541 = vtanh.f32 %v2472_v57 }
 0x312   :  { %2543 = vtanh.f32 %v955_v61 }
 0x319   :  { %v2538_v1 = vpop.eup %2537 }
 0x31a   :  { %v2540_v5 = vpop.eup %2539  ;;  %v948_v7 = vadd.f32 1.0, %v2538_v1 }
 0x31b   :  { %v952_v8 = vadd.f32 1.0, %v2540_v5  ;;  %v2542_v12 = vpop.eup %2541 }
 0x31c   :  { %v949_v11 = vmul.f32 0.5, %v948_v7  ;;  %v2544_v30 = vpop.eup %2543 }
 0x31d   :  { %v953_v15 = vmul.f32 0.5, %v952_v8  ;;  %v957_v31 = vadd.f32 1.0, %v2544_v30 }
 0x31e   :  { %v960_v17 = vmul.f32 %v2542_v12, %v949_v11 }
 0x31f   :  { %v959_v20 = vmul.f32 %v953_v15, %v3243_v24  ;;  %v958_v33 = vmul.f32 0.5, %v957_v31 }
 0x321   :  { %v3288_v21 = vadd.f32 %v960_v17, %v959_v20 }
 0x323   :  { %2545 = vtanh.f32 %v3288_v21 }
 0x32d   :  { %v2546_v34 = vpop.eup %2545 }
 0x32e   :  { %v963_v37 = vmul.f32 %v2546_v34, %v958_v33 }
 0x330   :  { %1870 = vst [vmem:[%s3480_s4 + $0x10] sm:$0xff] %v963_v37  ;;  %1043 = vmatmul.mubr.f32.vlgmr.msra.gmra.mrb[6].mxu0 %v963_v37  ;;  %1114 = vmatmul.mubr.f32.vlgmr.msra.gmra.mrb[6].mxu1 %v963_v37 }
 0x331   :  { %2199 = vmatpush1.bf16.msra.mxu0 %v2854_v47  ;;  %2231 = vmatpush1.bf16.msra.mxu1 %v2863_v50 }
 0x332   :  { %2201 = vmatprep.subr.bf16.mxu0 %v2872_v53  ;;  %2233 = vmatprep.subr.bf16.mxu1 %v2880_v56 }
 0x333   :  { %1220 = vmatprep.mubr.f32.mxu0 %v2597_v3  ;;  %1291 = vmatprep.mubr.f32.mxu1 %v2597_v3 }
 0x335   :  { %2203 = vmatpush1.bf16.msra.mxu0 %v2892_v60  ;;  %2235 = vmatpush1.bf16.msra.mxu1 %v2902_v63 }
 0x336   :  { %2205 = vmatprep.subr.bf16.mxu0 %v2912_v2  ;;  %2237 = vmatprep.subr.bf16.mxu1 %v2921_v6 }
 0x339   :  { %2207 = vmatpush1.bf16.msra.mxu0 %v2933_v10  ;;  %2239 = vmatpush1.bf16.msra.mxu1 %v2943_v13 }
 0x33a   :  { %2209 = vmatprep.subr.bf16.mxu0 %v2953_v16  ;;  %2241 = vmatprep.subr.bf16.mxu1 %v2962_v19 }
 0x33d   :  { %2211 = vmatpush1.bf16.msra.mxu0 %v2974_v23  ;;  %2243 = vmatpush1.bf16.msra.mxu1 %v2984_v26 }
 0x33e   :  { %2213 = vmatprep.subr.bf16.mxu0 %v2994_v29  ;;  %2245 = vmatprep.subr.bf16.mxu1 %v3003_v32 }
 0x341   :  { %2215 = vmatpush1.bf16.msra.mxu0 %v3015_v36  ;;  %2247 = vmatpush1.bf16.msra.mxu1 %v3025_v40 }
 0x342   :  { %2217 = vmatprep.subr.bf16.mxu0 %v3035_v44  ;;  %2249 = vmatprep.subr.bf16.mxu1 %v3044_v48 }
 0x345   :  { %2219 = vmatpush1.bf16.msra.mxu0 %v3056_v54  ;;  %2251 = vmatpush1.bf16.msra.mxu1 %v3066_v58 }
 0x346   :  { %2221 = vmatprep.subr.bf16.mxu0 %v3076_v62  ;;  %2253 = vmatprep.subr.bf16.mxu1 %v3085_v4 }
 0x349   :  { %2223 = vmatpush1.bf16.msra.mxu0 %v3097_v9  ;;  %2255 = vmatpush1.bf16.msra.mxu1 %v3107_v14 }
 0x34a   :  { %2225 = vmatprep.subr.bf16.mxu0 %v3117_v18  ;;  %2257 = vmatprep.subr.bf16.mxu1 %v3126_v22 }
 0x34d   :  { %2227 = vmatpush1.bf16.msra.mxu0 %v3132_v25  ;;  %2259 = vmatpush1.bf16.msra.mxu1 %v3136_v27 }
 0x34e   :  { %2261 = vmatprep.subr.bf16.mxu0 %v2829_v38  ;;  %2293 = vmatprep.subr.bf16.mxu1 %v2837_v41 }
 0x403   :  { %v1044_v24 = vpop.f32.mrb[6].mxu0  ;;  %v1115_v28 = vpop.f32.mrb[6].mxu1 }
 0x404   :  { %v2458_v42 = vadd.f32 %v1044_v24, %v3186_v35  ;;  %v1046_v43 = vpop.f32.mrb[7].mxu0  ;;  %v1117_v46 = vpop.f32.mrb[7].mxu1  ;;  %v2474_v55 = vadd.f32 %v1115_v28, %v3191_v45 }
 0x405   :  { %v2459_v49 = vadd.f32 %v1046_v43, %v3188_v39  ;;  %v2475_v57 = vadd.f32 %v1117_v46, %v3195_v0 }
 0x406   :  { %v1124_v51 = vmul.f32 0.5, %v2458_v42 }
 0x407   :  { %v1128_v52 = vmul.f32 0.5, %v2459_v49  ;;  %v1133_v59 = vmul.f32 0.5, %v2475_v57 }
 0x408   :  { %2547 = vtanh.f32 %v1124_v51 }
 0x409   :  { %2549 = vtanh.f32 %v1128_v52 }
 0x40a   :  { %2551 = vtanh.f32 %v2474_v55 }
 0x40b   :  { %2553 = vtanh.f32 %v1133_v59 }
 0x412   :  { %v2548_v61 = vpop.eup %2547 }
 0x413   :  { %v2550_v1 = vpop.eup %2549  ;;  %v1126_v5 = vadd.f32 1.0, %v2548_v61 }
 0x414   :  { %v1130_v7 = vadd.f32 1.0, %v2550_v1  ;;  %v2552_v11 = vpop.eup %2551 }
 0x415   :  { %v1127_v8 = vmul.f32 0.5, %v1126_v5  ;;  %v2554_v30 = vpop.eup %2553 }
 0x416   :  { %v1131_v12 = vmul.f32 0.5, %v1130_v7  ;;  %v1135_v31 = vadd.f32 1.0, %v2554_v30 }
 0x417   :  { %v1138_v15 = vmul.f32 %v2552_v11, %v1127_v8 }
 0x418   :  { %v1137_v17 = vmul.f32 %v1131_v12, %v3288_v21  ;;  %v1136_v33 = vmul.f32 0.5, %v1135_v31 }
 0x41a   :  { %v3333_v20 = vadd.f32 %v1138_v15, %v1137_v17 }
 0x41c   :  { %2555 = vtanh.f32 %v3333_v20 }
 0x426   :  { %v2556_v34 = vpop.eup %2555 }
 0x427   :  { %v1141_v37 = vmul.f32 %v2556_v34, %v1136_v33 }
 0x429   :  { %1871 = vst [vmem:[%s3480_s4 + $0x18] sm:$0xff] %v1141_v37  ;;  %1221 = vmatmul.mubr.f32.vlgmr.msra.gmra.mrb[8].mxu0 %v1141_v37  ;;  %1292 = vmatmul.mubr.f32.vlgmr.msra.gmra.mrb[8].mxu1 %v1141_v37 }
 0x42a   :  { %2263 = vmatpush1.bf16.msra.mxu0 %v2854_v47  ;;  %2295 = vmatpush1.bf16.msra.mxu1 %v2863_v50 }
 0x42b   :  { %2265 = vmatprep.subr.bf16.mxu0 %v2872_v53  ;;  %2297 = vmatprep.subr.bf16.mxu1 %v2880_v56 }
 0x42c   :  { %1398 = vmatprep.mubr.f32.mxu0 %v2597_v3  ;;  %1469 = vmatprep.mubr.f32.mxu1 %v2597_v3 }
 0x42e   :  { %2267 = vmatpush1.bf16.msra.mxu0 %v2892_v60  ;;  %2299 = vmatpush1.bf16.msra.mxu1 %v2902_v63 }
 0x42f   :  { %2269 = vmatprep.subr.bf16.mxu0 %v2912_v2  ;;  %2301 = vmatprep.subr.bf16.mxu1 %v2921_v6 }
 0x432   :  { %2271 = vmatpush1.bf16.msra.mxu0 %v2933_v10  ;;  %2303 = vmatpush1.bf16.msra.mxu1 %v2943_v13 }
 0x433   :  { %2273 = vmatprep.subr.bf16.mxu0 %v2953_v16  ;;  %2305 = vmatprep.subr.bf16.mxu1 %v2962_v19 }
 0x436   :  { %2275 = vmatpush1.bf16.msra.mxu0 %v2974_v23  ;;  %2307 = vmatpush1.bf16.msra.mxu1 %v2984_v26 }
 0x437   :  { %2277 = vmatprep.subr.bf16.mxu0 %v2994_v29  ;;  %2309 = vmatprep.subr.bf16.mxu1 %v3003_v32 }
 0x43a   :  { %2279 = vmatpush1.bf16.msra.mxu0 %v3015_v36  ;;  %2311 = vmatpush1.bf16.msra.mxu1 %v3025_v40 }
 0x43b   :  { %2281 = vmatprep.subr.bf16.mxu0 %v3035_v44  ;;  %2313 = vmatprep.subr.bf16.mxu1 %v3044_v48 }
 0x43e   :  { %2283 = vmatpush1.bf16.msra.mxu0 %v3056_v54  ;;  %2315 = vmatpush1.bf16.msra.mxu1 %v3066_v58 }
 0x43f   :  { %2285 = vmatprep.subr.bf16.mxu0 %v3076_v62  ;;  %2317 = vmatprep.subr.bf16.mxu1 %v3085_v4 }
 0x442   :  { %2287 = vmatpush1.bf16.msra.mxu0 %v3097_v9  ;;  %2319 = vmatpush1.bf16.msra.mxu1 %v3107_v14 }
 0x443   :  { %2289 = vmatprep.subr.bf16.mxu0 %v3117_v18  ;;  %2321 = vmatprep.subr.bf16.mxu1 %v3126_v22 }
 0x446   :  { %2291 = vmatpush1.bf16.msra.mxu0 %v3132_v25  ;;  %2323 = vmatpush1.bf16.msra.mxu1 %v3136_v27 }
 0x447   :  { %2325 = vmatprep.subr.bf16.mxu0 %v2829_v38  ;;  %2357 = vmatprep.subr.bf16.mxu1 %v2837_v41 }
 0x4fc   :  { %v1222_v21 = vpop.f32.mrb[8].mxu0  ;;  %v1293_v24 = vpop.f32.mrb[8].mxu1 }
 0x4fd   :  { %v2460_v28 = vadd.f32 %v1222_v21, %v3186_v35  ;;  %v1224_v42 = vpop.f32.mrb[9].mxu0  ;;  %v1295_v43 = vpop.f32.mrb[9].mxu1  ;;  %v2476_v52 = vadd.f32 %v1293_v24, %v3191_v45 }
 0x4fe   :  { %v2461_v46 = vadd.f32 %v1224_v42, %v3188_v39  ;;  %v2477_v55 = vadd.f32 %v1295_v43, %v3195_v0 }
 0x4ff   :  { %v1302_v49 = vmul.f32 0.5, %v2460_v28 }
 0x500   :  { %v1306_v51 = vmul.f32 0.5, %v2461_v46  ;;  %v1311_v57 = vmul.f32 0.5, %v2477_v55 }
 0x501   :  { %2557 = vtanh.f32 %v1302_v49 }
 0x502   :  { %2559 = vtanh.f32 %v1306_v51 }
 0x503   :  { %2561 = vtanh.f32 %v2476_v52 }
 0x504   :  { %2563 = vtanh.f32 %v1311_v57 }
 0x50b   :  { %v2558_v59 = vpop.eup %2557 }
 0x50c   :  { %v2560_v61 = vpop.eup %2559  ;;  %v1304_v1 = vadd.f32 1.0, %v2558_v59 }
 0x50d   :  { %v1308_v5 = vadd.f32 1.0, %v2560_v61  ;;  %v2562_v8 = vpop.eup %2561 }
 0x50e   :  { %v1305_v7 = vmul.f32 0.5, %v1304_v1  ;;  %v2564_v30 = vpop.eup %2563 }
 0x50f   :  { %v1309_v11 = vmul.f32 0.5, %v1308_v5  ;;  %v1313_v31 = vadd.f32 1.0, %v2564_v30 }
 0x510   :  { %v1316_v12 = vmul.f32 %v2562_v8, %v1305_v7 }
 0x511   :  { %v1315_v15 = vmul.f32 %v1309_v11, %v3333_v20  ;;  %v1314_v33 = vmul.f32 0.5, %v1313_v31 }
 0x513   :  { %v3378_v17 = vadd.f32 %v1316_v12, %v1315_v15 }
 0x515   :  { %2565 = vtanh.f32 %v3378_v17 }
 0x51f   :  { %v2566_v34 = vpop.eup %2565 }
 0x520   :  { %v1319_v37 = vmul.f32 %v2566_v34, %v1314_v33 }
 0x522   :  { %1872 = vst [vmem:[%s3480_s4 + $0x20] sm:$0xff] %v1319_v37  ;;  %1399 = vmatmul.mubr.f32.vlgmr.msra.gmra.mrb[10].mxu0 %v1319_v37  ;;  %1470 = vmatmul.mubr.f32.vlgmr.msra.gmra.mrb[10].mxu1 %v1319_v37 }
 0x523   :  { %2327 = vmatpush1.bf16.msra.mxu0 %v2854_v47  ;;  %2359 = vmatpush1.bf16.msra.mxu1 %v2863_v50 }
 0x524   :  { %2329 = vmatprep.subr.bf16.mxu0 %v2872_v53  ;;  %2361 = vmatprep.subr.bf16.mxu1 %v2880_v56 }
 0x525   :  { %1576 = vmatprep.mubr.f32.mxu0 %v2597_v3  ;;  %1647 = vmatprep.mubr.f32.mxu1 %v2597_v3 }
 0x527   :  { %2331 = vmatpush1.bf16.msra.mxu0 %v2892_v60  ;;  %2363 = vmatpush1.bf16.msra.mxu1 %v2902_v63 }
 0x528   :  { %2333 = vmatprep.subr.bf16.mxu0 %v2912_v2  ;;  %2365 = vmatprep.subr.bf16.mxu1 %v2921_v6 }
 0x52b   :  { %2335 = vmatpush1.bf16.msra.mxu0 %v2933_v10  ;;  %2367 = vmatpush1.bf16.msra.mxu1 %v2943_v13 }
 0x52c   :  { %2337 = vmatprep.subr.bf16.mxu0 %v2953_v16  ;;  %2369 = vmatprep.subr.bf16.mxu1 %v2962_v19 }
 0x52f   :  { %2339 = vmatpush1.bf16.msra.mxu0 %v2974_v23  ;;  %2371 = vmatpush1.bf16.msra.mxu1 %v2984_v26 }
 0x530   :  { %2341 = vmatprep.subr.bf16.mxu0 %v2994_v29  ;;  %2373 = vmatprep.subr.bf16.mxu1 %v3003_v32 }
 0x533   :  { %2343 = vmatpush1.bf16.msra.mxu0 %v3015_v36  ;;  %2375 = vmatpush1.bf16.msra.mxu1 %v3025_v40 }
 0x534   :  { %2345 = vmatprep.subr.bf16.mxu0 %v3035_v44  ;;  %2377 = vmatprep.subr.bf16.mxu1 %v3044_v48 }
 0x537   :  { %2347 = vmatpush1.bf16.msra.mxu0 %v3056_v54  ;;  %2379 = vmatpush1.bf16.msra.mxu1 %v3066_v58 }
 0x538   :  { %2349 = vmatprep.subr.bf16.mxu0 %v3076_v62  ;;  %2381 = vmatprep.subr.bf16.mxu1 %v3085_v4 }
 0x53b   :  { %2351 = vmatpush1.bf16.msra.mxu0 %v3097_v9  ;;  %2383 = vmatpush1.bf16.msra.mxu1 %v3107_v14 }
 0x53c   :  { %2353 = vmatprep.subr.bf16.mxu0 %v3117_v18  ;;  %2385 = vmatprep.subr.bf16.mxu1 %v3126_v22 }
 0x53f   :  { %2355 = vmatpush1.bf16.msra.mxu0 %v3132_v25  ;;  %2387 = vmatpush1.bf16.msra.mxu1 %v3136_v27 }
 0x540   :  { %2389 = vmatprep.subr.bf16.mxu0 %v2829_v38  ;;  %2421 = vmatprep.subr.bf16.mxu1 %v2837_v41 }
 0x5f5   :  { %v1400_v20 = vpop.f32.mrb[10].mxu0  ;;  %v1471_v21 = vpop.f32.mrb[10].mxu1 }
 0x5f6   :  { %v2462_v24 = vadd.f32 %v1400_v20, %v3186_v35  ;;  %v1402_v28 = vpop.f32.mrb[11].mxu0  ;;  %v1473_v42 = vpop.f32.mrb[11].mxu1  ;;  %v2478_v51 = vadd.f32 %v1471_v21, %v3191_v45 }
 0x5f7   :  { %v2463_v43 = vadd.f32 %v1402_v28, %v3188_v39  ;;  %v2479_v52 = vadd.f32 %v1473_v42, %v3195_v0 }
 0x5f8   :  { %v1480_v46 = vmul.f32 0.5, %v2462_v24 }
 0x5f9   :  { %v1484_v49 = vmul.f32 0.5, %v2463_v43  ;;  %v1489_v38 = vmul.f32 0.5, %v2479_v52 }
 0x5fa   :  { %2567 = vtanh.f32 %v1480_v46 }
 0x5fb   :  { %2569 = vtanh.f32 %v1484_v49 }
 0x5fc   :  { %2571 = vtanh.f32 %v2478_v51 }
 0x5fd   :  { %2573 = vtanh.f32 %v1489_v38 }
 0x604   :  { %v2568_v55 = vpop.eup %2567 }
 0x605   :  { %v2570_v41 = vpop.eup %2569  ;;  %v1482_v57 = vadd.f32 1.0, %v2568_v55 }
 0x606   :  { %v1486_v59 = vadd.f32 1.0, %v2570_v41  ;;  %v2572_v1 = vpop.eup %2571 }
 0x607   :  { %v1483_v61 = vmul.f32 0.5, %v1482_v57  ;;  %v2574_v12 = vpop.eup %2573 }
 0x608   :  { %v1487_v5 = vmul.f32 0.5, %v1486_v59  ;;  %v1491_v15 = vadd.f32 1.0, %v2574_v12 }
 0x609   :  { %v1494_v7 = vmul.f32 %v2572_v1, %v1483_v61 }
 0x60a   :  { %v1493_v8 = vmul.f32 %v1487_v5, %v3378_v17  ;;  %v1492_v30 = vmul.f32 0.5, %v1491_v15 }
 0x60c   :  { %v3423_v11 = vadd.f32 %v1494_v7, %v1493_v8 }
 0x60e   :  { %2575 = vtanh.f32 %v3423_v11 }
 0x618   :  { %v2576_v31 = vpop.eup %2575 }
 0x619   :  { %v1497_v33 = vmul.f32 %v2576_v31, %v1492_v30 }
 0x61b   :  { %1873 = vst [vmem:[%s3480_s4 + $0x28] sm:$0xff] %v1497_v33  ;;  %1577 = vmatmul.mubr.f32.vlgmr.msra.gmra.mrb[12].mxu0 %v1497_v33  ;;  %1648 = vmatmul.mubr.f32.vlgmr.msra.gmra.mrb[12].mxu1 %v1497_v33 }
 0x61c   :  { %2391 = vmatpush1.bf16.msra.mxu0 %v2854_v47  ;;  %2423 = vmatpush1.bf16.msra.mxu1 %v2863_v50 }
 0x61d   :  { %2393 = vmatprep.subr.bf16.mxu0 %v2872_v53  ;;  %2425 = vmatprep.subr.bf16.mxu1 %v2880_v56 }
 0x61e   :  { %1754 = vmatprep.mubr.f32.mxu0 %v2597_v3  ;;  %1825 = vmatprep.mubr.f32.mxu1 %v2597_v3 }
 0x620   :  { %2395 = vmatpush1.bf16.msra.mxu0 %v2892_v60  ;;  %2427 = vmatpush1.bf16.msra.mxu1 %v2902_v63 }
 0x621   :  { %2397 = vmatprep.subr.bf16.mxu0 %v2912_v2  ;;  %2429 = vmatprep.subr.bf16.mxu1 %v2921_v6 }
 0x624   :  { %2399 = vmatpush1.bf16.msra.mxu0 %v2933_v10  ;;  %2431 = vmatpush1.bf16.msra.mxu1 %v2943_v13 }
 0x625   :  { %2401 = vmatprep.subr.bf16.mxu0 %v2953_v16  ;;  %2433 = vmatprep.subr.bf16.mxu1 %v2962_v19 }
 0x628   :  { %2403 = vmatpush1.bf16.msra.mxu0 %v2974_v23  ;;  %2435 = vmatpush1.bf16.msra.mxu1 %v2984_v26 }
 0x629   :  { %2405 = vmatprep.subr.bf16.mxu0 %v2994_v29  ;;  %2437 = vmatprep.subr.bf16.mxu1 %v3003_v32 }
 0x62c   :  { %2407 = vmatpush1.bf16.msra.mxu0 %v3015_v36  ;;  %2439 = vmatpush1.bf16.msra.mxu1 %v3025_v40 }
 0x62d   :  { %2409 = vmatprep.subr.bf16.mxu0 %v3035_v44  ;;  %2441 = vmatprep.subr.bf16.mxu1 %v3044_v48 }
 0x630   :  { %2411 = vmatpush1.bf16.msra.mxu0 %v3056_v54  ;;  %2443 = vmatpush1.bf16.msra.mxu1 %v3066_v58 }
 0x631   :  { %2413 = vmatprep.subr.bf16.mxu0 %v3076_v62  ;;  %2445 = vmatprep.subr.bf16.mxu1 %v3085_v4 }
 0x634   :  { %2415 = vmatpush1.bf16.msra.mxu0 %v3097_v9  ;;  %2447 = vmatpush1.bf16.msra.mxu1 %v3107_v14 }
 0x635   :  { %2417 = vmatprep.subr.bf16.mxu0 %v3117_v18  ;;  %2449 = vmatprep.subr.bf16.mxu1 %v3126_v22 }
 0x638   :  { %2419 = vmatpush1.bf16.msra.mxu0 %v3132_v25  ;;  %2451 = vmatpush1.bf16.msra.mxu1 %v3136_v27 }
 0x6ee   :  { %v1578_v3 = vpop.f32.mrb[12].mxu0  ;;  %v1649_v47 = vpop.f32.mrb[12].mxu1 }
 0x6ef   :  { %v2464_v50 = vadd.f32 %v1578_v3, %v3186_v35  ;;  %v1580_v53 = vpop.f32.mrb[13].mxu0  ;;  %v1651_v56 = vpop.f32.mrb[13].mxu1  ;;  %v2480_v6 = vadd.f32 %v1649_v47, %v3191_v45 }
 0x6f0   :  { %v2465_v60 = vadd.f32 %v1580_v53, %v3188_v39  ;;  %v2481_v10 = vadd.f32 %v1651_v56, %v3195_v0 }
 0x6f1   :  { %v1658_v63 = vmul.f32 0.5, %v2464_v50 }
 0x6f2   :  { %v1662_v2 = vmul.f32 0.5, %v2465_v60  ;;  %v1667_v13 = vmul.f32 0.5, %v2481_v10 }
 0x6f3   :  { %2577 = vtanh.f32 %v1658_v63 }
 0x6f4   :  { %2579 = vtanh.f32 %v1662_v2 }
 0x6f5   :  { %2581 = vtanh.f32 %v2480_v6 }
 0x6f6   :  { %2583 = vtanh.f32 %v1667_v13 }
 0x6fd   :  { %v2578_v16 = vpop.eup %2577 }
 0x6fe   :  { %v2580_v19 = vpop.eup %2579  ;;  %v1660_v23 = vadd.f32 1.0, %v2578_v16 }
 0x6ff   :  { %v1664_v26 = vadd.f32 1.0, %v2580_v19  ;;  %v2582_v32 = vpop.eup %2581 }
 0x700   :  { %v1661_v29 = vmul.f32 0.5, %v1660_v23  ;;  %v2584_v54 = vpop.eup %2583 }
 0x701   :  { %v1665_v36 = vmul.f32 0.5, %v1664_v26  ;;  %v1669_v58 = vadd.f32 1.0, %v2584_v54 }
 0x702   :  { %v1672_v40 = vmul.f32 %v2582_v32, %v1661_v29 }
 0x703   :  { %v1671_v44 = vmul.f32 %v1665_v36, %v3423_v11  ;;  %v1670_v62 = vmul.f32 0.5, %v1669_v58 }
 0x705   :  { %v1673_v48 = vadd.f32 %v1672_v40, %v1671_v44 }
 0x707   :  { %2585 = vtanh.f32 %v1673_v48 }
 0x711   :  { %v2586_v4 = vpop.eup %2585 }
 0x712   :  { %v1675_v9 = vmul.f32 %v2586_v4, %v1670_v62 }
 0x714   :  { %1874 = vst [vmem:[%s3480_s4 + $0x30] sm:$0xff] %v1675_v9  ;;  %1755 = vmatmul.mubr.f32.vlgmr.msra.gmra.mrb[14].mxu0 %v1675_v9  ;;  %1826 = vmatmul.mubr.f32.vlgmr.msra.gmra.mrb[14].mxu1 %v1675_v9 }
 0x7e7   :  { %v1756_v14 = vpop.f32.mrb[14].mxu0  ;;  %v1827_v18 = vpop.f32.mrb[14].mxu1 }
 0x7e8   :  { %v2466_v22 = vadd.f32 %v1756_v14, %v3186_v35  ;;  %v1758_v25 = vpop.f32.mrb[15].mxu0  ;;  %v1829_v27 = vpop.f32.mrb[15].mxu1  ;;  %v2482_v20 = vadd.f32 %v1827_v18, %v3191_v45 }
 0x7e9   :  { %v2467_v17 = vadd.f32 %v1758_v25, %v3188_v39  ;;  %v2483_v21 = vadd.f32 %v1829_v27, %v3195_v0 }
 0x7ea   :  { %v1836_v34 = vmul.f32 0.5, %v2466_v22 }
 0x7eb   :  { %v1840_v37 = vmul.f32 0.5, %v2467_v17  ;;  %v1845_v24 = vmul.f32 0.5, %v2483_v21 }
 0x7ec   :  { %2587 = vtanh.f32 %v1836_v34 }
 0x7ed   :  { %2589 = vtanh.f32 %v1840_v37 }
 0x7ee   :  { %2591 = vtanh.f32 %v2482_v20 }
 0x7ef   :  { %2593 = vtanh.f32 %v1845_v24 }
 0x7f6   :  { %v2588_v28 = vpop.eup %2587 }
 0x7f7   :  { %v2590_v42 = vpop.eup %2589  ;;  %v1838_v43 = vadd.f32 1.0, %v2588_v28 }
 0x7f8   :  { %v1842_v46 = vadd.f32 1.0, %v2590_v42  ;;  %v2592_v49 = vpop.eup %2591 }
 0x7f9   :  { %v1839_v35 = vmul.f32 0.5, %v1838_v43  ;;  %v2594_v55 = vpop.eup %2593 }
 0x7fa   :  { %v1843_v51 = vmul.f32 0.5, %v1842_v46  ;;  %v1847_v41 = vadd.f32 1.0, %v2594_v55 }
 0x7fb   :  { %v1850_v52 = vmul.f32 %v2592_v49, %v1839_v35 }
 0x7fc   :  { %v1849_v39 = vmul.f32 %v1843_v51, %v1673_v48  ;;  %v1848_v45 = vmul.f32 0.5, %v1847_v41 }
 0x7fe   :  { %v1851_v38 = vadd.f32 %v1850_v52, %v1849_v39 }
 0x800   :  { %2595 = vtanh.f32 %v1851_v38 }
 0x80a   :  { %v2596_v57 = vpop.eup %2595 }
 0x80b   :  { %v1853_v59 = vmul.f32 %v2596_v57, %v1848_v45 }
 0x80d   :  { %1875 = vst [vmem:[%s3480_s4 + $0x38] sm:$0xff] %v1853_v59 }

</bundles_post_ra>
